<compile_context>
chip_gen: v5e
topology: v5e:2x2
jax: 0.10.0
libtpu: 0.0.40
codegen_flags: <defaults>
</compile_context>

<pallas_src>
import functools

import jax
import jax.numpy as jnp
from jax.experimental import pallas as pl
from jax.experimental.pallas import tpu as pltpu

_EPS = 1e-6  # nn.LayerNorm(token_dim, eps=1e-06) in the PyTorch module


# ----------------------------------------------------------------------------
# Shared math helpers (pure jnp) for the plain-JAX reference.
# ----------------------------------------------------------------------------
def _layernorm(x, g, b, eps=_EPS):
    mu = jnp.mean(x, axis=-1, keepdims=True)
    var = jnp.mean((x - mu) ** 2, axis=-1, keepdims=True)
    return (x - mu) * jax.lax.rsqrt(var + eps) * g + b


def _mhsa_ref(x, wq, bq, wk, bk, wv, bv, n_heads):
    """Reference multi-head self-attention (no output projection), x: (Bs, L, D)."""
    D = x.shape[-1]
    hd = D // n_heads
    q = jnp.einsum("bld,de->ble", x, wq) + bq
    k = jnp.einsum("bld,de->ble", x, wk) + bk
    v = jnp.einsum("bld,de->ble", x, wv) + bv
    scale = 1.0 / float(hd) ** 0.5
    outs = []
    for h in range(n_heads):
        qh = q[..., h * hd:(h + 1) * hd]
        kh = k[..., h * hd:(h + 1) * hd]
        vh = v[..., h * hd:(h + 1) * hd]
        att = jnp.einsum("bqd,bkd->bqk", qh, kh) * scale
        att = att - jnp.max(att, axis=-1, keepdims=True)
        att = jnp.exp(att)
        att = att / jnp.sum(att, axis=-1, keepdims=True)
        outs.append(jnp.einsum("bqk,bkd->bqd", att, vh))
    return jnp.concatenate(outs, axis=-1)


# ----------------------------------------------------------------------------
# Pallas kernel: one full OCVP-Par layer for a single batch element.
# ----------------------------------------------------------------------------
def ocvp_par_kernel(n_heads,
                    x_ref,
                    g_att_ref, b_att_ref,
                    wqkv_ref, bqkv_ref,
                    g_mlp_ref, b_mlp_ref,
                    w1_ref, b1_ref, w2_ref, b2_ref,
                    o_ref):
    _, T, S, D = x_ref.shape
    hd = D // n_heads
    L = T * S

    # (T, S, D) -> (T*S, D): leading-dim merge only (lane dim untouched).
    x = x_ref[0].astype(jnp.float32).reshape(L, D)

    # ---- pre-LN (f32), shared by both attention branches and the residual ----
    g_att = g_att_ref[...]
    b_att = b_att_ref[...]
    mu = jnp.mean(x, axis=-1, keepdims=True)
    var = jnp.mean(jnp.square(x - mu), axis=-1, keepdims=True)
    xn = (x - mu) * jax.lax.rsqrt(var + _EPS) * g_att + b_att          # (L, D) f32

    # ---- fused Q/K/V for BOTH branches: one (L, D) @ (D, 6D) bf16 matmul ----
    # layout of the 6D axis: [q_obj | k_obj | v_obj | q_time | k_time | v_time]
    # (1/sqrt(hd) already folded into q weights/biases host-side)
    qkv = jnp.dot(xn.astype(jnp.bfloat16), wqkv_ref[...],
                  preferred_element_type=jnp.float32) + bqkv_ref[...]  # (L, 6D) f32

    # object branch operands: (T, S, 3D), bf16 for the attention matmuls
    o_qkv = qkv[:, 0:3 * D].reshape(T, S, 3 * D).astype(jnp.bfloat16)
    # time branch: ONE transpose of the packed q|k|v slab -> (S, T, 3D)
    t_qkv = jnp.transpose(qkv[:, 3 * D:6 * D].reshape(T, S, 3 * D),
                          (1, 0, 2)).astype(jnp.bfloat16)

    def _attend(slab, s0):
        # slab: (batch, len, 3D) bf16; head lane-slice starts at s0 (scale pre-folded)
        q = slab[:, :, 0 * D + s0: 0 * D + s0 + hd]
        k = slab[:, :, 1 * D + s0: 1 * D + s0 + hd]
        v = slab[:, :, 2 * D + s0: 2 * D + s0 + hd]
        s = jnp.einsum("bqd,bkd->bqk", q, k, preferred_element_type=jnp.float32)
        s = s - jnp.max(s, axis=-1, keepdims=True)
        p = jnp.exp(s)
        p = p * pl.reciprocal(jnp.sum(p, axis=-1, keepdims=True), approx=True)
        return jnp.einsum("bqk,bkd->bqd", p.astype(jnp.bfloat16), v,
                          preferred_element_type=jnp.float32)

    # static unroll over heads (n_heads is small); rank-3 einsums only
    obj_heads = [_attend(o_qkv, h * hd) for h in range(n_heads)]       # (T, S, hd)
    tim_heads = [_attend(t_qkv, h * hd) for h in range(n_heads)]       # (S, T, hd)

    obj = jnp.concatenate(obj_heads, axis=-1).reshape(L, D)
    tim = jnp.transpose(jnp.concatenate(tim_heads, axis=-1), (1, 0, 2)).reshape(L, D)

    # parallel merge + residual (residual is the post-LN tensor, per the module)
    y = 0.5 * (obj + tim) + xn                                         # (L, D) f32

    # ---- MLP branch ----
    g_mlp = g_mlp_ref[...]
    b_mlp = b_mlp_ref[...]
    mu2 = jnp.mean(y, axis=-1, keepdims=True)
    var2 = jnp.mean(jnp.square(y - mu2), axis=-1, keepdims=True)
    z = (y - mu2) * jax.lax.rsqrt(var2 + _EPS) * g_mlp + b_mlp

    h1 = jnp.dot(z.astype(jnp.bfloat16), w1_ref[...],
                 preferred_element_type=jnp.float32) + b1_ref[...]
    # TODO(synk): exact erf GELU (PyTorch default) not used; tanh approximation.
    h1 = jax.nn.gelu(h1, approximate=True)
    z2 = jnp.dot(h1.astype(jnp.bfloat16), w2_ref[...],
                 preferred_element_type=jnp.float32) + b2_ref[...]

    o_ref[0] = (z2 + y).reshape(T, S, D).astype(o_ref.dtype)


# ----------------------------------------------------------------------------
# Host-side parameter packing (fold scale, fuse QKV, cast matmul weights bf16).
# ----------------------------------------------------------------------------
def pack_params(raw, n_heads):
    (g_att, b_att, owq, obq, owk, obk, owv, obv,
     twq, tbq, twk, tbk, twv, tbv, g_mlp, b_mlp, w1, b1, w2, b2) = raw
    D = owq.shape[0]
    hd = D // n_heads
    scale = 1.0 / float(hd) ** 0.5
    w_qkv = jnp.concatenate(
        [owq * scale, owk, owv, twq * scale, twk, twv], axis=1).astype(jnp.bfloat16)
    b_qkv = jnp.concatenate(
        [obq * scale, obk, obv, tbq * scale, tbk, tbv], axis=1).astype(jnp.float32)
    return (g_att, b_att, w_qkv, b_qkv, g_mlp, b_mlp,
            w1.astype(jnp.bfloat16), b1, w2.astype(jnp.bfloat16), b2)


# ----------------------------------------------------------------------------
# Wrapper: pallas_call with full-tensor-per-batch-element blocking.
# ----------------------------------------------------------------------------
def ocvp_par_forward(x, packed_params, n_heads):
    """x: (B, N_imgs, N_slots, D); packed_params from pack_params()."""
    B, T, S, D = x.shape
    H = packed_params[6].shape[1]       # w1: (D, H)
    L = T * S

    # All params are 2-D; full-array blocks, constant index map.
    weight_specs = [pl.BlockSpec(p.shape, lambda b: (0, 0)) for p in packed_params]

    grid_spec = pltpu.PrefetchScalarGridSpec(
        num_scalar_prefetch=0,
        grid=(B,),
        in_specs=[pl.BlockSpec((1, T, S, D), lambda b: (b, 0, 0, 0))]
                 + weight_specs,
        out_specs=pl.BlockSpec((1, T, S, D), lambda b: (b, 0, 0, 0)),
    )

    flops = int(2 * B * L * D * (6 * D)            # fused QKV projection
                + 4 * B * T * S * S * D            # object attention (QK^T + PV)
                + 4 * B * S * T * T * D            # time attention
                + 4 * B * L * D * H)               # MLP (two linears)
    transcendentals = int(B * T * n_heads * S * S  # exp (object softmax)
                          + B * S * n_heads * T * T  # exp (time softmax)
                          + B * L * H               # gelu
                          + 2 * B * L)              # rsqrt (two LayerNorms)
    bytes_accessed = int(x.size * x.dtype.itemsize * 2
                         + sum(p.size * p.dtype.itemsize for p in packed_params))

    return pl.pallas_call(
        functools.partial(ocvp_par_kernel, n_heads),
        out_shape=jax.ShapeDtypeStruct(x.shape, x.dtype),
        grid_spec=grid_spec,
        compiler_params=pltpu.CompilerParams(
            dimension_semantics=("parallel",)),   # v7x: 2 TCs take 1 batch elem each
        cost_estimate=pl.CostEstimate(flops=flops,
                                      transcendentals=transcendentals,
                                      bytes_accessed=bytes_accessed),
    )(x, *packed_params)


# ----------------------------------------------------------------------------
# Pure-JAX reference (f32, unpacked weights) for validation.
# ----------------------------------------------------------------------------
def ocvp_par_reference(x, raw, n_heads):
    (g_att, b_att, owq, obq, owk, obk, owv, obv,
     twq, tbq, twk, tbk, twv, tbv, g_mlp, b_mlp, w1, b1, w2, b2) = raw
    B, T, S, D = x.shape
    xn = _layernorm(x.astype(jnp.float32), g_att, b_att)
    obj = _mhsa_ref(xn.reshape(B * T, S, D), owq, obq, owk, obk, owv, obv,
                    n_heads).reshape(B, T, S, D)
    xt = jnp.transpose(xn, (0, 2, 1, 3)).reshape(B * S, T, D)
    tim = _mhsa_ref(xt, twq, tbq, twk, tbk, twv, tbv,
                    n_heads).reshape(B, S, T, D)
    tim = jnp.transpose(tim, (0, 2, 1, 3))
    y = 0.5 * (obj + tim) + xn
    z = _layernorm(y, g_mlp, b_mlp)
    h1 = jax.nn.gelu(jnp.einsum("btsd,dh->btsh", z, w1) + b1, approximate=True)
    z2 = jnp.einsum("btsh,hd->btsd", h1, w2) + b2
    return (z2 + y).astype(x.dtype)


# ----------------------------------------------------------------------------
# Deterministic synthetic parameters (shapes follow OCVPParLayer.__init__).
# ----------------------------------------------------------------------------
def init_params(key, D, H):
    keys = jax.random.split(key, 16)

    def w(k, shape, scale=0.02):
        return (scale * jax.random.normal(k, shape)).astype(jnp.float32)

    g_att = jnp.ones((1, D), jnp.float32)
    b_att = jnp.zeros((1, D), jnp.float32)
    g_mlp = jnp.ones((1, D), jnp.float32)
    b_mlp = jnp.zeros((1, D), jnp.float32)

    owq, obq = w(keys[0], (D, D)), w(keys[1], (1, D))
    owk, obk = w(keys[2], (D, D)), w(keys[3], (1, D))
    owv, obv = w(keys[4], (D, D)), w(keys[5], (1, D))
    twq, tbq = w(keys[6], (D, D)), w(keys[7], (1, D))
    twk, tbk = w(keys[8], (D, D)), w(keys[9], (1, D))
    twv, tbv = w(keys[10], (D, D)), w(keys[11], (1, D))
    w1, b1 = w(keys[12], (D, H)), w(keys[13], (1, H))
    w2, b2 = w(keys[14], (H, D)), w(keys[15], (1, D))

    return (g_att, b_att, owq, obq, owk, obk, owv, obv,
            twq, tbq, twk, tbk, twv, tbv, g_mlp, b_mlp, w1, b1, w2, b2)


if __name__ == "__main__":
    B, T, S, D, H, NH = 2, 8, 4, 32, 64, 4   # batch, imgs, slots, token_dim, hidden, heads
    key = jax.random.PRNGKey(0)
    kx, kp = jax.random.split(key)
    x = jax.random.normal(kx, (B, T, S, D), jnp.float32)
    raw = init_params(kp, D, H)
    packed = pack_params(raw, NH)

    out = jax.block_until_ready(ocvp_par_forward(x, packed, NH))

    ref = ocvp_par_reference(x, raw, NH)
    assert out.shape == x.shape and out.dtype == x.dtype
    max_err = float(jnp.max(jnp.abs(out - ref)))
    assert jnp.allclose(out, ref, atol=2e-2, rtol=2e-2), max_err

    print("KERNEL_OK")
</pallas_src>

<mosaic_0001>
module attributes {stable_mosaic.version = 11 : i64} {
  func.func @ocvp_par_kernel(%arg0: i32, %arg1: memref<1x8x4x32xf32, #tpu.memory_space<vmem>>, %arg2: memref<1x32xf32, #tpu.memory_space<vmem>>, %arg3: memref<1x32xf32, #tpu.memory_space<vmem>>, %arg4: memref<32x192xbf16, #tpu.memory_space<vmem>>, %arg5: memref<1x192xf32, #tpu.memory_space<vmem>>, %arg6: memref<1x32xf32, #tpu.memory_space<vmem>>, %arg7: memref<1x32xf32, #tpu.memory_space<vmem>>, %arg8: memref<32x64xbf16, #tpu.memory_space<vmem>>, %arg9: memref<1x64xf32, #tpu.memory_space<vmem>>, %arg10: memref<64x32xbf16, #tpu.memory_space<vmem>>, %arg11: memref<1x32xf32, #tpu.memory_space<vmem>>, %arg12: memref<1x8x4x32xf32, #tpu.memory_space<vmem>>) attributes {dimension_semantics = [#tpu.dimension_semantics<parallel>], iteration_bounds = array<i64: 2>, scalar_prefetch = 0 : i64, scratch_operands = 0 : i64, tpu.core_type = #tpu.core_type<tc>, window_params = [{transform_indices = @transform_0, window_bounds = array<i64: 1, 8, 4, 32>}, {pipeline_mode = #tpu.pipeline_mode<synchronous>, transform_indices = @transform_1, window_bounds = array<i64: 1, 32>}, {pipeline_mode = #tpu.pipeline_mode<synchronous>, transform_indices = @transform_2, window_bounds = array<i64: 1, 32>}, {pipeline_mode = #tpu.pipeline_mode<synchronous>, transform_indices = @transform_3, window_bounds = array<i64: 32, 192>}, {pipeline_mode = #tpu.pipeline_mode<synchronous>, transform_indices = @transform_4, window_bounds = array<i64: 1, 192>}, {pipeline_mode = #tpu.pipeline_mode<synchronous>, transform_indices = @transform_5, window_bounds = array<i64: 1, 32>}, {pipeline_mode = #tpu.pipeline_mode<synchronous>, transform_indices = @transform_6, window_bounds = array<i64: 1, 32>}, {pipeline_mode = #tpu.pipeline_mode<synchronous>, transform_indices = @transform_7, window_bounds = array<i64: 32, 64>}, {pipeline_mode = #tpu.pipeline_mode<synchronous>, transform_indices = @transform_8, window_bounds = array<i64: 1, 64>}, {pipeline_mode = #tpu.pipeline_mode<synchronous>, transform_indices = @transform_9, window_bounds = array<i64: 64, 32>}, {pipeline_mode = #tpu.pipeline_mode<synchronous>, transform_indices = @transform_10, window_bounds = array<i64: 1, 32>}, {transform_indices = @transform_11, window_bounds = array<i64: 1, 8, 4, 32>}]} {
    %c0 = arith.constant 0 : index
    %c0_0 = arith.constant 0 : index
    %c0_1 = arith.constant 0 : index
    %c0_2 = arith.constant 0 : index
    %0 = vector.load %arg1[%c0, %c0_0, %c0_1, %c0_2] : memref<1x8x4x32xf32, #tpu.memory_space<vmem>>, vector<1x8x4x32xf32>
    %1 = vector.shape_cast %0 : vector<1x8x4x32xf32> to vector<8x4x32xf32>
    %2 = vector.shape_cast %1 : vector<8x4x32xf32> to vector<32x32xf32>
    %c0_3 = arith.constant 0 : index
    %c0_4 = arith.constant 0 : index
    %3 = vector.load %arg2[%c0_3, %c0_4] : memref<1x32xf32, #tpu.memory_space<vmem>>, vector<1x32xf32>
    %c0_5 = arith.constant 0 : index
    %c0_6 = arith.constant 0 : index
    %4 = vector.load %arg3[%c0_5, %c0_6] : memref<1x32xf32, #tpu.memory_space<vmem>>, vector<1x32xf32>
    %cst = arith.constant dense<0.000000e+00> : vector<32xf32>
    %5 = vector.multi_reduction <add>, %2, %cst [1] : vector<32x32xf32> to vector<32xf32>
    %6 = vector.shape_cast %5 : vector<32xf32> to vector<32x1xf32>
    %cst_7 = arith.constant 3.200000e+01 : f32
    %7 = vector.broadcast %cst_7 : f32 to vector<32x1xf32>
    %8 = arith.divf %6, %7 : vector<32x1xf32>
    %9 = vector.broadcast %8 : vector<32x1xf32> to vector<32x32xf32>
    %10 = arith.subf %2, %9 : vector<32x32xf32>
    %11 = arith.mulf %10, %10 : vector<32x32xf32>
    %cst_8 = arith.constant dense<0.000000e+00> : vector<32xf32>
    %12 = vector.multi_reduction <add>, %11, %cst_8 [1] : vector<32x32xf32> to vector<32xf32>
    %13 = vector.shape_cast %12 : vector<32xf32> to vector<32x1xf32>
    %cst_9 = arith.constant 3.200000e+01 : f32
    %14 = vector.broadcast %cst_9 : f32 to vector<32x1xf32>
    %15 = arith.divf %13, %14 : vector<32x1xf32>
    %16 = vector.broadcast %8 : vector<32x1xf32> to vector<32x32xf32>
    %17 = arith.subf %2, %16 : vector<32x32xf32>
    %cst_10 = arith.constant 9.99999997E-7 : f32
    %18 = vector.broadcast %cst_10 : f32 to vector<32x1xf32>
    %19 = arith.addf %15, %18 : vector<32x1xf32>
    %20 = math.rsqrt %19 : vector<32x1xf32>
    %21 = vector.broadcast %20 : vector<32x1xf32> to vector<32x32xf32>
    %22 = arith.mulf %17, %21 : vector<32x32xf32>
    %23 = vector.broadcast %3 : vector<1x32xf32> to vector<32x32xf32>
    %24 = arith.mulf %22, %23 : vector<32x32xf32>
    %25 = vector.broadcast %4 : vector<1x32xf32> to vector<32x32xf32>
    %26 = arith.addf %24, %25 : vector<32x32xf32>
    %27 = arith.truncf %26 : vector<32x32xf32> to vector<32x32xbf16>
    %c0_11 = arith.constant 0 : index
    %c0_12 = arith.constant 0 : index
    %28 = vector.load %arg4[%c0_11, %c0_12] : memref<32x192xbf16, #tpu.memory_space<vmem>>, vector<32x192xbf16>
    %cst_13 = arith.constant dense<0.000000e+00> : vector<32x192xf32>
    %29 = tpu.matmul %27, %28, %cst_13 {dimension_numbers = #tpu.dot_dimension_numbers<[1], [0], [0], [1], [0, 0, 1, 1], [], []>} : vector<32x32xbf16>, vector<32x192xbf16>, vector<32x192xf32> -> vector<32x192xf32>
    %c0_14 = arith.constant 0 : index
    %c0_15 = arith.constant 0 : index
    %30 = vector.load %arg5[%c0_14, %c0_15] : memref<1x192xf32, #tpu.memory_space<vmem>>, vector<1x192xf32>
    %31 = vector.broadcast %30 : vector<1x192xf32> to vector<32x192xf32>
    %32 = arith.addf %29, %31 : vector<32x192xf32>
    %33 = vector.extract_strided_slice %32 {offsets = [0, 0], sizes = [32, 96], strides = [1, 1]} : vector<32x192xf32> to vector<32x96xf32>
    %34 = vector.shape_cast %33 : vector<32x96xf32> to vector<8x4x96xf32>
    %35 = arith.truncf %34 : vector<8x4x96xf32> to vector<8x4x96xbf16>
    %36 = vector.extract_strided_slice %32 {offsets = [0, 96], sizes = [32, 96], strides = [1, 1]} : vector<32x192xf32> to vector<32x96xf32>
    %37 = vector.shape_cast %36 : vector<32x96xf32> to vector<8x4x96xf32>
    %38 = tpu.transpose %37, [1, 0, 2] : vector<8x4x96xf32> -> vector<4x8x96xf32>
    %39 = arith.truncf %38 : vector<4x8x96xf32> to vector<4x8x96xbf16>
    %40 = vector.extract_strided_slice %35 {offsets = [0, 0, 0], sizes = [8, 4, 8], strides = [1, 1, 1]} : vector<8x4x96xbf16> to vector<8x4x8xbf16>
    %41 = vector.extract_strided_slice %35 {offsets = [0, 0, 32], sizes = [8, 4, 8], strides = [1, 1, 1]} : vector<8x4x96xbf16> to vector<8x4x8xbf16>
    %42 = vector.extract_strided_slice %35 {offsets = [0, 0, 64], sizes = [8, 4, 8], strides = [1, 1, 1]} : vector<8x4x96xbf16> to vector<8x4x8xbf16>
    "tpu.trace_start"() <{level = 10 : i32, message = "bqd,bkd->bqk"}> : () -> ()
    %cst_16 = arith.constant dense<0.000000e+00> : vector<8x4x4xf32>
    %43 = tpu.matmul %40, %41, %cst_16 {dimension_numbers = #tpu.dot_dimension_numbers<[2], [2], [1], [1], [0, 0, 0, 1, 1, 1], [0], [0]>} : vector<8x4x8xbf16>, vector<8x4x8xbf16>, vector<8x4x4xf32> -> vector<8x4x4xf32>
    "tpu.trace_stop"() : () -> ()
    %cst_17 = arith.constant dense<0xFF800000> : vector<8x4xf32>
    %44 = vector.multi_reduction <maximumf>, %43, %cst_17 [2] : vector<8x4x4xf32> to vector<8x4xf32>
    %45 = vector.shape_cast %44 : vector<8x4xf32> to vector<8x4x1xf32>
    %46 = vector.broadcast %45 : vector<8x4x1xf32> to vector<8x4x4xf32>
    %47 = arith.subf %43, %46 : vector<8x4x4xf32>
    %48 = math.exp %47 : vector<8x4x4xf32>
    %cst_18 = arith.constant dense<0.000000e+00> : vector<8x4xf32>
    %49 = vector.multi_reduction <add>, %48, %cst_18 [2] : vector<8x4x4xf32> to vector<8x4xf32>
    %50 = vector.shape_cast %49 : vector<8x4xf32> to vector<8x4x1xf32>
    %51 = tpu.reciprocal %50 {approx = true} : vector<8x4x1xf32> -> vector<8x4x1xf32>
    %52 = vector.broadcast %51 : vector<8x4x1xf32> to vector<8x4x4xf32>
    %53 = arith.mulf %48, %52 : vector<8x4x4xf32>
    %54 = arith.truncf %53 : vector<8x4x4xf32> to vector<8x4x4xbf16>
    "tpu.trace_start"() <{level = 10 : i32, message = "bqk,bkd->bqd"}> : () -> ()
    %cst_19 = arith.constant dense<0.000000e+00> : vector<8x4x8xf32>
    %55 = tpu.matmul %54, %42, %cst_19 {dimension_numbers = #tpu.dot_dimension_numbers<[2], [1], [1], [2], [0, 0, 0, 1, 1, 2], [0], [0]>} : vector<8x4x4xbf16>, vector<8x4x8xbf16>, vector<8x4x8xf32> -> vector<8x4x8xf32>
    "tpu.trace_stop"() : () -> ()
    %56 = vector.extract_strided_slice %35 {offsets = [0, 0, 8], sizes = [8, 4, 8], strides = [1, 1, 1]} : vector<8x4x96xbf16> to vector<8x4x8xbf16>
    %57 = vector.extract_strided_slice %35 {offsets = [0, 0, 40], sizes = [8, 4, 8], strides = [1, 1, 1]} : vector<8x4x96xbf16> to vector<8x4x8xbf16>
    %58 = vector.extract_strided_slice %35 {offsets = [0, 0, 72], sizes = [8, 4, 8], strides = [1, 1, 1]} : vector<8x4x96xbf16> to vector<8x4x8xbf16>
    "tpu.trace_start"() <{level = 10 : i32, message = "bqd,bkd->bqk"}> : () -> ()
    %cst_20 = arith.constant dense<0.000000e+00> : vector<8x4x4xf32>
    %59 = tpu.matmul %56, %57, %cst_20 {dimension_numbers = #tpu.dot_dimension_numbers<[2], [2], [1], [1], [0, 0, 0, 1, 1, 1], [0], [0]>} : vector<8x4x8xbf16>, vector<8x4x8xbf16>, vector<8x4x4xf32> -> vector<8x4x4xf32>
    "tpu.trace_stop"() : () -> ()
    %cst_21 = arith.constant dense<0xFF800000> : vector<8x4xf32>
    %60 = vector.multi_reduction <maximumf>, %59, %cst_21 [2] : vector<8x4x4xf32> to vector<8x4xf32>
    %61 = vector.shape_cast %60 : vector<8x4xf32> to vector<8x4x1xf32>
    %62 = vector.broadcast %61 : vector<8x4x1xf32> to vector<8x4x4xf32>
    %63 = arith.subf %59, %62 : vector<8x4x4xf32>
    %64 = math.exp %63 : vector<8x4x4xf32>
    %cst_22 = arith.constant dense<0.000000e+00> : vector<8x4xf32>
    %65 = vector.multi_reduction <add>, %64, %cst_22 [2] : vector<8x4x4xf32> to vector<8x4xf32>
    %66 = vector.shape_cast %65 : vector<8x4xf32> to vector<8x4x1xf32>
    %67 = tpu.reciprocal %66 {approx = true} : vector<8x4x1xf32> -> vector<8x4x1xf32>
    %68 = vector.broadcast %67 : vector<8x4x1xf32> to vector<8x4x4xf32>
    %69 = arith.mulf %64, %68 : vector<8x4x4xf32>
    %70 = arith.truncf %69 : vector<8x4x4xf32> to vector<8x4x4xbf16>
    "tpu.trace_start"() <{level = 10 : i32, message = "bqk,bkd->bqd"}> : () -> ()
    %cst_23 = arith.constant dense<0.000000e+00> : vector<8x4x8xf32>
    %71 = tpu.matmul %70, %58, %cst_23 {dimension_numbers = #tpu.dot_dimension_numbers<[2], [1], [1], [2], [0, 0, 0, 1, 1, 2], [0], [0]>} : vector<8x4x4xbf16>, vector<8x4x8xbf16>, vector<8x4x8xf32> -> vector<8x4x8xf32>
    "tpu.trace_stop"() : () -> ()
    %72 = vector.extract_strided_slice %35 {offsets = [0, 0, 16], sizes = [8, 4, 8], strides = [1, 1, 1]} : vector<8x4x96xbf16> to vector<8x4x8xbf16>
    %73 = vector.extract_strided_slice %35 {offsets = [0, 0, 48], sizes = [8, 4, 8], strides = [1, 1, 1]} : vector<8x4x96xbf16> to vector<8x4x8xbf16>
    %74 = vector.extract_strided_slice %35 {offsets = [0, 0, 80], sizes = [8, 4, 8], strides = [1, 1, 1]} : vector<8x4x96xbf16> to vector<8x4x8xbf16>
    "tpu.trace_start"() <{level = 10 : i32, message = "bqd,bkd->bqk"}> : () -> ()
    %cst_24 = arith.constant dense<0.000000e+00> : vector<8x4x4xf32>
    %75 = tpu.matmul %72, %73, %cst_24 {dimension_numbers = #tpu.dot_dimension_numbers<[2], [2], [1], [1], [0, 0, 0, 1, 1, 1], [0], [0]>} : vector<8x4x8xbf16>, vector<8x4x8xbf16>, vector<8x4x4xf32> -> vector<8x4x4xf32>
    "tpu.trace_stop"() : () -> ()
    %cst_25 = arith.constant dense<0xFF800000> : vector<8x4xf32>
    %76 = vector.multi_reduction <maximumf>, %75, %cst_25 [2] : vector<8x4x4xf32> to vector<8x4xf32>
    %77 = vector.shape_cast %76 : vector<8x4xf32> to vector<8x4x1xf32>
    %78 = vector.broadcast %77 : vector<8x4x1xf32> to vector<8x4x4xf32>
    %79 = arith.subf %75, %78 : vector<8x4x4xf32>
    %80 = math.exp %79 : vector<8x4x4xf32>
    %cst_26 = arith.constant dense<0.000000e+00> : vector<8x4xf32>
    %81 = vector.multi_reduction <add>, %80, %cst_26 [2] : vector<8x4x4xf32> to vector<8x4xf32>
    %82 = vector.shape_cast %81 : vector<8x4xf32> to vector<8x4x1xf32>
    %83 = tpu.reciprocal %82 {approx = true} : vector<8x4x1xf32> -> vector<8x4x1xf32>
    %84 = vector.broadcast %83 : vector<8x4x1xf32> to vector<8x4x4xf32>
    %85 = arith.mulf %80, %84 : vector<8x4x4xf32>
    %86 = arith.truncf %85 : vector<8x4x4xf32> to vector<8x4x4xbf16>
    "tpu.trace_start"() <{level = 10 : i32, message = "bqk,bkd->bqd"}> : () -> ()
    %cst_27 = arith.constant dense<0.000000e+00> : vector<8x4x8xf32>
    %87 = tpu.matmul %86, %74, %cst_27 {dimension_numbers = #tpu.dot_dimension_numbers<[2], [1], [1], [2], [0, 0, 0, 1, 1, 2], [0], [0]>} : vector<8x4x4xbf16>, vector<8x4x8xbf16>, vector<8x4x8xf32> -> vector<8x4x8xf32>
    "tpu.trace_stop"() : () -> ()
    %88 = vector.extract_strided_slice %35 {offsets = [0, 0, 24], sizes = [8, 4, 8], strides = [1, 1, 1]} : vector<8x4x96xbf16> to vector<8x4x8xbf16>
    %89 = vector.extract_strided_slice %35 {offsets = [0, 0, 56], sizes = [8, 4, 8], strides = [1, 1, 1]} : vector<8x4x96xbf16> to vector<8x4x8xbf16>
    %90 = vector.extract_strided_slice %35 {offsets = [0, 0, 88], sizes = [8, 4, 8], strides = [1, 1, 1]} : vector<8x4x96xbf16> to vector<8x4x8xbf16>
    "tpu.trace_start"() <{level = 10 : i32, message = "bqd,bkd->bqk"}> : () -> ()
    %cst_28 = arith.constant dense<0.000000e+00> : vector<8x4x4xf32>
    %91 = tpu.matmul %88, %89, %cst_28 {dimension_numbers = #tpu.dot_dimension_numbers<[2], [2], [1], [1], [0, 0, 0, 1, 1, 1], [0], [0]>} : vector<8x4x8xbf16>, vector<8x4x8xbf16>, vector<8x4x4xf32> -> vector<8x4x4xf32>
    "tpu.trace_stop"() : () -> ()
    %cst_29 = arith.constant dense<0xFF800000> : vector<8x4xf32>
    %92 = vector.multi_reduction <maximumf>, %91, %cst_29 [2] : vector<8x4x4xf32> to vector<8x4xf32>
    %93 = vector.shape_cast %92 : vector<8x4xf32> to vector<8x4x1xf32>
    %94 = vector.broadcast %93 : vector<8x4x1xf32> to vector<8x4x4xf32>
    %95 = arith.subf %91, %94 : vector<8x4x4xf32>
    %96 = math.exp %95 : vector<8x4x4xf32>
    %cst_30 = arith.constant dense<0.000000e+00> : vector<8x4xf32>
    %97 = vector.multi_reduction <add>, %96, %cst_30 [2] : vector<8x4x4xf32> to vector<8x4xf32>
    %98 = vector.shape_cast %97 : vector<8x4xf32> to vector<8x4x1xf32>
    %99 = tpu.reciprocal %98 {approx = true} : vector<8x4x1xf32> -> vector<8x4x1xf32>
    %100 = vector.broadcast %99 : vector<8x4x1xf32> to vector<8x4x4xf32>
    %101 = arith.mulf %96, %100 : vector<8x4x4xf32>
    %102 = arith.truncf %101 : vector<8x4x4xf32> to vector<8x4x4xbf16>
    "tpu.trace_start"() <{level = 10 : i32, message = "bqk,bkd->bqd"}> : () -> ()
    %cst_31 = arith.constant dense<0.000000e+00> : vector<8x4x8xf32>
    %103 = tpu.matmul %102, %90, %cst_31 {dimension_numbers = #tpu.dot_dimension_numbers<[2], [1], [1], [2], [0, 0, 0, 1, 1, 2], [0], [0]>} : vector<8x4x4xbf16>, vector<8x4x8xbf16>, vector<8x4x8xf32> -> vector<8x4x8xf32>
    "tpu.trace_stop"() : () -> ()
    %104 = vector.extract_strided_slice %39 {offsets = [0, 0, 0], sizes = [4, 8, 8], strides = [1, 1, 1]} : vector<4x8x96xbf16> to vector<4x8x8xbf16>
    %105 = vector.extract_strided_slice %39 {offsets = [0, 0, 32], sizes = [4, 8, 8], strides = [1, 1, 1]} : vector<4x8x96xbf16> to vector<4x8x8xbf16>
    %106 = vector.extract_strided_slice %39 {offsets = [0, 0, 64], sizes = [4, 8, 8], strides = [1, 1, 1]} : vector<4x8x96xbf16> to vector<4x8x8xbf16>
    "tpu.trace_start"() <{level = 10 : i32, message = "bqd,bkd->bqk"}> : () -> ()
    %cst_32 = arith.constant dense<0.000000e+00> : vector<4x8x8xf32>
    %107 = tpu.matmul %104, %105, %cst_32 {dimension_numbers = #tpu.dot_dimension_numbers<[2], [2], [1], [1], [0, 0, 0, 1, 1, 1], [0], [0]>} : vector<4x8x8xbf16>, vector<4x8x8xbf16>, vector<4x8x8xf32> -> vector<4x8x8xf32>
    "tpu.trace_stop"() : () -> ()
    %cst_33 = arith.constant dense<0xFF800000> : vector<4x8xf32>
    %108 = vector.multi_reduction <maximumf>, %107, %cst_33 [2] : vector<4x8x8xf32> to vector<4x8xf32>
    %109 = vector.shape_cast %108 : vector<4x8xf32> to vector<4x8x1xf32>
    %110 = vector.broadcast %109 : vector<4x8x1xf32> to vector<4x8x8xf32>
    %111 = arith.subf %107, %110 : vector<4x8x8xf32>
    %112 = math.exp %111 : vector<4x8x8xf32>
    %cst_34 = arith.constant dense<0.000000e+00> : vector<4x8xf32>
    %113 = vector.multi_reduction <add>, %112, %cst_34 [2] : vector<4x8x8xf32> to vector<4x8xf32>
    %114 = vector.shape_cast %113 : vector<4x8xf32> to vector<4x8x1xf32>
    %115 = tpu.reciprocal %114 {approx = true} : vector<4x8x1xf32> -> vector<4x8x1xf32>
    %116 = vector.broadcast %115 : vector<4x8x1xf32> to vector<4x8x8xf32>
    %117 = arith.mulf %112, %116 : vector<4x8x8xf32>
    %118 = arith.truncf %117 : vector<4x8x8xf32> to vector<4x8x8xbf16>
    "tpu.trace_start"() <{level = 10 : i32, message = "bqk,bkd->bqd"}> : () -> ()
    %cst_35 = arith.constant dense<0.000000e+00> : vector<4x8x8xf32>
    %119 = tpu.matmul %118, %106, %cst_35 {dimension_numbers = #tpu.dot_dimension_numbers<[2], [1], [1], [2], [0, 0, 0, 1, 1, 2], [0], [0]>} : vector<4x8x8xbf16>, vector<4x8x8xbf16>, vector<4x8x8xf32> -> vector<4x8x8xf32>
    "tpu.trace_stop"() : () -> ()
    %120 = vector.extract_strided_slice %39 {offsets = [0, 0, 8], sizes = [4, 8, 8], strides = [1, 1, 1]} : vector<4x8x96xbf16> to vector<4x8x8xbf16>
    %121 = vector.extract_strided_slice %39 {offsets = [0, 0, 40], sizes = [4, 8, 8], strides = [1, 1, 1]} : vector<4x8x96xbf16> to vector<4x8x8xbf16>
    %122 = vector.extract_strided_slice %39 {offsets = [0, 0, 72], sizes = [4, 8, 8], strides = [1, 1, 1]} : vector<4x8x96xbf16> to vector<4x8x8xbf16>
    "tpu.trace_start"() <{level = 10 : i32, message = "bqd,bkd->bqk"}> : () -> ()
    %cst_36 = arith.constant dense<0.000000e+00> : vector<4x8x8xf32>
    %123 = tpu.matmul %120, %121, %cst_36 {dimension_numbers = #tpu.dot_dimension_numbers<[2], [2], [1], [1], [0, 0, 0, 1, 1, 1], [0], [0]>} : vector<4x8x8xbf16>, vector<4x8x8xbf16>, vector<4x8x8xf32> -> vector<4x8x8xf32>
    "tpu.trace_stop"() : () -> ()
    %cst_37 = arith.constant dense<0xFF800000> : vector<4x8xf32>
    %124 = vector.multi_reduction <maximumf>, %123, %cst_37 [2] : vector<4x8x8xf32> to vector<4x8xf32>
    %125 = vector.shape_cast %124 : vector<4x8xf32> to vector<4x8x1xf32>
    %126 = vector.broadcast %125 : vector<4x8x1xf32> to vector<4x8x8xf32>
    %127 = arith.subf %123, %126 : vector<4x8x8xf32>
    %128 = math.exp %127 : vector<4x8x8xf32>
    %cst_38 = arith.constant dense<0.000000e+00> : vector<4x8xf32>
    %129 = vector.multi_reduction <add>, %128, %cst_38 [2] : vector<4x8x8xf32> to vector<4x8xf32>
    %130 = vector.shape_cast %129 : vector<4x8xf32> to vector<4x8x1xf32>
    %131 = tpu.reciprocal %130 {approx = true} : vector<4x8x1xf32> -> vector<4x8x1xf32>
    %132 = vector.broadcast %131 : vector<4x8x1xf32> to vector<4x8x8xf32>
    %133 = arith.mulf %128, %132 : vector<4x8x8xf32>
    %134 = arith.truncf %133 : vector<4x8x8xf32> to vector<4x8x8xbf16>
    "tpu.trace_start"() <{level = 10 : i32, message = "bqk,bkd->bqd"}> : () -> ()
    %cst_39 = arith.constant dense<0.000000e+00> : vector<4x8x8xf32>
    %135 = tpu.matmul %134, %122, %cst_39 {dimension_numbers = #tpu.dot_dimension_numbers<[2], [1], [1], [2], [0, 0, 0, 1, 1, 2], [0], [0]>} : vector<4x8x8xbf16>, vector<4x8x8xbf16>, vector<4x8x8xf32> -> vector<4x8x8xf32>
    "tpu.trace_stop"() : () -> ()
    %136 = vector.extract_strided_slice %39 {offsets = [0, 0, 16], sizes = [4, 8, 8], strides = [1, 1, 1]} : vector<4x8x96xbf16> to vector<4x8x8xbf16>
    %137 = vector.extract_strided_slice %39 {offsets = [0, 0, 48], sizes = [4, 8, 8], strides = [1, 1, 1]} : vector<4x8x96xbf16> to vector<4x8x8xbf16>
    %138 = vector.extract_strided_slice %39 {offsets = [0, 0, 80], sizes = [4, 8, 8], strides = [1, 1, 1]} : vector<4x8x96xbf16> to vector<4x8x8xbf16>
    "tpu.trace_start"() <{level = 10 : i32, message = "bqd,bkd->bqk"}> : () -> ()
    %cst_40 = arith.constant dense<0.000000e+00> : vector<4x8x8xf32>
    %139 = tpu.matmul %136, %137, %cst_40 {dimension_numbers = #tpu.dot_dimension_numbers<[2], [2], [1], [1], [0, 0, 0, 1, 1, 1], [0], [0]>} : vector<4x8x8xbf16>, vector<4x8x8xbf16>, vector<4x8x8xf32> -> vector<4x8x8xf32>
    "tpu.trace_stop"() : () -> ()
    %cst_41 = arith.constant dense<0xFF800000> : vector<4x8xf32>
    %140 = vector.multi_reduction <maximumf>, %139, %cst_41 [2] : vector<4x8x8xf32> to vector<4x8xf32>
    %141 = vector.shape_cast %140 : vector<4x8xf32> to vector<4x8x1xf32>
    %142 = vector.broadcast %141 : vector<4x8x1xf32> to vector<4x8x8xf32>
    %143 = arith.subf %139, %142 : vector<4x8x8xf32>
    %144 = math.exp %143 : vector<4x8x8xf32>
    %cst_42 = arith.constant dense<0.000000e+00> : vector<4x8xf32>
    %145 = vector.multi_reduction <add>, %144, %cst_42 [2] : vector<4x8x8xf32> to vector<4x8xf32>
    %146 = vector.shape_cast %145 : vector<4x8xf32> to vector<4x8x1xf32>
    %147 = tpu.reciprocal %146 {approx = true} : vector<4x8x1xf32> -> vector<4x8x1xf32>
    %148 = vector.broadcast %147 : vector<4x8x1xf32> to vector<4x8x8xf32>
    %149 = arith.mulf %144, %148 : vector<4x8x8xf32>
    %150 = arith.truncf %149 : vector<4x8x8xf32> to vector<4x8x8xbf16>
    "tpu.trace_start"() <{level = 10 : i32, message = "bqk,bkd->bqd"}> : () -> ()
    %cst_43 = arith.constant dense<0.000000e+00> : vector<4x8x8xf32>
    %151 = tpu.matmul %150, %138, %cst_43 {dimension_numbers = #tpu.dot_dimension_numbers<[2], [1], [1], [2], [0, 0, 0, 1, 1, 2], [0], [0]>} : vector<4x8x8xbf16>, vector<4x8x8xbf16>, vector<4x8x8xf32> -> vector<4x8x8xf32>
    "tpu.trace_stop"() : () -> ()
    %152 = vector.extract_strided_slice %39 {offsets = [0, 0, 24], sizes = [4, 8, 8], strides = [1, 1, 1]} : vector<4x8x96xbf16> to vector<4x8x8xbf16>
    %153 = vector.extract_strided_slice %39 {offsets = [0, 0, 56], sizes = [4, 8, 8], strides = [1, 1, 1]} : vector<4x8x96xbf16> to vector<4x8x8xbf16>
    %154 = vector.extract_strided_slice %39 {offsets = [0, 0, 88], sizes = [4, 8, 8], strides = [1, 1, 1]} : vector<4x8x96xbf16> to vector<4x8x8xbf16>
    "tpu.trace_start"() <{level = 10 : i32, message = "bqd,bkd->bqk"}> : () -> ()
    %cst_44 = arith.constant dense<0.000000e+00> : vector<4x8x8xf32>
    %155 = tpu.matmul %152, %153, %cst_44 {dimension_numbers = #tpu.dot_dimension_numbers<[2], [2], [1], [1], [0, 0, 0, 1, 1, 1], [0], [0]>} : vector<4x8x8xbf16>, vector<4x8x8xbf16>, vector<4x8x8xf32> -> vector<4x8x8xf32>
    "tpu.trace_stop"() : () -> ()
    %cst_45 = arith.constant dense<0xFF800000> : vector<4x8xf32>
    %156 = vector.multi_reduction <maximumf>, %155, %cst_45 [2] : vector<4x8x8xf32> to vector<4x8xf32>
    %157 = vector.shape_cast %156 : vector<4x8xf32> to vector<4x8x1xf32>
    %158 = vector.broadcast %157 : vector<4x8x1xf32> to vector<4x8x8xf32>
    %159 = arith.subf %155, %158 : vector<4x8x8xf32>
    %160 = math.exp %159 : vector<4x8x8xf32>
    %cst_46 = arith.constant dense<0.000000e+00> : vector<4x8xf32>
    %161 = vector.multi_reduction <add>, %160, %cst_46 [2] : vector<4x8x8xf32> to vector<4x8xf32>
    %162 = vector.shape_cast %161 : vector<4x8xf32> to vector<4x8x1xf32>
    %163 = tpu.reciprocal %162 {approx = true} : vector<4x8x1xf32> -> vector<4x8x1xf32>
    %164 = vector.broadcast %163 : vector<4x8x1xf32> to vector<4x8x8xf32>
    %165 = arith.mulf %160, %164 : vector<4x8x8xf32>
    %166 = arith.truncf %165 : vector<4x8x8xf32> to vector<4x8x8xbf16>
    "tpu.trace_start"() <{level = 10 : i32, message = "bqk,bkd->bqd"}> : () -> ()
    %cst_47 = arith.constant dense<0.000000e+00> : vector<4x8x8xf32>
    %167 = tpu.matmul %166, %154, %cst_47 {dimension_numbers = #tpu.dot_dimension_numbers<[2], [1], [1], [2], [0, 0, 0, 1, 1, 2], [0], [0]>} : vector<4x8x8xbf16>, vector<4x8x8xbf16>, vector<4x8x8xf32> -> vector<4x8x8xf32>
    "tpu.trace_stop"() : () -> ()
    %168 = tpu.concatenate %55, %71, %87, %103 in 2 : vector<8x4x8xf32>, vector<8x4x8xf32>, vector<8x4x8xf32>, vector<8x4x8xf32> -> vector<8x4x32xf32>
    %169 = vector.shape_cast %168 : vector<8x4x32xf32> to vector<32x32xf32>
    %170 = tpu.concatenate %119, %135, %151, %167 in 2 : vector<4x8x8xf32>, vector<4x8x8xf32>, vector<4x8x8xf32>, vector<4x8x8xf32> -> vector<4x8x32xf32>
    %171 = tpu.transpose %170, [1, 0, 2] : vector<4x8x32xf32> -> vector<8x4x32xf32>
    %172 = vector.shape_cast %171 : vector<8x4x32xf32> to vector<32x32xf32>
    %173 = arith.addf %169, %172 : vector<32x32xf32>
    %cst_48 = arith.constant 5.000000e-01 : f32
    %174 = vector.broadcast %cst_48 : f32 to vector<32x32xf32>
    %175 = arith.mulf %174, %173 : vector<32x32xf32>
    %176 = arith.addf %175, %26 : vector<32x32xf32>
    %c0_49 = arith.constant 0 : index
    %c0_50 = arith.constant 0 : index
    %177 = vector.load %arg6[%c0_49, %c0_50] : memref<1x32xf32, #tpu.memory_space<vmem>>, vector<1x32xf32>
    %c0_51 = arith.constant 0 : index
    %c0_52 = arith.constant 0 : index
    %178 = vector.load %arg7[%c0_51, %c0_52] : memref<1x32xf32, #tpu.memory_space<vmem>>, vector<1x32xf32>
    %cst_53 = arith.constant dense<0.000000e+00> : vector<32xf32>
    %179 = vector.multi_reduction <add>, %176, %cst_53 [1] : vector<32x32xf32> to vector<32xf32>
    %180 = vector.shape_cast %179 : vector<32xf32> to vector<32x1xf32>
    %cst_54 = arith.constant 3.200000e+01 : f32
    %181 = vector.broadcast %cst_54 : f32 to vector<32x1xf32>
    %182 = arith.divf %180, %181 : vector<32x1xf32>
    %183 = vector.broadcast %182 : vector<32x1xf32> to vector<32x32xf32>
    %184 = arith.subf %176, %183 : vector<32x32xf32>
    %185 = arith.mulf %184, %184 : vector<32x32xf32>
    %cst_55 = arith.constant dense<0.000000e+00> : vector<32xf32>
    %186 = vector.multi_reduction <add>, %185, %cst_55 [1] : vector<32x32xf32> to vector<32xf32>
    %187 = vector.shape_cast %186 : vector<32xf32> to vector<32x1xf32>
    %cst_56 = arith.constant 3.200000e+01 : f32
    %188 = vector.broadcast %cst_56 : f32 to vector<32x1xf32>
    %189 = arith.divf %187, %188 : vector<32x1xf32>
    %190 = vector.broadcast %182 : vector<32x1xf32> to vector<32x32xf32>
    %191 = arith.subf %176, %190 : vector<32x32xf32>
    %cst_57 = arith.constant 9.99999997E-7 : f32
    %192 = vector.broadcast %cst_57 : f32 to vector<32x1xf32>
    %193 = arith.addf %189, %192 : vector<32x1xf32>
    %194 = math.rsqrt %193 : vector<32x1xf32>
    %195 = vector.broadcast %194 : vector<32x1xf32> to vector<32x32xf32>
    %196 = arith.mulf %191, %195 : vector<32x32xf32>
    %197 = vector.broadcast %177 : vector<1x32xf32> to vector<32x32xf32>
    %198 = arith.mulf %196, %197 : vector<32x32xf32>
    %199 = vector.broadcast %178 : vector<1x32xf32> to vector<32x32xf32>
    %200 = arith.addf %198, %199 : vector<32x32xf32>
    %201 = arith.truncf %200 : vector<32x32xf32> to vector<32x32xbf16>
    %c0_58 = arith.constant 0 : index
    %c0_59 = arith.constant 0 : index
    %202 = vector.load %arg8[%c0_58, %c0_59] : memref<32x64xbf16, #tpu.memory_space<vmem>>, vector<32x64xbf16>
    %cst_60 = arith.constant dense<0.000000e+00> : vector<32x64xf32>
    %203 = tpu.matmul %201, %202, %cst_60 {dimension_numbers = #tpu.dot_dimension_numbers<[1], [0], [0], [1], [0, 0, 1, 1], [], []>} : vector<32x32xbf16>, vector<32x64xbf16>, vector<32x64xf32> -> vector<32x64xf32>
    %c0_61 = arith.constant 0 : index
    %c0_62 = arith.constant 0 : index
    %204 = vector.load %arg9[%c0_61, %c0_62] : memref<1x64xf32, #tpu.memory_space<vmem>>, vector<1x64xf32>
    %205 = vector.broadcast %204 : vector<1x64xf32> to vector<32x64xf32>
    %206 = arith.addf %203, %205 : vector<32x64xf32>
    %207 = arith.mulf %206, %206 : vector<32x64xf32>
    %208 = arith.mulf %206, %207 : vector<32x64xf32>
    %cst_63 = arith.constant 4.471500e-02 : f32
    %209 = vector.broadcast %cst_63 : f32 to vector<32x64xf32>
    %210 = arith.mulf %209, %208 : vector<32x64xf32>
    %211 = arith.addf %206, %210 : vector<32x64xf32>
    %cst_64 = arith.constant 0.797884583 : f32
    %212 = vector.broadcast %cst_64 : f32 to vector<32x64xf32>
    %213 = arith.mulf %212, %211 : vector<32x64xf32>
    %214 = math.tanh %213 : vector<32x64xf32>
    %cst_65 = arith.constant 1.000000e+00 : f32
    %215 = vector.broadcast %cst_65 : f32 to vector<32x64xf32>
    %216 = arith.addf %215, %214 : vector<32x64xf32>
    %cst_66 = arith.constant 5.000000e-01 : f32
    %217 = vector.broadcast %cst_66 : f32 to vector<32x64xf32>
    %218 = arith.mulf %217, %216 : vector<32x64xf32>
    %219 = arith.mulf %206, %218 : vector<32x64xf32>
    %220 = arith.truncf %219 : vector<32x64xf32> to vector<32x64xbf16>
    %c0_67 = arith.constant 0 : index
    %c0_68 = arith.constant 0 : index
    %221 = vector.load %arg10[%c0_67, %c0_68] : memref<64x32xbf16, #tpu.memory_space<vmem>>, vector<64x32xbf16>
    %cst_69 = arith.constant dense<0.000000e+00> : vector<32x32xf32>
    %222 = tpu.matmul %220, %221, %cst_69 {dimension_numbers = #tpu.dot_dimension_numbers<[1], [0], [0], [1], [0, 0, 1, 1], [], []>} : vector<32x64xbf16>, vector<64x32xbf16>, vector<32x32xf32> -> vector<32x32xf32>
    %c0_70 = arith.constant 0 : index
    %c0_71 = arith.constant 0 : index
    %223 = vector.load %arg11[%c0_70, %c0_71] : memref<1x32xf32, #tpu.memory_space<vmem>>, vector<1x32xf32>
    %224 = vector.broadcast %223 : vector<1x32xf32> to vector<32x32xf32>
    %225 = arith.addf %222, %224 : vector<32x32xf32>
    %226 = arith.addf %225, %176 : vector<32x32xf32>
    %227 = vector.shape_cast %226 : vector<32x32xf32> to vector<8x4x32xf32>
    %c0_72 = arith.constant 0 : index
    %c0_73 = arith.constant 0 : index
    %c0_74 = arith.constant 0 : index
    %c0_75 = arith.constant 0 : index
    %228 = vector.load %arg12[%c0_72, %c0_73, %c0_74, %c0_75] : memref<1x8x4x32xf32, #tpu.memory_space<vmem>>, vector<1x8x4x32xf32>
    %229 = vector.shape_cast %228 : vector<1x8x4x32xf32> to vector<8x4x32xf32>
    %230 = vector.shape_cast %227 : vector<8x4x32xf32> to vector<1x8x4x32xf32>
    tpu.vector_store %arg12[%c0_72, %c0_73, %c0_74, %c0_75], %230 {strides = array<i32>} : memref<1x8x4x32xf32, #tpu.memory_space<vmem>>, vector<1x8x4x32xf32>,
    return
  }
  func.func @transform_0(%arg0: i32) -> (i32, i32, i32, i32) {
    %c0_i32 = arith.constant 0 : i32
    %c0_i32_0 = arith.constant 0 : i32
    %c0_i32_1 = arith.constant 0 : i32
    %c0_i32_2 = arith.constant 0 : i32
    return %arg0, %c0_i32, %c0_i32_0, %c0_i32_1 : i32, i32, i32, i32
  }
  func.func @transform_1(%arg0: i32) -> (i32, i32) {
    %c0_i32 = arith.constant 0 : i32
    %c0_i32_0 = arith.constant 0 : i32
    %c0_i32_1 = arith.constant 0 : i32
    return %c0_i32, %c0_i32_0 : i32, i32
  }
  func.func @transform_2(%arg0: i32) -> (i32, i32) {
    %c0_i32 = arith.constant 0 : i32
    %c0_i32_0 = arith.constant 0 : i32
    %c0_i32_1 = arith.constant 0 : i32
    return %c0_i32, %c0_i32_0 : i32, i32
  }
  func.func @transform_3(%arg0: i32) -> (i32, i32) {
    %c0_i32 = arith.constant 0 : i32
    %c0_i32_0 = arith.constant 0 : i32
    %c0_i32_1 = arith.constant 0 : i32
    return %c0_i32, %c0_i32_0 : i32, i32
  }
  func.func @transform_4(%arg0: i32) -> (i32, i32) {
    %c0_i32 = arith.constant 0 : i32
    %c0_i32_0 = arith.constant 0 : i32
    %c0_i32_1 = arith.constant 0 : i32
    return %c0_i32, %c0_i32_0 : i32, i32
  }
  func.func @transform_5(%arg0: i32) -> (i32, i32) {
    %c0_i32 = arith.constant 0 : i32
    %c0_i32_0 = arith.constant 0 : i32
    %c0_i32_1 = arith.constant 0 : i32
    return %c0_i32, %c0_i32_0 : i32, i32
  }
  func.func @transform_6(%arg0: i32) -> (i32, i32) {
    %c0_i32 = arith.constant 0 : i32
    %c0_i32_0 = arith.constant 0 : i32
    %c0_i32_1 = arith.constant 0 : i32
    return %c0_i32, %c0_i32_0 : i32, i32
  }
  func.func @transform_7(%arg0: i32) -> (i32, i32) {
    %c0_i32 = arith.constant 0 : i32
    %c0_i32_0 = arith.constant 0 : i32
    %c0_i32_1 = arith.constant 0 : i32
    return %c0_i32, %c0_i32_0 : i32, i32
  }
  func.func @transform_8(%arg0: i32) -> (i32, i32) {
    %c0_i32 = arith.constant 0 : i32
    %c0_i32_0 = arith.constant 0 : i32
    %c0_i32_1 = arith.constant 0 : i32
    return %c0_i32, %c0_i32_0 : i32, i32
  }
  func.func @transform_9(%arg0: i32) -> (i32, i32) {
    %c0_i32 = arith.constant 0 : i32
    %c0_i32_0 = arith.constant 0 : i32
    %c0_i32_1 = arith.constant 0 : i32
    return %c0_i32, %c0_i32_0 : i32, i32
  }
  func.func @transform_10(%arg0: i32) -> (i32, i32) {
    %c0_i32 = arith.constant 0 : i32
    %c0_i32_0 = arith.constant 0 : i32
    %c0_i32_1 = arith.constant 0 : i32
    return %c0_i32, %c0_i32_0 : i32, i32
  }
  func.func @transform_11(%arg0: i32) -> (i32, i32, i32, i32) {
    %c0_i32 = arith.constant 0 : i32
    %c0_i32_0 = arith.constant 0 : i32
    %c0_i32_1 = arith.constant 0 : i32
    %c0_i32_2 = arith.constant 0 : i32
    return %arg0, %c0_i32, %c0_i32_0, %c0_i32_1 : i32, i32, i32, i32
  }
}

</mosaic_0001>

<bundles_post_ra>
// kernel: tpu_custom_call.1
= control target key start
LH: loop header
LB: loop body
LE: loop exit
PB: predicated region body
PF: predicated region fallthrough
CT: control target
= control target key end

     0   :  { %s7017_s0 = inlined_call_operand.hbm [shape: f32[2,8,4,32], index: 0, kind: input, shape index: {}]   ;;  %s7018_s1 = inlined_call_operand.hbm [shape: f32[1,32], index: 1, kind: input, shape index: {}]   ;;  %s7019_s2 = inlined_call_operand.hbm [shape: f32[1,32], index: 2, kind: input, shape index: {}]   ;;  %s7020_s3 = inlined_call_operand.vmem [shape: bf16[32,192], index: 3, kind: input, shape index: {}]   ;;  %s7021_s4 = inlined_call_operand.vmem [shape: f32[1,192], index: 4, kind: input, shape index: {}]   ;;  %s7022_s5 = inlined_call_operand.vmem [shape: f32[1,32], index: 5, kind: input, shape index: {}]   ;;  %s7023_s6 = inlined_call_operand.vmem [shape: f32[1,32], index: 6, kind: input, shape index: {}]   ;;  %s7024_s7 = inlined_call_operand.vmem [shape: bf16[32,64], index: 7, kind: input, shape index: {}]   ;;  %s7025_s8 = inlined_call_operand.vmem [shape: f32[1,64], index: 8, kind: input, shape index: {}]   ;;  %s7026_s9 = inlined_call_operand.vmem [shape: bf16[64,32], index: 9, kind: input, shape index: {}]   ;;  %s7027_s10 = inlined_call_operand.vmem [shape: f32[1,32], index: 10, kind: input, shape index: {}]   ;;  %s7028_s11 = inlined_call_operand.hbm [shape: f32[2,8,4,32], index: 11, kind: output, shape index: {}]  }
   0x1   :  { %7049 = sst [smem:[#allocation29_spill]] %s7018_s1 }
   0x2   :  { %7050 = sst [smem:[#allocation30_spill]] %s7019_s2 }
   0x3   :  { %7051 = sst [smem:[#allocation31_spill]] %s7028_s11 }
   0x4   :  { %16 = vsyncpa [#allocation3], 0 }
   0x5   :  { %18 = vsyncpa [#allocation3 + $0x1], 0 }
   0x6   :  { %19 = vsyncpa [#allocation6], 0 }
   0x7   :  { %20 = vsyncpa [#allocation4], 0 }
   0x8   :  { %22 = vsyncpa [#allocation4 + $0x1], 0  ;;  %s5328_s17 = smov 0   ;;  %s5330_s18 = smov 0  }
   0x9   :  { %s5332_s19 = smov 0   ;;  %s5334_s20 = smov 0  }
   0xa LB: > { %7052 = sst [smem:[#allocation12_spill]] %s5229_s17  ;;  %s5349_s21 = sadd.s32 4294967295, %s5241_s20   ;;  %s5241_s20 = sphi %s5334_s20, %s7095_s20   ;;  %s5237_s19 = sphi %s5332_s19, %s7099_s19   ;;  %s5233_s18 = sphi %s5330_s18, %s7098_s18   ;;  %s5229_s17 = sphi %s5328_s17, %s7097_s17  }
   0xb   : > { %s4589_s22 = sadd.s32 4294967294, %s5241_s20   ;;  %s5353_s23 = sadd.s32 1, %s5241_s20  }
   0xc   : > { %7053 = sst [smem:[#allocation13_spill]] %s5353_s23  ;;  %s35_s24 = sadd.s32 1, %s5237_s19 }
   0xd   : > { %s32_s25 = ssub.s32 %s5241_s20, %s5353_s23  ;;  %p42_p0 = scmp.ne.s32.totalorder %s5237_s19, %s5233_s18 }
   0xe   : > { %p33_p1 = scmp.eq.s32.totalorder %s32_s25, 0  ;;  %p43_p2 = scmp.eq.s32.totalorder %s5241_s20, 0 }
   0xf   : > { %p48_p3 = scmp.ne.s32.totalorder %s5233_s18, %s5229_s17  ;;  %p49_p4 = scmp.eq.s32.totalorder %s5349_s21, 0 }
  0x10   : > { %s5365_s26 = scalar_select %p33_p1, %s5237_s19, %s35_s24  }
  0x11   : > { %p5367_p5 = por %p43_p2, %p42_p0  ;;  %p5373_p6 = por %p49_p4, %p48_p3 }
  0x12   : > { %7054 = sst [smem:[#allocation14_spill]] %s5365_s26  ;;  %p282_p7 = scmp.eq.s32.totalorder %s5349_s21, 1 }
  0x13   : > { %p288_p8 = scmp.eq.s32.totalorder %s4589_s22, 1  ;;  %p4590_p9 = scmp.ge.s32.totalorder %s5241_s20, 1 }
  0x14   : > { %p295_p10 = scmp.lt.s32.totalorder %s5241_s20, 3  ;;  %p5380_p11 = por %p282_p7, %p42_p0 }
  0x15   : > { %p5384_p12 = por %p288_p8, %p48_p3  ;;  %s7062_s1 = sld [smem:[#allocation29_spill]] }
  0x16   : > { %s7057_s29 = scalar_select %p5380_p11, 1, 0 }
  0x17   : > { %s7059_s30 = scalar_select %p5384_p12, 1, 0 }
  0x18   : > { %7058 = sst [smem:[#allocation15_spill]] %s7057_s29  ;;  %p5388_p13 = pnand %p4590_p9, %p295_p10 }
  0x19   : > { %7060 = sst [smem:[#allocation16_spill]] %s7059_s30  ;;  %s5243_s16 = smov [#allocation5]  }
  0x1a   : > { %p4779_p1 = pneg %p5388_p13  ;;  %s309_s22 = sshll.u32 %s5243_s16, 4  ;;  %s310_s22 = int_to_ptr.vmem [resolvable:$true] %s309_s22 }
  0x1b   : > { %s307_s15 = sshll.u32 %s7062_s1, 4  ;;  %p4796_p3 = scmp.lt.s32.totalorder %s5241_s20, 2  ;;  %s308_s15 = int_to_ptr.hbm [resolvable:$true] %s307_s15 }
  0x1c   : > { %p4780_p2 = pnand %p4779_p1, %p49_p4  ;;  %s7063_s2 = sld [smem:[#allocation30_spill]] }
  0x1d   : > { %p5406_p7 = pnand %p4796_p3, %p5367_p5  ;;  %s5244_s14 = smov [#allocation7]  }
  0x1e   : > { %4782 = dma.hbm_to_vmem [thread:$0]  (!%p4780_p2), %s308_s15, 16, %s310_s22, [#allocation6]  }
  0x1f   : > { %s321_s1 = sshll.u32 %s5244_s14, 4  ;;  %s356_s23 = sand.u32 1, %s5237_s19   ;;  %s322_s1 = int_to_ptr.vmem [resolvable:$true] %s321_s1 }
  0x20   : > { %s4594_s16 = sshll.u32 %s356_s23, 5  ;;  %s4751_s30 = sshll.u32 %s5241_s20, 5 }
  0x21   : > { %s365_s24 = scalar_lea.hbm %s7017_s0, %s4751_s30  ;;  %s360_s25 = scalar_lea.vmem [#allocation2], %s4594_s16 }
  0x22   : > { %s319_s26 = sshll.u32 %s7063_s2, 4  ;;  %s368_s2 = sshll.u32 %s360_s25, 4  ;;  %s320_s26 = int_to_ptr.hbm [resolvable:$true] %s319_s26  ;;  %s369_s2 = int_to_ptr.vmem [resolvable:$true] %s368_s2 }
  0x23   : > { %4785 = dma.hbm_to_vmem [thread:$0]  (!%p4780_p2), %s320_s26, 16, %s322_s1, [#allocation6]  }
  0x24   : > { %s366_s15 = sshll.u32 %s365_s24, 4  ;;  %s357_s27 = scalar_lea.sflag [#allocation3], %s356_s23  ;;  %s367_s15 = int_to_ptr.hbm [resolvable:$true] %s366_s15 }
  0x25   : > { %s5141_s22 = sshra.s32 %s367_s15, 4  ;;  %p5145_p8 = pneg %p5406_p7  ;;  %s5142_s22 = int_to_ptr.hbm [resolvable:$true] %s5141_s22 }
  0x26   : > { %s5143_s11 = scalar_lea.hbm %s5142_s22, 32  ;;  %s5148_s14 = scalar_lea.hbm %s7017_s0, 64 }
  0x27   : > { %p5144_p5 = scmp.ne.s32.totalorder %s5142_s22, %s5143_s11  ;;  %p5149_p1 = scmp.lt.s32.totalorder %s5142_s22, %s7017_s0 }
  0x28   : > { %p5150_p2 = scmp.lt.s32.totalorder %s5148_s14, %s5143_s11 }
  0x29   : > { %p5146_p9 = pnand %p5145_p8, %p5144_p5 }
  0x2a   : > { %p5151_p3 = por %p5150_p2, %p5149_p1 }
  0x2b   : > { %p5147_p10 = pneg %p5146_p9 }
  0x2d   : > { %p5152_p0 = pnand %p5151_p3, %p5147_p10 }
  0x2f   : > { %5155 = shalt.err (!%p5152_p0)
}
  0x30   : > { %s5245_s23 = smov 64   ;;  %s5246_s30 = smov 4  }
  0x31   : > { %4789 = dma.hbm_to_vmem [thread:$0]  (!%p5406_p7), %s367_s15, 512, %s369_s2, %s357_s27, %s5245_s23, %s5245_s23, %s5246_s30  }
  0x32   : > { %380 = sbr.rel (%p5388_p13) target bundleno = 5389 (0x150d), region = 64 }
  0x37   : > { %s5428_s16 = sand.u32 1, %s5233_s18  }
  0x38   : > { %s4598_s24 = sshll.u32 %s5428_s16, 5  ;;  %s383_s11 = scalar_lea.sflag [#allocation3], %s5428_s16 }
  0x39   : > { %s386_s25 = scalar_lea.vmem [#allocation2], %s4598_s24 }
  0x3a   : > { %5216 = dma.done.wait (%p5373_p6), %s383_s11, 512  }
  0x3b   : > { %5218 = vsyncadd (%p5373_p6), %s383_s11, 4294966784 }
  0x3c   : > { %5220 = dma.done.wait (%p49_p4), [#allocation6], 32  }
  0x3d   : > { %5222 = vsyncadd (%p49_p4), [#allocation6], 4294967264  ;;  %v441_v0 = vld [vmem:[%s386_s25 + $0x10] sm:$0xf]  ;;  %v442_v1 = vld [vmem:[%s386_s25 + $0x14] sm:$0xf] }
  0x3e   : > { %v437_v2 = vld [vmem:[%s386_s25] sm:$0xf]  ;;  %463 = vst [vmem:[#allocation1 + $0x20] ss:$2 sm:$0xff] %v441_v0  ;;  %v438_v3 = vld [vmem:[%s386_s25 + $0x4] sm:$0xf] }
  0x3f   : > { %465 = vst [vmem:[#allocation1 + $0x21] ss:$2 sm:$0xff] %v442_v1  ;;  %v5442_v4 = vld [vmem:[%s386_s25 + $0x18] sm:$0xf]  ;;  %v5444_v5 = vld [vmem:[%s386_s25 + $0x1c] sm:$0xf] }
  0x40   : > { %455 = vst [vmem:[#allocation1] ss:$2 sm:$0xff] %v437_v2  ;;  %v5446_v6 = vld [vmem:[%s386_s25 + $0x8] sm:$0xf]  ;;  %v5449_v7 = vld [vmem:[%s386_s25 + $0xc] sm:$0xf] }
  0x41   : > { %457 = vst [vmem:[#allocation1 + $0x1] ss:$2 sm:$0xff] %v438_v3  ;;  %vm478_vm0 = vcmask 261120   ;;  %v5247_v16 = vmov 32.0   ;;  %v5248_v22 = vmov 839922192  }
  0x42   : > { %467 = vst [vmem:[#allocation1 + $0x30] ss:$2 sm:$0xff] %v5442_v4  ;;  %4863 = vrcp.f32 %v5247_v16  ;;  %v507_v23 = vunpack.c.l.s4 %v5248_v22  ;;  %v5249_v24 = vmov 1985246804   ;;  %v4754_v16 = vld [vmem:[%s7020_s3 + $0x14] sm:$0xf] }
  0x43   : > { %469 = vst [vmem:[#allocation1 + $0x31] ss:$2 sm:$0xff] %v5444_v5  ;;  %v511_v25 = vunpack.c.l.s4 %v5249_v24  ;;  %v4604_v22 = vld [vmem:[%s7020_s3] sm:$0xf]  ;;  %vm866_vm14 = vcmask 1043456   ;;  %s5250_s12 = smov 96  }
  0x44   : > { %459 = vst [vmem:[#allocation1 + $0x10] ss:$2 sm:$0xff] %v5446_v6  ;;  %v5460_v27 = vunpack.c.0.s8 %v507_v23  ;;  %s5251_s13 = smov 64   ;;  %s5252_s15 = smov 88   ;;  %vm1016_vm15 = vcmask 64512  }
  0x45   : > { %461 = vst [vmem:[#allocation1 + $0x11] ss:$2 sm:$0xff] %v5449_v7  ;;  %v5462_v28 = vunpack.c.0.s8 %v511_v25  ;;  %v4753_v25 = vld [vmem:[%s7020_s3 + $0x4] sm:$0xf0]  ;;  %s5253_s27 = smov 120   ;;  %s5254_s22 = smov 56  }
  0x46   : > { %v472_v8 = vld.sshfl [vmem:[#allocation1 + $0x20] sm:$0xff pattern:$0x75316420]  ;;  %7066 = vst [vmem:[#allocation18_spill] sm:$0xff] %v5460_v27  ;;  %s5255_s1 = smov 80   ;;  %s5256_s26 = smov 112  }
  0x47   : > { %v485_v9 = vsel %vm478_vm0, %v472_v8, 0.0  ;;  %7067 = vst [vmem:[#allocation19_spill] sm:$0xff] %v5462_v28  ;;  %s5257_s14 = smov 48   ;;  %s5258_s17 = smov 72  }
  0x48   : > { %486 = vadd.xlane.f32.xlu1 %v485_v9  ;;  %v470_v10 = vld.sshfl [vmem:[#allocation1] sm:$0xff pattern:$0x75316420]  ;;  %v4864_v17 = vpop.eup %4863  ;;  %s5259_s29 = smov 104   ;;  %s5260_s23 = smov 32  }
  0x49   : > { %v479_v11 = vsel %vm478_vm0, %v470_v10, 0.0  ;;  %v492_v18 = vmul.f32 32.0, %v4864_v17  ;;  %vm496_vm1 = vweird.f32 %v4864_v17  ;;  %s5263_s30 = smov 40   ;;  %s5264_s11 = smov 8  }
  0x4a   : > { %480 = vadd.xlane.f32.xlu0 %v479_v11  ;;  %v473_v12 = vld.sshfl [vmem:[#allocation1 + $0x30] sm:$0xff pattern:$0x75316420]  ;;  %s5265_s25 = smov 16   ;;  %s5266_s2 = smov 24  }
  0x4b   : > { %v488_v14 = vsel %vm478_vm0, %v473_v12, 0.0  ;;  %v493_v19 = vsub.f32 1.0, %v492_v18 }
  0x4c   : > { %v471_v13 = vld.sshfl [vmem:[#allocation1 + $0x10] sm:$0xff pattern:$0x75316420] }
  0x4d   : > { %v482_v15 = vsel %vm478_vm0, %v471_v13, 0.0  ;;  %v494_v20 = vmul.f32 %v4864_v17, %v493_v19 }
  0x4f   : > { %v495_v21 = vadd.f32 %v4864_v17, %v494_v20 }
  0x50   : > { %489 = vadd.xlane.f32.xlu1 %v488_v14  ;;  %v4612_v14 = vld [vmem:[%s7020_s3 + $0x10] sm:$0xf] }
  0x51   : > { %v5458_v26 = vsel %vm496_vm1, %v4864_v17, %v495_v21  ;;  %v4614_v21 = vld [vmem:[%s7020_s3 + $0x18] sm:$0xf0]  ;;  %vm1307_vm1 = vcmask 1041408  }
  0x52   : > { %483 = vadd.xlane.f32.xlu0 %v482_v15  ;;  %7065 = vst [vmem:[#allocation17_spill] sm:$0xff] %v5458_v26  ;;  %v4755_v15 = vld [vmem:[%s7020_s3 + $0x14] sm:$0xf0]  ;;  %v4617_v24 = vor.u32 %v4754_v16, %v4614_v21 }
  0x53   : > { %v4613_v20 = vor.u32 %v4755_v15, %v4612_v14 }
  0x54   : > { %825 = vmatpush.bf16.msra.mxu1 %v4617_v24  ;;  %4765 = vmatpush.bf16.msra.mxu3 %v4617_v24 }
  0x55   : > { %806 = vmatpush.bf16.msra.mxu0 %v4613_v20  ;;  %4763 = vmatpush.bf16.msra.mxu2 %v4613_v20 }
  0xbb   : > { %v487_v29 = vpop.xlane.xlu1 %486 }
  0xbc   : > { %v500_v30 = vmul.f32 %v5458_v26, %v487_v29  ;;  %v4752_v29 = vld [vmem:[%s7020_s3 + $0x4] sm:$0xf] }
  0xbd   : > { %v481_v31 = vpop.xlane.xlu0 %480 }
  0xbe   : > { %v525_v32 = vperm.slane %v500_v30, %v5460_v27  ;;  %v529_v33 = vperm.slane %v500_v30, %v5462_v28  ;;  %v498_v34 = vmul.f32 %v5458_v26, %v481_v31  ;;  %v4606_v30 = vld [vmem:[%s7020_s3 + $0x8] sm:$0xf0] }
  0xc0   : > { %v5468_v35 = vsub.f32 %v441_v0, %v525_v32  ;;  %v5470_v36 = vsub.f32 %v442_v1, %v529_v33  ;;  %v509_v37 = vperm.slane %v498_v34, %v5460_v27  ;;  %v513_v38 = vperm.slane %v498_v34, %v5462_v28 }
  0xc1   : > { %v4605_v33 = vor.u32 %v4753_v25, %v4604_v22 }
  0xc2   : > { %v558_v39 = vmul.f32 %v5468_v35, %v5468_v35  ;;  %v559_v40 = vmul.f32 %v5470_v36, %v5470_v36  ;;  %v5478_v41 = vsub.f32 %v437_v2, %v509_v37  ;;  %v5480_v42 = vsub.f32 %v438_v3, %v513_v38 }
  0xc3   : > { %v490_v43 = vpop.xlane.xlu1 %489  ;;  %v4609_v38 = vor.u32 %v4752_v29, %v4606_v30  ;;  %807 = vmatpush.bf16.msra.mxu0 %v4605_v33  ;;  %4764 = vmatpush.bf16.msra.mxu2 %v4605_v33 }
  0xc4   : > { %578 = vst [vmem:[#allocation1 + $0x20] ss:$2 sm:$0xff] %v558_v39  ;;  %v554_v44 = vmul.f32 %v5478_v41, %v5478_v41  ;;  %v555_v45 = vmul.f32 %v5480_v42, %v5480_v42  ;;  %v501_v46 = vmul.f32 %v5458_v26, %v490_v43  ;;  %v5550_v43 = vld [vmem:[#allocation5] ss:$0 sm:$0xff] }
  0xc5   : > { %580 = vst [vmem:[#allocation1 + $0x21] ss:$2 sm:$0xff] %v559_v40  ;;  %v484_v47 = vpop.xlane.xlu0 %483  ;;  %826 = vmatpush.bf16.msra.mxu1 %v4609_v38  ;;  %4766 = vmatpush.bf16.msra.mxu3 %v4609_v38 }
  0xc6   : > { %570 = vst [vmem:[#allocation1] ss:$2 sm:$0xff] %v554_v44  ;;  %v533_v48 = vperm.slane %v501_v46, %v5460_v27  ;;  %v537_v49 = vperm.slane %v501_v46, %v5462_v28  ;;  %v499_v50 = vmul.f32 %v5458_v26, %v484_v47  ;;  %v5552_v47 = vld [vmem:[#allocation7] ss:$0 sm:$0xff] }
  0xc7   : > { %572 = vst [vmem:[#allocation1 + $0x1] ss:$2 sm:$0xff] %v555_v45 }
  0xc8   : > { %v5491_v51 = vsub.f32 %v5442_v4, %v533_v48  ;;  %v5494_v52 = vsub.f32 %v5444_v5, %v537_v49  ;;  %v517_v53 = vperm.slane %v499_v50, %v5460_v27  ;;  %v521_v54 = vperm.slane %v499_v50, %v5462_v28 }
  0xca   : > { %v560_v55 = vmul.f32 %v5491_v51, %v5491_v51  ;;  %v561_v56 = vmul.f32 %v5494_v52, %v5494_v52  ;;  %v5503_v57 = vsub.f32 %v5446_v6, %v517_v53  ;;  %v5506_v58 = vsub.f32 %v5449_v7, %v521_v54 }
  0xcb   : > { %v708_v54 = vrot.slane %v5550_v43, 4 }
  0xcc   : > { %582 = vst [vmem:[#allocation1 + $0x30] ss:$2 sm:$0xff] %v560_v55  ;;  %v556_v59 = vmul.f32 %v5503_v57, %v5503_v57  ;;  %v557_v60 = vmul.f32 %v5506_v58, %v5506_v58  ;;  %v587_v61 = vld.sshfl [vmem:[#allocation1 + $0x20] sm:$0xff pattern:$0x75316420] }
  0xcd   : > { %584 = vst [vmem:[#allocation1 + $0x31] ss:$2 sm:$0xff] %v561_v56  ;;  %v599_v62 = vsel %vm478_vm0, %v587_v61, 0.0  ;;  %v721_v61 = vrot.slane %v5552_v47, 4 }
  0xce   : > { %574 = vst [vmem:[#allocation1 + $0x10] ss:$2 sm:$0xff] %v556_v59  ;;  %600 = vadd.xlane.f32.xlu0 %v599_v62  ;;  %v585_v63 = vld.sshfl [vmem:[#allocation1] sm:$0xff pattern:$0x75316420] }
  0xcf   : > { %576 = vst [vmem:[#allocation1 + $0x11] ss:$2 sm:$0xff] %v557_v60  ;;  %v593_v0 = vsel %vm478_vm0, %v585_v63, 0.0 }
  0xd0   : > { %594 = vadd.xlane.f32.xlu2 %v593_v0 }
  0xd4   : > { %v588_v1 = vld.sshfl [vmem:[#allocation1 + $0x30] sm:$0xff pattern:$0x75316420] }
  0xd5   : > { %v602_v2 = vsel %vm478_vm0, %v588_v1, 0.0 }
  0xd6   : > { %603 = vadd.xlane.f32.xlu1 %v602_v2  ;;  %v586_v3 = vld.sshfl [vmem:[#allocation1 + $0x10] sm:$0xff pattern:$0x75316420] }
  0xd7   : > { %v596_v4 = vsel %vm478_vm0, %v586_v3, 0.0 }
  0xd8   : > { %597 = vadd.xlane.f32.xlu2 %v596_v4 }
 0x141   : > { %v601_v5 = vpop.xlane.xlu0 %600 }
 0x142   : > { %v607_v6 = vmul.f32 %v601_v5, %v5458_v26 }
 0x143   : > { %v595_v7 = vpop.xlane.xlu2 %594 }
 0x144   : > { %v605_v8 = vmul.f32 %v595_v7, %v5458_v26  ;;  %v611_v9 = vadd.f32 1e-06, %v607_v6 }
 0x146   : > { %v609_v10 = vadd.f32 1e-06, %v605_v8  ;;  %4865 = vrsqrt.f32 %v611_v9  ;;  %vm639_vm2 = vweird.f32 %v611_v9 }
 0x148   : > { %4867 = vrsqrt.f32 %v609_v10  ;;  %vm619_vm6 = vweird.f32 %v609_v10 }
 0x149   : > { %v604_v11 = vpop.xlane.xlu1 %603 }
 0x14a   : > { %v608_v12 = vmul.f32 %v604_v11, %v5458_v26 }
 0x14b   : > { %v598_v13 = vpop.xlane.xlu2 %597 }
 0x14c   : > { %v4866_v17 = vpop.eup %4865  ;;  %v5528_v18 = vadd.f32 1e-06, %v608_v12  ;;  %v606_v19 = vmul.f32 %v598_v13, %v5458_v26 }
 0x14d   : > { %v634_v23 = vmul.f32 %v4866_v17, %v611_v9  ;;  %vm640_vm3 = vweird.f32 %v4866_v17 }
 0x14e   : > { %v4868_v31 = vpop.eup %4867  ;;  %4869 = vrsqrt.f32 %v5528_v18  ;;  %v5547_v32 = vadd.f32 1e-06, %v606_v19  ;;  %vm641_vm4 = vmor %vm639_vm2, %vm640_vm3  ;;  %vm649_vm8 = vweird.f32 %v5528_v18  ;;  %vm1204_vm2 = vcmask 27648  }
 0x14f   : > { %v614_v34 = vmul.f32 %v4868_v31, %v609_v10  ;;  %v635_v37 = vmul.f32 %v4866_v17, %v634_v23  ;;  %vm620_vm5 = vweird.f32 %v4868_v31  ;;  %vm1303_vm3 = vcmask 31744  }
 0x150   : > { %4871 = vrsqrt.f32 %v5547_v32  ;;  %vm621_vm7 = vmor %vm619_vm6, %vm620_vm5  ;;  %vm629_vm12 = vweird.f32 %v5547_v32  ;;  %vm3819_vm5 = vcmask 130048   ;;  %vm3828_vm6 = vcmask 195584  }
 0x151   : > { %v615_v39 = vmul.f32 %v4868_v31, %v614_v34  ;;  %v636_v40 = vmul.f32 0.5, %v635_v37 }
 0x153   : > { %v616_v44 = vmul.f32 0.5, %v615_v39  ;;  %v637_v45 = vsub.f32 1.5, %v636_v40 }
 0x154   : > { %v4870_v46 = vpop.eup %4869 }
 0x155   : > { %v617_v48 = vsub.f32 1.5, %v616_v44  ;;  %v638_v49 = vmul.f32 %v4866_v17, %v637_v45  ;;  %v644_v50 = vmul.f32 %v4870_v46, %v5528_v18  ;;  %vm650_vm9 = vweird.f32 %v4870_v46  ;;  %v768_v45 = vld [vmem:[%s7021_s4] sm:$0x3] }
 0x156   : > { %v4872_v53 = vpop.eup %4871  ;;  %vm651_vm10 = vmor %vm649_vm8, %vm650_vm9 }
 0x157   : > { %v618_v55 = vmul.f32 %v4868_v31, %v617_v48  ;;  %v642_v56 = vsel %vm641_vm4, %v4866_v17, %v638_v49  ;;  %v645_v59 = vmul.f32 %v4870_v46, %v644_v50  ;;  %v624_v60 = vmul.f32 %v4872_v53, %v5547_v32 }
 0x158   : > { %v676_v62 = vperm.slane %v642_v56, %v5460_v27  ;;  %v680_v63 = vperm.slane %v642_v56, %v5462_v28  ;;  %vm630_vm11 = vweird.f32 %v4872_v53  ;;  %vm920_vm4 = vcmask 1047556  }
 0x159   : > { %v622_v0 = vsel %vm621_vm7, %v4868_v31, %v618_v55  ;;  %v646_v1 = vmul.f32 0.5, %v645_v59  ;;  %v625_v2 = vmul.f32 %v4872_v53, %v624_v60  ;;  %vm631_vm13 = vmor %vm629_vm12, %vm630_vm11 }
 0x15a   : > { %v660_v3 = vperm.slane %v622_v0, %v5460_v27  ;;  %v664_v4 = vperm.slane %v622_v0, %v5462_v28  ;;  %v701_v5 = vmul.f32 %v676_v62, %v5468_v35  ;;  %v702_v6 = vmul.f32 %v680_v63, %v5470_v36 }
 0x15b   : > { %v647_v7 = vsub.f32 1.5, %v646_v1  ;;  %v626_v8 = vmul.f32 0.5, %v625_v2 }
 0x15c   : > { %v697_v9 = vmul.f32 %v660_v3, %v5478_v41  ;;  %v698_v10 = vmul.f32 %v664_v4, %v5480_v42  ;;  %v714_v11 = vmul.f32 %v5550_v43, %v701_v5  ;;  %v715_v12 = vmul.f32 %v708_v54, %v702_v6 }
 0x15d   : > { %v648_v13 = vmul.f32 %v4870_v46, %v647_v7  ;;  %v627_v14 = vsub.f32 1.5, %v626_v8 }
 0x15e   : > { %v710_v15 = vmul.f32 %v5550_v43, %v697_v9  ;;  %v711_v35 = vmul.f32 %v708_v54, %v698_v10  ;;  %v5572_v36 = vadd.f32 %v5552_v47, %v714_v11  ;;  %v5574_v16 = vadd.f32 %v721_v61, %v715_v12 }
 0x15f   : > { %v652_v41 = vsel %vm651_vm10, %v4870_v46, %v648_v13  ;;  %v628_v17 = vmul.f32 %v4872_v53, %v627_v14  ;;  %v770_v46 = vperm.slane %v768_v45, 0 }
 0x160   : > { %7068 = vst [vmem:[#allocation20_spill] sm:$0xff] %v5572_v36  ;;  %v5578_v42 = vadd.f32 %v5552_v47, %v710_v15  ;;  %v5580_v18 = vadd.f32 %v721_v61, %v711_v35  ;;  %v684_v19 = vperm.slane %v652_v41, %v5460_v27  ;;  %v688_v20 = vperm.slane %v652_v41, %v5462_v28 }
 0x161   : > { %7069 = vst [vmem:[#allocation21_spill] sm:$0xff] %v5574_v16  ;;  %v632_v21 = vsel %vm631_vm13, %v4872_v53, %v628_v17 }
 0x162   : > { %7070 = vst [vmem:[#allocation22_spill] sm:$0xff] %v5578_v42  ;;  %v703_v22 = vmul.f32 %v684_v19, %v5491_v51  ;;  %v704_v23 = vmul.f32 %v688_v20, %v5494_v52  ;;  %v668_v24 = vperm.slane %v632_v21, %v5460_v27  ;;  %v672_v25 = vperm.slane %v632_v21, %v5462_v28 }
 0x163   : > { %7071 = vst [vmem:[#allocation23_spill] sm:$0xff] %v5580_v18 }
 0x164   : > { %747 = vst [vmem:[#allocation1 + $0x20] ss:$2 sm:$0xff] %v5572_v36  ;;  %v716_v29 = vmul.f32 %v5550_v43, %v703_v22  ;;  %v717_v30 = vmul.f32 %v708_v54, %v704_v23  ;;  %v699_v31 = vmul.f32 %v668_v24, %v5503_v57  ;;  %v700_v32 = vmul.f32 %v672_v25, %v5506_v58 }
 0x165   : > { %749 = vst [vmem:[#allocation1 + $0x21] ss:$2 sm:$0xff] %v5574_v16 }
 0x166   : > { %739 = vst [vmem:[#allocation1] ss:$2 sm:$0xff] %v5578_v42  ;;  %v5596_v33 = vadd.f32 %v5552_v47, %v716_v29  ;;  %v5598_v34 = vadd.f32 %v721_v61, %v717_v30  ;;  %v712_v51 = vmul.f32 %v5550_v43, %v699_v31  ;;  %v713_v52 = vmul.f32 %v708_v54, %v700_v32 }
 0x167   : > { %741 = vst [vmem:[#allocation1 + $0x1] ss:$2 sm:$0xff] %v5580_v18 }
 0x168   : > { %7072 = vst [vmem:[#allocation24_spill] sm:$0xff] %v5596_v33  ;;  %v5603_v37 = vadd.f32 %v5552_v47, %v712_v51  ;;  %v5605_v38 = vadd.f32 %v721_v61, %v713_v52  ;;  %v5617_v47 = vperm.slane %v768_v45, 1 }
 0x169   : > { %7073 = vst [vmem:[#allocation25_spill] sm:$0xff] %v5598_v34 }
 0x16a   : > { %751 = vst [vmem:[#allocation1 + $0x30] ss:$2 sm:$0xff] %v5596_v33 }
 0x16b   : > { %7074 = vst [vmem:[#allocation26_spill] sm:$0xff] %v5605_v38 }
 0x16c   : > { %753 = vst [vmem:[#allocation1 + $0x31] ss:$2 sm:$0xff] %v5598_v34  ;;  %v756_v57 = vld.sshfl [vmem:[#allocation1 + $0x20] sm:$0xff pattern:$0x75316420] }
 0x16d   : > { %743 = vst [vmem:[#allocation1 + $0x10] ss:$2 sm:$0xff] %v5603_v37 }
 0x16e   : > { %745 = vst [vmem:[#allocation1 + $0x11] ss:$2 sm:$0xff] %v5605_v38  ;;  %v754_v40 = vld.sshfl [vmem:[#allocation1] sm:$0xff pattern:$0x75316420] }
 0x173   : > { %v757_v58 = vld.sshfl [vmem:[#allocation1 + $0x30] sm:$0xff pattern:$0x75316420] }
 0x174   : > { %v763_v39 = vpack.c.bf16 %v757_v58, %v756_v57 }
 0x175   : > { %v755_v44 = vld.sshfl [vmem:[#allocation1 + $0x10] sm:$0xff pattern:$0x75316420] }
 0x176   : > { %v762_v43 = vpack.c.bf16 %v755_v44, %v754_v40  ;;  %4619 = vmatmul.msk.bf16.vlgmr.msra.gmra.mxu2 %vm478_vm0, %v763_v39  ;;  %4621 = vmatmul.msk.bf16.vlgmr.msra.gmra.mxu3 %vm478_vm0, %v763_v39 }
 0x178   : > { %4618 = vmatmul.msk.bf16.vlgmr.msra.gmra.mxu0 %vm478_vm0, %v762_v43  ;;  %4620 = vmatmul.msk.bf16.vlgmr.msra.gmra.mxu1 %vm478_vm0, %v762_v43 }
 0x1f5   : > { %v809_v48 = vpop.f32.mrf.mxu0  ;;  %v828_v49 = vpop.f32.mrf.mxu1 }
 0x1f6   : > { %v810_v50 = vadd.f32 %v809_v48, %v770_v46  ;;  %v829_v53 = vadd.f32 %v828_v49, %v5617_v47 }
 0x1f8   : > { %v842_v54 = vrot.slane %v810_v50, 4  ;;  %v5620_v55 = vpack.c.bf16 %v810_v50, %v810_v50  ;;  %v862_v56 = vrot.slane %v829_v53, 4 }
 0x1f9   : > { %v814_v59 = vpop.f32.mrf.mxu2  ;;  %v833_v60 = vpop.f32.mrf.mxu3 }
 0x1fa   : > { %v5622_v61 = vpack.c.bf16 %v842_v54, %v842_v54  ;;  %v1012_v62 = vunpack.c.l.b16 %v5620_v55  ;;  %v834_v63 = vadd.f32 %v833_v60, %v5617_v47  ;;  %v5627_v0 = vsel %vm866_vm14, %v810_v50, %v862_v56 }
 0x1fb   : > { %v5630_v1 = vsel %vm866_vm14, %v862_v56, %v810_v50  ;;  %v815_v4 = vadd.f32 %v814_v59, %v770_v46 }
 0x1fc   : > { %v5632_v2 = vpack.c.b16 %v1012_v62, %v1012_v62  ;;  %v1037_v3 = vunpack.c.l.b16 %v5622_v61  ;;  %v864_v5 = vrot.slane %v834_v63, 4 }
 0x1fd   : > { %v811_v6 = vpop.f32.mrf.mxu0  ;;  %v844_v41 = vrot.slane %v815_v4, 4  ;;  %v854_v17 = vpack.c.bf16 %v815_v4, %v815_v4 }
 0x1fe   : > { %v5635_v7 = vpack.c.b16 %v1037_v3, %v1037_v3  ;;  %v5637_v8 = vadd.f32 %v811_v6, %v770_v46  ;;  %1014 = vrot.lane.b32.xlu2 %v5632_v2, %s5250_s12  ;;  %v5642_v9 = vsel %vm866_vm14, %v815_v4, %v864_v5  ;;  %v5645_v10 = vsel %vm866_vm14, %v864_v5, %v815_v4 }
 0x1ff   : > { %v855_v29 = vpack.c.bf16 %v844_v41, %v844_v41  ;;  %v1109_v30 = vunpack.c.l.b16 %v854_v17 }
 0x200   : > { %v843_v11 = vrot.slane %v5637_v8, 4  ;;  %v852_v12 = vpack.c.bf16 %v5637_v8, %v5637_v8  ;;  %1039 = vrot.lane.b32.xlu0 %v5635_v7, %s5250_s12 }
 0x201   : > { %v816_v13 = vpop.f32.mrf.mxu2  ;;  %v5678_v51 = vpack.c.b16 %v1109_v30, %v1109_v30  ;;  %v1133_v52 = vunpack.c.l.b16 %v855_v29  ;;  %v5731_v41 = vpop.f32.mrf.mxu3 }
 0x202   : > { %v5652_v14 = vpack.c.bf16 %v843_v11, %v843_v11  ;;  %v1061_v15 = vunpack.c.l.b16 %v852_v12  ;;  %v5654_v35 = vadd.f32 %v816_v13, %v770_v46 }
 0x203   : > { %v5684_v58 = vpack.c.b16 %v1133_v52, %v1133_v52 }
 0x204   : > { %v5656_v19 = vpack.c.b16 %v1061_v15, %v1061_v15  ;;  %v1085_v20 = vunpack.c.l.b16 %v5652_v14  ;;  %v845_v21 = vrot.slane %v5654_v35, 4  ;;  %v5662_v22 = vpack.c.bf16 %v5654_v35, %v5654_v35 }
 0x206   : > { %v5664_v23 = vpack.c.b16 %v1085_v20, %v1085_v20  ;;  %v5666_v24 = vpack.c.bf16 %v845_v21, %v845_v21  ;;  %v1157_v25 = vunpack.c.l.b16 %v5662_v22  ;;  %1063 = vrot.lane.b32.xlu1 %v5656_v19, %s5250_s12  ;;  %v5734_v21 = vpop.f32.mrf.mxu1 }
 0x208   : > { %v5671_v31 = vpack.c.b16 %v1157_v25, %v1157_v25  ;;  %1087 = vrot.lane.b32.xlu2 %v5664_v23, %s5250_s12  ;;  %v1181_v32 = vunpack.c.l.b16 %v5666_v24 }
 0x20a   : > { %1159 = vrot.lane.b32.xlu0 %v5671_v31, %s5250_s12  ;;  %v5680_v57 = vpack.c.b16 %v1181_v32, %v1181_v32 }
 0x20e   : > { %1111 = vrot.lane.b32.xlu1 %v5678_v51, %s5250_s12 }
 0x210   : > { %1183 = vrot.lane.b32.xlu2 %v5680_v57, %s5250_s12 }
 0x212   : > { %1135 = vrot.lane.b32.xlu0 %v5684_v58, %s5250_s12 }
 0x216   : > { %1450 = vrot.lane.b32.xlu1 %v5680_v57, %s5251_s13 }
 0x218   : > { %1366 = vrot.lane.b32.xlu2 %v5664_v23, %s5251_s13 }
 0x21a   : > { %1345 = vrot.lane.b32.xlu0 %v5656_v19, %s5251_s13 }
 0x220   : > { %1429 = vrot.lane.b32.xlu2 %v5671_v31, %s5251_s13 }
 0x228   : > { %1519 = vrot.lane.b32.xlu2 %v5656_v19, %s5252_s15 }
 0x230   : > { %1542 = vrot.lane.b32.xlu2 %v5664_v23, %s5252_s15 }
 0x258   : > { %v1015_v39 = vpop.permute.xlu2 %1014 }
 0x259   : > { %v1021_v40 = vsel %vm1016_vm15, %v1015_v39, 0 }
 0x25a   : > { %1030 = vmatpush.bf16.xpose.msrb.mxu2 %v1021_v40 }
 0x261   : > { %4622 = vmatmul.msk.bf16.vlgmr.msrb.gmra.mxu2 %vm1016_vm15, %v5620_v55 }
 0x262   : > { %v1088_v44 = vpop.permute.xlu2 %1087 }
 0x263   : > { %v1093_v46 = vsel %vm1016_vm15, %v1088_v44, 0 }
 0x26a   : > { %v1184_v48 = vpop.permute.xlu2 %1183 }
 0x26b   : > { %v1189_v53 = vsel %vm1016_vm15, %v1184_v48, 0 }
 0x272   : > { %v1040_v43 = vpop.permute.xlu0 %1039  ;;  %v1367_v60 = vpop.permute.xlu2 %1366 }
 0x273   : > { %v1045_v45 = vsel %vm1016_vm15, %v1040_v43, 0 }
 0x274   : > { %1054 = vmatpush.bf16.xpose.msrb.mxu3 %v1045_v45 }
 0x278   : > { %v1064_v49 = vpop.permute.xlu1 %1063 }
 0x279   : > { %v1069_v50 = vsel %vm1016_vm15, %v1064_v49, 0 }
 0x27a   : > { %1078 = vmatpush.bf16.xpose.msra.mxu2 %v1069_v50  ;;  %v1430_v5 = vpop.permute.xlu2 %1429 }
 0x27b   : > { %4623 = vmatmul.msk.bf16.vlgmr.msrb.gmra.mxu3 %vm1016_vm15, %v5622_v61  ;;  %v1372_v61 = vsel %vm1307_vm1, %v1367_v60, 0  ;;  %v1435_v6 = vsel %vm1307_vm1, %v1430_v5, 0 }
 0x27c   : > { %1102 = vmatpush.bf16.xpose.msra.mxu3 %v1093_v46  ;;  %v1160_v54 = vpop.permute.xlu0 %1159 }
 0x27d   : > { %v1165_v55 = vsel %vm1016_vm15, %v1160_v54, 0 }
 0x280   : > { %v1112_v56 = vpop.permute.xlu1 %1111 }
 0x281   : > { %4624 = vmatmul.msk.bf16.vlgmr.msra.gmra.mxu2 %vm1016_vm15, %v852_v12  ;;  %v1117_v59 = vsel %vm1016_vm15, %v1112_v56, 0 }
 0x282   : > { %1174 = vmatpush.bf16.xpose.msrb.mxu2 %v1165_v55  ;;  %1126 = vmatpush.bf16.xpose.msrb.mxu0 %v1117_v59  ;;  %v5756_v56 = vpop.permute.xlu2 %1519 }
 0x284   : > { %1198 = vmatpush.bf16.xpose.msrb.mxu3 %v1189_v53  ;;  %v1136_v62 = vpop.permute.xlu0 %1135 }
 0x285   : > { %v1141_v63 = vsel %vm1016_vm15, %v1136_v62, 0 }
 0x286   : > { %1150 = vmatpush.bf16.xpose.msrb.mxu1 %v1141_v63 }
 0x288   : > { %v1451_v11 = vpop.permute.xlu1 %1450 }
 0x289   : > { %4626 = vmatmul.msk.bf16.vlgmr.msrb.gmra.mxu0 %vm1016_vm15, %v854_v17  ;;  %v1456_v12 = vsel %vm1307_vm1, %v1451_v11, 0 }
 0x28a   : > { %v5758_v59 = vpop.permute.xlu2 %1542 }
 0x28b   : > { %4625 = vmatmul.msk.bf16.vlgmr.msra.gmra.mxu3 %vm1016_vm15, %v5652_v14 }
 0x28c   : > { %1381 = vmatpush.bf16.msra.mxu3 %v1372_v61  ;;  %v1346_v3 = vpop.permute.xlu0 %1345 }
 0x28d   : > { %v1351_v4 = vsel %vm1307_vm1, %v1346_v3, 0  ;;  %4627 = vmatmul.msk.bf16.vlgmr.msrb.gmra.mxu1 %vm1016_vm15, %v855_v29 }
 0x28e   : > { %1360 = vmatpush.bf16.msra.mxu2 %v1351_v4 }
 0x291   : > { %4628 = vmatmul.msk.bf16.vlgmr.msrb.gmra.mxu2 %vm1016_vm15, %v5662_v22 }
 0x292   : > { %1444 = vmatpush.bf16.msrb.mxu2 %v1435_v6 }
 0x29b   : > { %4629 = vmatmul.msk.bf16.vlgmr.msrb.gmra.mxu3 %vm1016_vm15, %v5666_v24 }
 0x29c   : > { %1465 = vmatpush.bf16.msrb.mxu3 %v1456_v12 }
 0x2e4   : > { %v5727_v13 = vpop.f32.mrf.mxu2 }
 0x2e5   : > { %v1205_v14 = vsel %vm1204_vm2, %v5727_v13, -inf }
 0x2e6   : > { %1206 = vmax.xlane.f32.xlu1 %v1205_v14 }
 0x2ec   : > { %v1034_v15 = vpop.f32.mrf.mxu2 }
 0x2fe   : > { %v1056_v17 = vpop.f32.mrf.mxu3 }
 0x2ff   : > { %v1208_v20 = vsel %vm1204_vm2, %v1056_v17, -inf }
 0x300   : > { %1209 = vmax.xlane.f32.xlu0 %v1208_v20 }
 0x304   : > { %v1080_v22 = vpop.f32.mrf.mxu2 }
 0x305   : > { %v1211_v24 = vsel %vm1204_vm2, %v1080_v22, -inf }
 0x306   : > { %1212 = vmax.xlane.f32.xlu2 %v1211_v24  ;;  %v1058_v25 = vpop.f32.mrf.mxu3  ;;  %v5737_v29 = vpop.f32.mrf.mxu0 }
 0x307   : > { %v1217_v30 = vsel %vm1204_vm2, %v5737_v29, -inf }
 0x308   : > { %1218 = vmax.xlane.f32.xlu1 %v1217_v30 }
 0x30a   : > { %v5741_v32 = vpop.f32.mrf.mxu1 }
 0x30b   : > { %v1220_v44 = vsel %vm1204_vm2, %v5741_v32, -inf }
 0x30c   : > { %v1082_v52 = vpop.f32.mrf.mxu2 }
 0x30e   : > { %v1104_v39 = vpop.f32.mrf.mxu3  ;;  %v1130_v40 = vpop.f32.mrf.mxu0 }
 0x30f   : > { %v1214_v49 = vsel %vm1204_vm2, %v1104_v39, -inf }
 0x310   : > { %1221 = vmax.xlane.f32.xlu1 %v1220_v44 }
 0x312   : > { %v1154_v43 = vpop.f32.mrf.mxu1 }
 0x314   : > { %v1176_v45 = vpop.f32.mrf.mxu2 }
 0x315   : > { %v1223_v46 = vsel %vm1204_vm2, %v1176_v45, -inf }
 0x316   : > { %v1106_v48 = vpop.f32.mrf.mxu3  ;;  %1224 = vmax.xlane.f32.xlu0 %v1223_v46 }
 0x318   : > { %1215 = vmax.xlane.f32.xlu1 %v1214_v49 }
 0x31c   : > { %v1178_v50 = vpop.f32.mrf.mxu2 }
 0x31e   : > { %v1200_v53 = vpop.f32.mrf.mxu3 }
 0x31f   : > { %v1226_v54 = vsel %vm1204_vm2, %v1200_v53, -inf }
 0x320   : > { %1227 = vmax.xlane.f32.xlu2 %v1226_v54 }
 0x326   : > { %v1202_v55 = vpop.f32.mrf.mxu3 }
 0x331   : > { %1540 = vrot.lane.b32.xlu1 %v5664_v23, %s5253_s27 }
 0x339   : > { %1611 = vrot.lane.b32.xlu1 %v5671_v31, %s5252_s15 }
 0x341   : > { %1301 = vrot.lane.b32.xlu1 %v5632_v2, %s5251_s13 }
 0x349   : > { %1324 = vrot.lane.b32.xlu1 %v5635_v7, %s5251_s13 }
 0x359   : > { %v1207_v60 = vpop.xlane.xlu1 %1206 }
 0x373   : > { %v1210_v62 = vpop.xlane.xlu0 %1209 }
 0x374   : > { %v1230_v63 = vsub.f32 %v1056_v17, %v1210_v62  ;;  %v1229_v62 = vsub.f32 %v5727_v13, %v1207_v60 }
 0x376   : > { %v1239_v61 = vmul.f32 1.442695, %v1230_v63  ;;  %v1237_v63 = vmul.f32 1.442695, %v1229_v62 }
 0x378   : > { %4873 = vpow2.f32 %v1239_v61 }
 0x379   : > { %v1213_v3 = vpop.xlane.xlu2 %1212 }
 0x37a   : > { %v1231_v4 = vsub.f32 %v1080_v22, %v1213_v3 }
 0x37b   : > { %v1219_v5 = vpop.xlane.xlu1 %1218 }
 0x37c   : > { %v1241_v6 = vmul.f32 1.442695, %v1231_v4  ;;  %v1233_v60 = vsub.f32 %v5737_v29, %v1219_v5 }
 0x37e   : > { %v5760_v11 = vpop.eup %4873  ;;  %4875 = vpow2.f32 %v1241_v6 }
 0x37f   : > { %v1256_v12 = vsel %vm1204_vm2, %v5760_v11, 0.0 }
 0x380   : > { %1257 = vadd.xlane.f32.xlu0 %v1256_v12  ;;  %v1245_v12 = vmul.f32 1.442695, %v1233_v60 }
 0x383   : > { %v1222_v14 = vpop.xlane.xlu1 %1221 }
 0x384   : > { %v5764_v15 = vpop.eup %4875 }
 0x385   : > { %v1259_v20 = vsel %vm1204_vm2, %v5764_v15, 0.0 }
 0x386   : > { %1260 = vadd.xlane.f32.xlu2 %v1259_v20 }
 0x389   : > { %v1225_v48 = vpop.xlane.xlu0 %1224 }
 0x38a   : > { %v1235_v50 = vsub.f32 %v1176_v45, %v1225_v48 }
 0x38b   : > { %v1216_v17 = vpop.xlane.xlu1 %1215 }
 0x38c   : > { %v1232_v24 = vsub.f32 %v1104_v39, %v1216_v17 }
 0x38e   : > { %v1243_v25 = vmul.f32 1.442695, %v1232_v24  ;;  %v1234_v24 = vsub.f32 %v5741_v32, %v1222_v14 }
 0x390   : > { %4877 = vpow2.f32 %v1243_v25  ;;  %v1247_v29 = vmul.f32 1.442695, %v1234_v24 }
 0x393   : > { %v1228_v22 = vpop.xlane.xlu2 %1227 }
 0x394   : > { %v1236_v30 = vsub.f32 %v1200_v53, %v1228_v22  ;;  %1634 = vrot.lane.b32.xlu0 %v5680_v57, %s5252_s15  ;;  %v1249_v53 = vmul.f32 1.442695, %v1235_v50 }
 0x396   : > { %v5770_v52 = vpop.eup %4877  ;;  %v1251_v40 = vmul.f32 1.442695, %v1236_v30 }
 0x397   : > { %v1262_v44 = vsel %vm1204_vm2, %v5770_v52, 0.0 }
 0x398   : > { %4879 = vpow2.f32 %v1251_v40  ;;  %1263 = vadd.xlane.f32.xlu1 %v1262_v44 }
 0x399   : > { %4881 = vpow2.f32 %v1249_v53 }
 0x39a   : > { %4883 = vpow2.f32 %v1237_v63 }
 0x39b   : > { %4885 = vpow2.f32 %v1245_v12 }
 0x39c   : > { %4887 = vpow2.f32 %v1247_v29 }
 0x39e   : > { %v5774_v43 = vpop.eup %4879  ;;  %1517 = vrot.lane.b32.xlu2 %v5656_v19, %s5253_s27 }
 0x39f   : > { %v1274_v39 = vsel %vm1204_vm2, %v5774_v43, 0.0  ;;  %v5788_v61 = vpop.eup %4881 }
 0x3a0   : > { %1275 = vadd.xlane.f32.xlu1 %v1274_v39  ;;  %v1271_v45 = vsel %vm1204_vm2, %v5788_v61, 0.0  ;;  %v5793_v6 = vpop.eup %4883 }
 0x3a1   : > { %v1253_v13 = vsel %vm1204_vm2, %v5793_v6, 0.0  ;;  %v5800_v20 = vpop.eup %4885 }
 0x3a2   : > { %v1265_v17 = vsel %vm1204_vm2, %v5800_v20, 0.0  ;;  %v5813_v25 = vpop.eup %4887 }
 0x3a3   : > { %v5780_v46 = vpop.permute.xlu1 %1540  ;;  %v1268_v32 = vsel %vm1204_vm2, %v5813_v25, 0.0 }
 0x3ab   : > { %v5782_v49 = vpop.permute.xlu1 %1611 }
 0x3b3   : > { %v1302_v54 = vpop.permute.xlu1 %1301 }
 0x3b4   : > { %v1309_v55 = vsel %vm1307_vm1, %v1302_v54, 0 }
 0x3b5   : > { %1318 = vmatpush.bf16.msra.mxu0 %v1309_v55  ;;  %v1548_v55 = vsel %vm1016_vm15, %v5758_v59, 0 }
 0x3b9   : > { %1609 = vrot.lane.b32.xlu1 %v5671_v31, %s5253_s27 }
 0x3bb   : > { %v1325_v3 = vpop.permute.xlu1 %1324 }
 0x3bc   : > { %v1330_v4 = vsel %vm1307_vm1, %v1325_v3, 0 }
 0x3bd   : > { %1339 = vmatpush.bf16.msra.mxu1 %v1330_v4 }
 0x3be   : > { %1272 = vadd.xlane.f32.xlu0 %v1271_v45 }
 0x3c7   : > { %1254 = vadd.xlane.f32.xlu2 %v1253_v13 }
 0x3d2   : > { %1632 = vrot.lane.b32.xlu0 %v5680_v57, %s5253_s27 }
 0x3df   : > { %1387 = vrot.lane.b32.xlu2 %v5678_v51, %s5251_s13 }
 0x3e3   : > { %1266 = vadd.xlane.f32.xlu1 %v1265_v17  ;;  %v1617_v17 = vsel %vm1016_vm15, %v5782_v49, 0 }
 0x3e7   : > { %1408 = vrot.lane.b32.xlu2 %v5684_v58, %s5251_s13 }
 0x3ef   : > { %1473 = vrot.lane.b32.xlu2 %v5632_v2, %s5252_s15 }
 0x3f3   : > { %v1258_v5 = vpop.xlane.xlu0 %1257 }
 0x3f4   : > { %4889 = vrcp.f32 %v1258_v5 }
 0x3f7   : > { %1494 = vrot.lane.b32.xlu2 %v5635_v7, %s5253_s27 }
 0x3f9   : > { %v1261_v22 = vpop.xlane.xlu2 %1260 }
 0x3fa   : > { %v4890_v30 = vpop.eup %4889  ;;  %4891 = vrcp.f32 %v1261_v22 }
 0x3fb   : > { %v1286_v40 = vmul.f32 %v4890_v30, %v5760_v11  ;;  %v1525_v11 = vsel %vm1016_vm15, %v5756_v56, 0 }
 0x3fc   : > { %1496 = vrot.lane.b32.xlu1 %v5635_v7, %s5252_s15  ;;  %1269 = vadd.xlane.f32.xlu0 %v1268_v32 }
 0x3fd   : > { %v1294_v14 = vpack.c.bf16 %v1286_v40, %v1286_v40 }
 0x3ff   : > { %1565 = vrot.lane.b32.xlu2 %v5678_v51, %s5252_s15  ;;  %4631 = vmatmul.msk.bf16.vlgmr.msra.gmra.mxu1 %vm1303_vm3, %v1294_v14 }
 0x400   : > { %v4892_v44 = vpop.eup %4891 }
 0x401   : > { %v1287_v39 = vmul.f32 %v4892_v44, %v5764_v15  ;;  %v1518_v45 = vpop.permute.xlu2 %1517 }
 0x403   : > { %v1295_v48 = vpack.c.bf16 %v1287_v39, %v1287_v39 }
 0x404   : > { %1586 = vrot.lane.b32.xlu1 %v5684_v58, %s5253_s27 }
 0x405   : > { %4632 = vmatmul.msk.bf16.vlgmr.msra.gmra.mxu2 %vm1303_vm3, %v1295_v48 }
 0x406   : > { %1534 = vmatpush.bf16.xpose.msra.mxu2 %v1525_v11  ;;  %v1635_v3 = vpop.permute.xlu0 %1634 }
 0x407   : > { %1588 = vrot.lane.b32.xlu2 %v5684_v58, %s5252_s15  ;;  %v1640_v4 = vsel %vm1016_vm15, %v1635_v3, 0 }
 0x40b   : > { %v1264_v50 = vpop.xlane.xlu1 %1263 }
 0x40c   : > { %4893 = vrcp.f32 %v1264_v50  ;;  %1814 = vrot.lane.b32.xlu1 %v5664_v23, %s5254_s22 }
 0x40f   : > { %1877 = vrot.lane.b32.xlu2 %v5671_v31, %s5254_s22 }
 0x410   : > { %1471 = vrot.lane.b32.xlu0 %v5632_v2, %s5253_s27 }
 0x412   : > { %v4894_v15 = vpop.eup %4893 }
 0x413   : > { %v1288_v56 = vmul.f32 %v4894_v15, %v5770_v52  ;;  %v1276_v54 = vpop.xlane.xlu1 %1275 }
 0x414   : > { %4895 = vrcp.f32 %v1276_v54 }
 0x415   : > { %v1296_v53 = vpack.c.bf16 %v1288_v56, %v1288_v56 }
 0x417   : > { %4633 = vmatmul.msk.bf16.vlgmr.msra.gmra.mxu3 %vm1303_vm3, %v1296_v53 }
 0x418   : > { %1557 = vmatpush.bf16.xpose.msra.mxu3 %v1548_v55  ;;  %1563 = vrot.lane.b32.xlu0 %v5678_v51, %s5253_s27 }
 0x41a   : > { %v4896_v62 = vpop.eup %4895 }
 0x41b   : > { %v1292_v63 = vmul.f32 %v4896_v62, %v5774_v43 }
 0x41d   : > { %v1300_v52 = vpack.c.bf16 %v1292_v63, %v1292_v63 }
 0x420   : > { %1793 = vrot.lane.b32.xlu0 %v5656_v19, %s5254_s22 }
 0x427   : > { %4637 = vmatmul.msk.bf16.vlgmr.msrb.gmra.mxu3 %vm1303_vm3, %v1300_v52 }
 0x428   : > { %1649 = vmatpush.bf16.xpose.msrb.mxu3 %v1640_v4  ;;  %1898 = vrot.lane.b32.xlu0 %v5680_v57, %s5254_s22 }
 0x42b   : > { %v1610_v49 = vpop.permute.xlu1 %1609 }
 0x431   : > { %v1273_v59 = vpop.xlane.xlu0 %1272 }
 0x432   : > { %4897 = vrcp.f32 %v1273_v59 }
 0x437   : > { %4641 = vmatmul.msk.bf16.vlgmr.msra.gmra.mxu3 %vm1016_vm15, %v5780_v46 }
 0x438   : > { %v4898_v13 = vpop.eup %4897 }
 0x439   : > { %v1291_v60 = vmul.f32 %v4898_v13, %v5788_v61 }
 0x43a   : > { %v1255_v43 = vpop.xlane.xlu2 %1254 }
 0x43b   : > { %v1299_v12 = vpack.c.bf16 %v1291_v60, %v1291_v60  ;;  %4899 = vrcp.f32 %v1255_v43 }
 0x43d   : > { %4636 = vmatmul.msk.bf16.vlgmr.msrb.gmra.mxu2 %vm1303_vm3, %v1299_v12 }
 0x43e   : > { %1626 = vmatpush.bf16.xpose.msrb.mxu2 %v1617_v17 }
 0x441   : > { %v4900_v24 = vpop.eup %4899 }
 0x442   : > { %v1285_v29 = vmul.f32 %v4900_v24, %v5793_v6  ;;  %v1388_v5 = vpop.permute.xlu2 %1387 }
 0x443   : > { %v1393_v22 = vsel %vm1307_vm1, %v1388_v5, 0 }
 0x444   : > { %v1293_v30 = vpack.c.bf16 %v1285_v29, %v1285_v29  ;;  %1402 = vmatpush.bf16.msrb.mxu0 %v1393_v22  ;;  %v1633_v46 = vpop.permute.xlu0 %1632 }
 0x446   : > { %4630 = vmatmul.msk.bf16.vlgmr.msra.gmra.mxu0 %vm1303_vm3, %v1293_v30 }
 0x447   : > { %4645 = vmatmul.msk.bf16.vlgmr.msrb.gmra.mxu3 %vm1016_vm15, %v1633_v46 }
 0x44a   : > { %v1409_v61 = vpop.permute.xlu2 %1408 }
 0x44b   : > { %v1414_v40 = vsel %vm1307_vm1, %v1409_v61, 0 }
 0x44c   : > { %1423 = vmatpush.bf16.msrb.mxu1 %v1414_v40 }
 0x44d   : > { %4640 = vmatmul.msk.bf16.vlgmr.msra.gmra.mxu2 %vm1016_vm15, %v1518_v45 }
 0x452   : > { %v1474_v32 = vpop.permute.xlu2 %1473 }
 0x453   : > { %v1479_v6 = vsel %vm1016_vm15, %v1474_v32, 0 }
 0x454   : > { %1488 = vmatpush.bf16.xpose.msra.mxu0 %v1479_v6 }
 0x456   : > { %v1267_v14 = vpop.xlane.xlu1 %1266 }
 0x457   : > { %4901 = vrcp.f32 %v1267_v14 }
 0x45a   : > { %v1495_v44 = vpop.permute.xlu2 %1494 }
 0x45d   : > { %v4902_v39 = vpop.eup %4901  ;;  %4644 = vmatmul.msk.bf16.vlgmr.msrb.gmra.mxu2 %vm1016_vm15, %v1610_v49 }
 0x45e   : > { %v1289_v48 = vmul.f32 %v4902_v39, %v5800_v20 }
 0x460   : > { %v1297_v11 = vpack.c.bf16 %v1289_v48, %v1289_v48 }
 0x462   : > { %v1566_v50 = vpop.permute.xlu2 %1565  ;;  %4634 = vmatmul.msk.bf16.vlgmr.msrb.gmra.mxu0 %vm1303_vm3, %v1297_v11 }
 0x463   : > { %v1571_v15 = vsel %vm1016_vm15, %v1566_v50, 0 }
 0x464   : > { %1580 = vmatpush.bf16.xpose.msrb.mxu0 %v1571_v15 }
 0x46a   : > { %v1589_v3 = vpop.permute.xlu2 %1588 }
 0x46b   : > { %v1594_v20 = vsel %vm1016_vm15, %v1589_v3, 0 }
 0x46e   : > { %v1497_v56 = vpop.permute.xlu1 %1496 }
 0x46f   : > { %v1502_v53 = vsel %vm1016_vm15, %v1497_v56, 0  ;;  %v1270_v54 = vpop.xlane.xlu0 %1269 }
 0x470   : > { %4903 = vrcp.f32 %v1270_v54  ;;  %1511 = vmatpush.bf16.xpose.msra.mxu1 %v1502_v53 }
 0x472   : > { %v1878_v17 = vpop.permute.xlu2 %1877 }
 0x473   : > { %v1883_v5 = vsel %vm1307_vm1, %v1878_v17, 0 }
 0x476   : > { %v4904_v55 = vpop.eup %4903  ;;  %v1587_v62 = vpop.permute.xlu1 %1586 }
 0x477   : > { %v1290_v63 = vmul.f32 %v4904_v55, %v5813_v25 }
 0x479   : > { %v1298_v52 = vpack.c.bf16 %v1290_v63, %v1290_v63 }
 0x47b   : > { %4635 = vmatmul.msk.bf16.vlgmr.msrb.gmra.mxu1 %vm1303_vm3, %v1298_v52 }
 0x47c   : > { %1603 = vmatpush.bf16.xpose.msrb.mxu1 %v1594_v20  ;;  %v5871_v4 = vpop.f32.mrf.mxu1 }
 0x47e   : > { %v1815_v59 = vpop.permute.xlu1 %1814 }
 0x47f   : > { %v1820_v45 = vsel %vm1307_vm1, %v1815_v59, 0 }
 0x480   : > { %1829 = vmatpush.bf16.msra.mxu3 %v1820_v45 }
 0x482   : > { %v1472_v13 = vpop.permute.xlu0 %1471 }
 0x483   : > { %4638 = vmatmul.msk.bf16.vlgmr.msra.gmra.mxu0 %vm1016_vm15, %v1472_v13 }
 0x484   : > { %v1343_v60 = vpop.f32.mrf.mxu1 }
 0x488   : > { %v5875_v43 = vpop.f32.mrf.mxu2 }
 0x48a   : > { %v1564_v25 = vpop.permute.xlu0 %1563 }
 0x48b   : > { %4639 = vmatmul.msk.bf16.vlgmr.msra.gmra.mxu1 %vm1016_vm15, %v1495_v44 }
 0x490   : > { %v1364_v12 = vpop.f32.mrf.mxu2 }
 0x492   : > { %v1794_v24 = vpop.permute.xlu0 %1793 }
 0x493   : > { %v1799_v29 = vsel %vm1307_vm1, %v1794_v24, 0  ;;  %4642 = vmatmul.msk.bf16.vlgmr.msrb.gmra.mxu0 %vm1016_vm15, %v1564_v25 }
 0x494   : > { %1808 = vmatpush.bf16.msra.mxu2 %v1799_v29 }
 0x498   : > { %1892 = vmatpush.bf16.msrb.mxu2 %v1883_v5 }
 0x49a   : > { %v5881_v22 = vpop.f32.mrf.mxu3  ;;  %v1899_v30 = vpop.permute.xlu0 %1898 }
 0x49b   : > { %v1904_v46 = vsel %vm1307_vm1, %v1899_v30, 0  ;;  %4643 = vmatmul.msk.bf16.vlgmr.msrb.gmra.mxu1 %vm1016_vm15, %v1587_v62 }
 0x49c   : > { %1913 = vmatpush.bf16.msrb.mxu3 %v1904_v46 }
 0x4a2   : > { %v1385_v61 = vpop.f32.mrf.mxu3 }
 0x4aa   : > { %v5885_v40 = vpop.f32.mrf.mxu3 }
 0x4ab   : > { %7075 = vst [vmem:[#allocation27_spill] sm:$0xff] %v5885_v40 }
 0x4b2   : > { %v1469_v49 = vpop.f32.mrf.mxu3 }
 0x4ba   : > { %v1559_v32 = vpop.f32.mrf.mxu3 }
 0x4bb   : > { %v1664_v60 = vsel %vm1204_vm2, %v1559_v32, -inf }
 0x4c0   : > { %v5887_v6 = vpop.f32.mrf.mxu2 }
 0x4c1   : > { %7076 = vst [vmem:[#allocation28_spill] sm:$0xff] %v5887_v6 }
 0x4c2   : > { %v1561_v14 = vpop.f32.mrf.mxu3 }
 0x4c3   : > { %v5889_v44 = vpop.f32.mrf.mxu0 }
 0x4c8   : > { %v1448_v39 = vpop.f32.mrf.mxu2 }
 0x4ca   : > { %v5891_v48 = vpop.f32.mrf.mxu3 }
 0x4cb   : > { %v1322_v11 = vpop.f32.mrf.mxu0  ;;  %v1676_v49 = vsel %vm1204_vm2, %v5891_v48, -inf }
 0x4d0   : > { %v1536_v50 = vpop.f32.mrf.mxu2 }
 0x4d1   : > { %v1661_v61 = vsel %vm1204_vm2, %v1536_v50, -inf }
 0x4d2   : > { %v1653_v15 = vpop.f32.mrf.mxu3 }
 0x4d8   : > { %v1538_v56 = vpop.f32.mrf.mxu2 }
 0x4df   : > { %v5893_v53 = vpop.f32.mrf.mxu0 }
 0x4e0   : > { %v5895_v54 = vpop.f32.mrf.mxu2 }
 0x4e1   : > { %v1673_v30 = vsel %vm1204_vm2, %v5895_v54, -inf }
 0x4e7   : > { %v1406_v55 = vpop.f32.mrf.mxu0 }
 0x4e8   : > { %v1630_v62 = vpop.f32.mrf.mxu2 }
 0x4f8   : > { %v5897_v63 = vpop.f32.mrf.mxu1 }
 0x500   : > { %v1427_v3 = vpop.f32.mrf.mxu1  ;;  %v1490_v52 = vpop.f32.mrf.mxu0 }
 0x501   : > { %v1655_v20 = vsel %vm1204_vm2, %v1490_v52, -inf }
 0x502   : > { %1656 = vmax.xlane.f32.xlu0 %v1655_v20 }
 0x508   : > { %v1492_v59 = vpop.f32.mrf.mxu0  ;;  %v1513_v45 = vpop.f32.mrf.mxu1 }
 0x509   : > { %v1658_v13 = vsel %vm1204_vm2, %v1513_v45, -inf }
 0x50a   : > { %1659 = vmax.xlane.f32.xlu1 %v1658_v13  ;;  %1665 = vmax.xlane.f32.xlu0 %v1664_v60 }
 0x510   : > { %v1515_v25 = vpop.f32.mrf.mxu1  ;;  %v1582_v12 = vpop.f32.mrf.mxu0 }
 0x511   : > { %v1667_v17 = vsel %vm1204_vm2, %v1582_v12, -inf }
 0x512   : > { %1668 = vmax.xlane.f32.xlu1 %v1667_v17 }
 0x518   : > { %v1584_v24 = vpop.f32.mrf.mxu0  ;;  %v5903_v29 = vpop.f32.mrf.mxu1 }
 0x519   : > { %v1670_v5 = vsel %vm1204_vm2, %v5903_v29, -inf }
 0x51a   : > { %1671 = vmax.xlane.f32.xlu2 %v1670_v5  ;;  %1674 = vmax.xlane.f32.xlu1 %v1673_v30 }
 0x520   : > { %v1607_v46 = vpop.f32.mrf.mxu1 }
 0x522   : > { %1662 = vmax.xlane.f32.xlu2 %v1661_v61 }
 0x52a   : > { %1677 = vmax.xlane.f32.xlu2 %v1676_v49 }
 0x533   : > { %1967 = vrot.lane.b32.xlu1 %v5656_v19, %s5255_s1 }
 0x575   : > { %v1657_v14 = vpop.xlane.xlu0 %1656 }
 0x576   : > { %v1679_v39 = vsub.f32 %v1490_v52, %v1657_v14 }
 0x578   : > { %v1687_v11 = vmul.f32 1.442695, %v1679_v39 }
 0x57a   : > { %4905 = vpow2.f32 %v1687_v11 }
 0x57d   : > { %v1666_v15 = vpop.xlane.xlu0 %1665 }
 0x57e   : > { %v1682_v56 = vsub.f32 %v1559_v32, %v1666_v15 }
 0x580   : > { %v5914_v55 = vpop.eup %4905  ;;  %v1693_v62 = vmul.f32 1.442695, %v1682_v56 }
 0x581   : > { %v1703_v3 = vsel %vm1204_vm2, %v5914_v55, 0.0 }
 0x582   : > { %1704 = vadd.xlane.f32.xlu1 %v1703_v3  ;;  %4907 = vpow2.f32 %v1693_v62 }
 0x588   : > { %v4908_v20 = vpop.eup %4907 }
 0x589   : > { %v1712_v59 = vsel %vm1204_vm2, %v4908_v20, 0.0 }
 0x58a   : > { %1713 = vadd.xlane.f32.xlu0 %v1712_v59 }
 0x58d   : > { %v5919_v13 = vpop.xlane.xlu2 %1671 }
 0x595   : > { %v1663_v60 = vpop.xlane.xlu2 %1662 }
 0x596   : > { %v1681_v52 = vsub.f32 %v1536_v50, %v1663_v60  ;;  %v1660_v50 = vpop.xlane.xlu1 %1659 }
 0x597   : > { %v1680_v24 = vsub.f32 %v1513_v45, %v1660_v50 }
 0x598   : > { %v1691_v25 = vmul.f32 1.442695, %v1681_v52 }
 0x599   : > { %v1689_v5 = vmul.f32 1.442695, %v1680_v24 }
 0x59a   : > { %4909 = vpow2.f32 %v1691_v25 }
 0x59b   : > { %2082 = vrot.lane.b32.xlu1 %v5680_v57, %s5255_s1  ;;  %4911 = vpow2.f32 %v1689_v5 }
 0x59d   : > { %v1678_v56 = vpop.xlane.xlu2 %1677 }
 0x59e   : > { %1990 = vrot.lane.b32.xlu0 %v5664_v23, %s5255_s1  ;;  %v1669_v30 = vpop.xlane.xlu1 %1668  ;;  %v1686_v62 = vsub.f32 %v5891_v48, %v1678_v56 }
 0x59f   : > { %v1683_v46 = vsub.f32 %v1582_v12, %v1669_v30 }
 0x5a0   : > { %v5925_v32 = vpop.eup %4909  ;;  %v1701_v3 = vmul.f32 1.442695, %v1686_v62 }
 0x5a1   : > { %v1709_v17 = vsel %vm1204_vm2, %v5925_v32, 0.0  ;;  %v1695_v61 = vmul.f32 1.442695, %v1683_v46  ;;  %v5943_v49 = vpop.eup %4911 }
 0x5a2   : > { %1710 = vadd.xlane.f32.xlu2 %v1709_v17  ;;  %v1706_v45 = vsel %vm1204_vm2, %v5943_v49, 0.0 }
 0x5a3   : > { %2080 = vrot.lane.b32.xlu1 %v5680_v57, %s5256_s26  ;;  %4913 = vpow2.f32 %v1695_v61 }
 0x5a6   : > { %v1675_v39 = vpop.xlane.xlu1 %1674 }
 0x5a7   : > { %v1685_v11 = vsub.f32 %v5895_v54, %v1675_v39 }
 0x5a9   : > { %v5951_v12 = vpop.eup %4913  ;;  %v1699_v15 = vmul.f32 1.442695, %v1685_v11 }
 0x5aa   : > { %v1715_v14 = vsel %vm1204_vm2, %v5951_v12, 0.0 }
 0x5ab   : > { %1856 = vrot.lane.b32.xlu1 %v5684_v58, %s5254_s22  ;;  %4915 = vpow2.f32 %v1699_v15 }
 0x5ac   : > { %4917 = vpow2.f32 %v1701_v3 }
 0x5ae   : > { %v1968_v24 = vpop.permute.xlu1 %1967 }
 0x5af   : > { %v1973_v15 = vsel %vm1016_vm15, %v1968_v24, 0 }
 0x5b1   : > { %v5965_v59 = vpop.eup %4915 }
 0x5b2   : > { %v1721_v60 = vsel %vm1204_vm2, %v5965_v59, 0.0  ;;  %v5971_v52 = vpop.eup %4917 }
 0x5b3   : > { %1944 = vrot.lane.b32.xlu1 %v5635_v7, %s5255_s1  ;;  %v1724_v48 = vsel %vm1204_vm2, %v5971_v52, 0.0 }
 0x5ba   : > { %1965 = vrot.lane.b32.xlu2 %v5656_v19, %s5256_s26 }
 0x5bb   : > { %2013 = vrot.lane.b32.xlu1 %v5678_v51, %s5255_s1 }
 0x5c2   : > { %1988 = vrot.lane.b32.xlu2 %v5664_v23, %s5256_s26 }
 0x5c3   : > { %2011 = vrot.lane.b32.xlu1 %v5678_v51, %s5256_s26 }
 0x5c8   : > { %1707 = vadd.xlane.f32.xlu0 %v1706_v45 }
 0x5ca   : > { %1751 = vrot.lane.b32.xlu2 %v5632_v2, %s5254_s22 }
 0x5cb   : > { %2325 = vrot.lane.b32.xlu1 %v5671_v31, %s5257_s14 }
 0x5d0   : > { %1716 = vadd.xlane.f32.xlu0 %v1715_v14 }
 0x5d2   : > { %1772 = vrot.lane.b32.xlu2 %v5635_v7, %s5254_s22 }
 0x5e4   : > { %2057 = vrot.lane.b32.xlu0 %v5671_v31, %s5256_s26 }
 0x5ec   : > { %1835 = vrot.lane.b32.xlu0 %v5678_v51, %s5254_s22 }
 0x5f4   : > { %1921 = vrot.lane.b32.xlu0 %v5632_v2, %s5255_s1 }
 0x5f5   : > { %v1705_v61 = vpop.xlane.xlu1 %1704 }
 0x5fb   : > { %1722 = vadd.xlane.f32.xlu2 %v1721_v60 }
 0x5fc   : > { %1919 = vrot.lane.b32.xlu0 %v5632_v2, %s5256_s26 }
 0x5fd   : > { %v1714_v54 = vpop.xlane.xlu0 %1713 }
 0x5fe   : > { %4919 = vrcp.f32 %v1714_v54 }
 0x603   : > { %1725 = vadd.xlane.f32.xlu2 %v1724_v48 }
 0x604   : > { %v4920_v25 = vpop.eup %4919  ;;  %2036 = vrot.lane.b32.xlu0 %v5684_v58, %s5255_s1 }
 0x605   : > { %v1738_v17 = vmul.f32 %v4920_v25, %v4908_v20  ;;  %v1684_v25 = vsub.f32 %v5903_v29, %v5919_v13 }
 0x607   : > { %v1746_v50 = vpack.c.bf16 %v1738_v17, %v1738_v17  ;;  %v1697_v24 = vmul.f32 1.442695, %v1684_v25 }
 0x609   : > { %4649 = vmatmul.msk.bf16.vlgmr.msra.gmra.mxu3 %vm1303_vm3, %v1746_v50 }
 0x60c   : > { %2034 = vrot.lane.b32.xlu0 %v5684_v58, %s5256_s26 }
 0x60d   : > { %v5990_v11 = vpop.permute.xlu1 %2082 }
 0x610   : > { %v1991_v5 = vpop.permute.xlu0 %1990 }
 0x611   : > { %v1996_v30 = vsel %vm1016_vm15, %v1991_v5, 0 }
 0x612   : > { %2005 = vmatpush.bf16.xpose.msra.mxu3 %v1996_v30 }
 0x614   : > { %2241 = vrot.lane.b32.xlu0 %v5656_v19, %s5257_s14 }
 0x615   : > { %v1711_v46 = vpop.xlane.xlu2 %1710  ;;  %v5996_v3 = vpop.permute.xlu1 %2080 }
 0x616   : > { %4921 = vrcp.f32 %v1711_v46 }
 0x617   : > { %4923 = vrcp.f32 %v1705_v61 }
 0x618   : > { %4925 = vpow2.f32 %v1697_v24 }
 0x61b   : > { %2059 = vrot.lane.b32.xlu2 %v5671_v31, %s5255_s1 }
 0x61c   : > { %v4922_v20 = vpop.eup %4921  ;;  %2346 = vrot.lane.b32.xlu0 %v5680_v57, %s5257_s14 }
 0x61d   : > { %v1737_v45 = vmul.f32 %v4922_v20, %v5925_v32  ;;  %v5988_v14 = vpop.permute.xlu2 %1965  ;;  %v4924_v62 = vpop.eup %4923 }
 0x61e   : > { %v1735_v32 = vmul.f32 %v4924_v62, %v5914_v55  ;;  %v1857_v17 = vpop.permute.xlu1 %1856  ;;  %v6005_v46 = vpop.eup %4925 }
 0x61f   : > { %v1745_v39 = vpack.c.bf16 %v1737_v45, %v1737_v45  ;;  %v1862_v30 = vsel %vm1307_vm1, %v1857_v17, 0  ;;  %v1718_v29 = vsel %vm1204_vm2, %v6005_v46, 0.0 }
 0x620   : > { %v1743_v48 = vpack.c.bf16 %v1735_v32, %v1735_v32 }
 0x621   : > { %4648 = vmatmul.msk.bf16.vlgmr.msra.gmra.mxu2 %vm1303_vm3, %v1745_v39 }
 0x622   : > { %1982 = vmatpush.bf16.xpose.msra.mxu2 %v1973_v15 }
 0x625   : > { %v5994_v56 = vpop.permute.xlu2 %1988 }
 0x626   : > { %v1945_v20 = vpop.permute.xlu1 %1944 }
 0x627   : > { %v1950_v39 = vsel %vm1016_vm15, %v1945_v20, 0 }
 0x62d   : > { %v1752_v60 = vpop.permute.xlu2 %1751 }
 0x62e   : > { %v1757_v54 = vsel %vm1307_vm1, %v1752_v60, 0  ;;  %v2014_v25 = vpop.permute.xlu1 %2013 }
 0x62f   : > { %1766 = vmatpush.bf16.msra.mxu0 %v1757_v54  ;;  %v2019_v24 = vsel %vm1016_vm15, %v2014_v25, 0 }
 0x632   : > { %4646 = vmatmul.msk.bf16.vlgmr.msra.gmra.mxu0 %vm1303_vm3, %v1743_v48 }
 0x635   : > { %v1773_v50 = vpop.permute.xlu2 %1772 }
 0x636   : > { %v1778_v5 = vsel %vm1307_vm1, %v1773_v50, 0 }
 0x637   : > { %1787 = vmatpush.bf16.msra.mxu1 %v1778_v5 }
 0x63b   : > { %1871 = vmatpush.bf16.msrb.mxu1 %v1862_v30  ;;  %v1708_v55 = vpop.xlane.xlu0 %1707 }
 0x63c   : > { %4927 = vrcp.f32 %v1708_v55 }
 0x642   : > { %v4928_v61 = vpop.eup %4927 }
 0x643   : > { %v1736_v13 = vmul.f32 %v4928_v61, %v5943_v49  ;;  %v1717_v15 = vpop.xlane.xlu0 %1716 }
 0x644   : > { %1719 = vadd.xlane.f32.xlu2 %v1718_v29  ;;  %4929 = vrcp.f32 %v1717_v15 }
 0x645   : > { %v1744_v45 = vpack.c.bf16 %v1736_v13, %v1736_v13 }
 0x647   : > { %4647 = vmatmul.msk.bf16.vlgmr.msra.gmra.mxu1 %vm1303_vm3, %v1744_v45 }
 0x648   : > { %1959 = vmatpush.bf16.xpose.msra.mxu1 %v1950_v39 }
 0x64a   : > { %v4930_v32 = vpop.eup %4929 }
 0x64b   : > { %v1739_v60 = vmul.f32 %v4930_v32, %v5951_v12 }
 0x64d   : > { %v1747_v48 = vpack.c.bf16 %v1739_v60, %v1739_v60 }
 0x656   : > { %v2058_v62 = vpop.permute.xlu0 %2057 }
 0x65c   : > { %1942 = vrot.lane.b32.xlu2 %v5635_v7, %s5256_s26 }
 0x65e   : > { %v1836_v54 = vpop.permute.xlu0 %1835 }
 0x65f   : > { %v1841_v49 = vsel %vm1307_vm1, %v1836_v54, 0  ;;  %v2088_v54 = vsel %vm1016_vm15, %v5990_v11, 0 }
 0x660   : > { %1850 = vmatpush.bf16.msrb.mxu0 %v1841_v49 }
 0x663   : > { %4650 = vmatmul.msk.bf16.vlgmr.msrb.gmra.mxu0 %vm1303_vm3, %v1747_v48 }
 0x664   : > { %2262 = vrot.lane.b32.xlu2 %v5664_v23, %s5257_s14 }
 0x666   : > { %v1922_v17 = vpop.permute.xlu0 %1921 }
 0x667   : > { %v1927_v50 = vsel %vm1016_vm15, %v1922_v17, 0 }
 0x668   : > { %1936 = vmatpush.bf16.xpose.msra.mxu0 %v1927_v50 }
 0x66e   : > { %v1723_v5 = vpop.xlane.xlu2 %1722  ;;  %v1920_v12 = vpop.permute.xlu0 %1919 }
 0x66f   : > { %4931 = vrcp.f32 %v1723_v5 }
 0x670   : > { %2028 = vmatpush.bf16.xpose.msrb.mxu0 %v2019_v24 }
 0x673   : > { %4654 = vmatmul.msk.bf16.vlgmr.msra.gmra.mxu0 %vm1016_vm15, %v1920_v12 }
 0x675   : > { %v4932_v30 = vpop.eup %4931 }
 0x676   : > { %v1741_v55 = vmul.f32 %v4932_v30, %v5965_v59  ;;  %v1726_v61 = vpop.xlane.xlu2 %1725  ;;  %v2037_v29 = vpop.permute.xlu0 %2036 }
 0x677   : > { %4933 = vrcp.f32 %v1726_v61  ;;  %v2012_v59 = vpop.permute.xlu1 %2011 }
 0x678   : > { %v1749_v13 = vpack.c.bf16 %v1741_v55, %v1741_v55 }
 0x67a   : > { %4652 = vmatmul.msk.bf16.vlgmr.msrb.gmra.mxu2 %vm1303_vm3, %v1749_v13  ;;  %v2042_v13 = vsel %vm1016_vm15, %v2037_v29, 0 }
 0x67d   : > { %v4934_v20 = vpop.eup %4933 }
 0x67e   : > { %v1742_v45 = vmul.f32 %v4934_v20, %v5971_v52  ;;  %v2060_v39 = vpop.permute.xlu2 %2059  ;;  %v2035_v32 = vpop.permute.xlu0 %2034 }
 0x67f   : > { %v2065_v15 = vsel %vm1016_vm15, %v2060_v39, 0  ;;  %v2326_v11 = vpop.permute.xlu1 %2325 }
 0x680   : > { %v1750_v60 = vpack.c.bf16 %v1742_v45, %v1742_v45  ;;  %2074 = vmatpush.bf16.xpose.msrb.mxu2 %v2065_v15  ;;  %v2331_v17 = vsel %vm1307_vm1, %v2326_v11, 0 }
 0x682   : > { %4653 = vmatmul.msk.bf16.vlgmr.msrb.gmra.mxu3 %vm1303_vm3, %v1750_v60 }
 0x683   : > { %2097 = vmatpush.bf16.xpose.msrb.mxu3 %v2088_v54  ;;  %4658 = vmatmul.msk.bf16.vlgmr.msrb.gmra.mxu0 %vm1016_vm15, %v2012_v59 }
 0x686   : > { %v2242_v49 = vpop.permute.xlu0 %2241 }
 0x687   : > { %v2247_v48 = vsel %vm1307_vm1, %v2242_v49, 0 }
 0x68a   : > { %4656 = vmatmul.msk.bf16.vlgmr.msra.gmra.mxu2 %vm1016_vm15, %v5988_v14 }
 0x68b   : > { %2256 = vmatpush.bf16.msra.mxu2 %v2247_v48 }
 0x68c   : > { %v6033_v52 = vpop.f32.mrf.mxu3 }
 0x692   : > { %4657 = vmatmul.msk.bf16.vlgmr.msra.gmra.mxu3 %vm1016_vm15, %v5994_v56 }
 0x694   : > { %v1833_v25 = vpop.f32.mrf.mxu3 }
 0x69a   : > { %4660 = vmatmul.msk.bf16.vlgmr.msrb.gmra.mxu2 %vm1016_vm15, %v2058_v62 }
 0x69b   : > { %2340 = vmatpush.bf16.msrb.mxu2 %v2331_v17 }
 0x6a2   : > { %4661 = vmatmul.msk.bf16.vlgmr.msrb.gmra.mxu3 %vm1016_vm15, %v5996_v3  ;;  %v2347_v3 = vpop.permute.xlu0 %2346 }
 0x6a3   : > { %v2352_v39 = vsel %vm1307_vm1, %v2347_v3, 0 }
 0x6a4   : > { %v6041_v50 = vpop.f32.mrf.mxu2 }
 0x6ac   : > { %v1812_v24 = vpop.f32.mrf.mxu2 }
 0x6af   : > { %v6043_v14 = vpop.f32.mrf.mxu0 }
 0x6b7   : > { %v1720_v5 = vpop.xlane.xlu2 %1719  ;;  %v1770_v12 = vpop.f32.mrf.mxu0 }
 0x6b8   : > { %4935 = vrcp.f32 %v1720_v5 }
 0x6be   : > { %v4936_v30 = vpop.eup %4935 }
 0x6bf   : > { %v1740_v56 = vmul.f32 %v4936_v30, %v6005_v46  ;;  %v1943_v55 = vpop.permute.xlu2 %1942 }
 0x6c1   : > { %v1748_v61 = vpack.c.bf16 %v1740_v56, %v1740_v56 }
 0x6c3   : > { %4651 = vmatmul.msk.bf16.vlgmr.msrb.gmra.mxu1 %vm1303_vm3, %v1748_v61 }
 0x6c4   : > { %2051 = vmatpush.bf16.xpose.msrb.mxu1 %v2042_v13  ;;  %v6048_v62 = vpop.f32.mrf.mxu1 }
 0x6c7   : > { %v2263_v20 = vpop.permute.xlu2 %2262 }
 0x6c8   : > { %v2268_v45 = vsel %vm1307_vm1, %v2263_v20, 0 }
 0x6c9   : > { %2277 = vmatpush.bf16.msra.mxu3 %v2268_v45 }
 0x6cc   : > { %v1791_v15 = vpop.f32.mrf.mxu1 }
 0x6cd   : > { %2361 = vmatpush.bf16.msrb.mxu3 %v2352_v39 }
 0x6d3   : > { %4655 = vmatmul.msk.bf16.vlgmr.msra.gmra.mxu1 %vm1016_vm15, %v1943_v55 }
 0x6e0   : > { %v6053_v46 = vpop.f32.mrf.mxu0 }
 0x6e3   : > { %4659 = vmatmul.msk.bf16.vlgmr.msrb.gmra.mxu1 %vm1016_vm15, %v2035_v32 }
 0x6e8   : > { %v1854_v29 = vpop.f32.mrf.mxu0 }
 0x6f0   : > { %v1938_v60 = vpop.f32.mrf.mxu0 }
 0x6f1   : > { %v2103_v54 = vsel %vm1204_vm2, %v1938_v60, -inf }
 0x6f2   : > { %2104 = vmax.xlane.f32.xlu0 %v2103_v54 }
 0x6f8   : > { %v1940_v59 = vpop.f32.mrf.mxu0 }
 0x6fd   : > { %v6057_v49 = vpop.f32.mrf.mxu2 }
 0x700   : > { %v2030_v48 = vpop.f32.mrf.mxu0 }
 0x701   : > { %v2115_v54 = vsel %vm1204_vm2, %v2030_v48, -inf }
 0x705   : > { %v1896_v25 = vpop.f32.mrf.mxu2  ;;  %v6059_v11 = vpop.f32.mrf.mxu3 }
 0x708   : > { %v2032_v17 = vpop.f32.mrf.mxu0 }
 0x70d   : > { %v1917_v24 = vpop.f32.mrf.mxu3  ;;  %v6061_v5 = vpop.f32.mrf.mxu2 }
 0x715   : > { %v1986_v12 = vpop.f32.mrf.mxu2  ;;  %v2007_v30 = vpop.f32.mrf.mxu3 }
 0x716   : > { %v2112_v32 = vsel %vm1204_vm2, %v2007_v30, -inf  ;;  %v2109_v12 = vsel %vm1204_vm2, %v6061_v5, -inf }
 0x717   : > { %2113 = vmax.xlane.f32.xlu0 %v2112_v32 }
 0x71d   : > { %v2009_v56 = vpop.f32.mrf.mxu3  ;;  %v6064_v55 = vpop.f32.mrf.mxu2 }
 0x71e   : > { %v2121_v25 = vsel %vm1204_vm2, %v6064_v55, -inf }
 0x725   : > { %v2078_v61 = vpop.f32.mrf.mxu2  ;;  %v6066_v13 = vpop.f32.mrf.mxu3 }
 0x726   : > { %v2124_v32 = vsel %vm1204_vm2, %v6066_v13, -inf }
 0x72b   : > { %2438 = vrot.lane.b32.xlu0 %v5664_v23, %s5258_s17 }
 0x72d   : > { %v2101_v3 = vpop.f32.mrf.mxu3 }
 0x740   : > { %v6070_v20 = vpop.f32.mrf.mxu1 }
 0x748   : > { %v1875_v45 = vpop.f32.mrf.mxu1 }
 0x750   : > { %v1961_v39 = vpop.f32.mrf.mxu1 }
 0x751   : > { %v2106_v15 = vsel %vm1204_vm2, %v1961_v39, -inf }
 0x752   : > { %2107 = vmax.xlane.f32.xlu2 %v2106_v15 }
 0x758   : > { %v1963_v29 = vpop.f32.mrf.mxu1 }
 0x75a   : > { %2116 = vmax.xlane.f32.xlu2 %v2115_v54 }
 0x760   : > { %v6074_v59 = vpop.f32.mrf.mxu1 }
 0x761   : > { %v2118_v17 = vsel %vm1204_vm2, %v6074_v59, -inf }
 0x762   : > { %2122 = vmax.xlane.f32.xlu2 %v2121_v25  ;;  %2119 = vmax.xlane.f32.xlu1 %v2118_v17 }
 0x765   : > { %v2105_v56 = vpop.xlane.xlu0 %2104 }
 0x766   : > { %v2127_v15 = vsub.f32 %v1938_v60, %v2105_v56 }
 0x768   : > { %v2055_v24 = vpop.f32.mrf.mxu1  ;;  %v2135_v54 = vmul.f32 1.442695, %v2127_v15 }
 0x76a   : > { %2110 = vmax.xlane.f32.xlu1 %v2109_v12 }
 0x772   : > { %2125 = vmax.xlane.f32.xlu1 %v2124_v32 }
 0x77a   : > { %2415 = vrot.lane.b32.xlu2 %v5656_v19, %s5258_s17 }
 0x78a   : > { %v2114_v61 = vpop.xlane.xlu0 %2113 }
 0x78b   : > { %v2130_v3 = vsub.f32 %v2007_v30, %v2114_v61 }
 0x78d   : > { %v2141_v45 = vmul.f32 1.442695, %v2130_v3 }
 0x78f   : > { %4937 = vpow2.f32 %v2141_v45 }
 0x790   : > { %4939 = vpow2.f32 %v2135_v54 }
 0x795   : > { %v4938_v29 = vpop.eup %4937 }
 0x796   : > { %v2160_v25 = vsel %vm1204_vm2, %v4938_v29, 0.0  ;;  %v6087_v17 = vpop.eup %4939 }
 0x797   : > { %2161 = vadd.xlane.f32.xlu0 %v2160_v25  ;;  %v2151_v24 = vsel %vm1204_vm2, %v6087_v17, 0.0 }
 0x7a3   : > { %2152 = vadd.xlane.f32.xlu2 %v2151_v24 }
 0x7bb   : > { %2507 = vrot.lane.b32.xlu2 %v5671_v31, %s5258_s17 }
 0x7c3   : > { %2528 = vrot.lane.b32.xlu2 %v5680_v57, %s5259_s29 }
 0x7c5   : > { %v2108_v60 = vpop.xlane.xlu2 %2107 }
 0x7c6   : > { %v2128_v30 = vsub.f32 %v1961_v39, %v2108_v60  ;;  %v831_v60 = vadd.f32 %v5734_v21, %v5617_v47  ;;  %v875_v21 = vrot.slane %v5645_v10, 4 }
 0x7c8   : > { %v2137_v12 = vmul.f32 1.442695, %v2128_v30  ;;  %v863_v30 = vrot.slane %v831_v60, 4 }
 0x7ca   : > { %4941 = vpow2.f32 %v2137_v12 }
 0x7cb   : > { %2304 = vrot.lane.b32.xlu2 %v5684_v58, %s5257_s14 }
 0x7cd   : > { %v2117_v32 = vpop.xlane.xlu2 %2116 }
 0x7ce   : > { %v2131_v56 = vsub.f32 %v2030_v48, %v2117_v32 }
 0x7d0   : > { %v6097_v61 = vpop.eup %4941  ;;  %v2143_v3 = vmul.f32 1.442695, %v2131_v56  ;;  %v870_v56 = vsel %vm866_vm14, %v5637_v8, %v863_v30 }
 0x7d1   : > { %v2154_v45 = vsel %vm1204_vm2, %v6097_v61, 0.0 }
 0x7d2   : > { %4943 = vpow2.f32 %v2143_v3  ;;  %2155 = vadd.xlane.f32.xlu0 %v2154_v45 }
 0x7d3   : > { %2392 = vrot.lane.b32.xlu2 %v5635_v7, %s5258_s17 }
 0x7d5   : > { %v6103_v15 = vpop.xlane.xlu1 %2119 }
 0x7d8   : > { %v6105_v39 = vpop.eup %4943 }
 0x7d9   : > { %v2163_v54 = vsel %vm1204_vm2, %v6105_v39, 0.0 }
 0x7da   : > { %2164 = vadd.xlane.f32.xlu0 %v2163_v54  ;;  %v836_v54 = vadd.f32 %v5731_v41, %v5617_v47  ;;  %v871_v47 = vsel %vm866_vm14, %v863_v30, %v5637_v8 }
 0x7db   : > { %2390 = vrot.lane.b32.xlu2 %v5635_v7, %s5259_s29  ;;  %v872_v41 = vrot.slane %v871_v47, 4 }
 0x7dd   : > { %v2111_v48 = vpop.xlane.xlu1 %2110 }
 0x7de   : > { %v2129_v25 = vsub.f32 %v6061_v5, %v2111_v48  ;;  %v2439_v5 = vpop.permute.xlu0 %2438 }
 0x7df   : > { %v2444_v48 = vsel %vm1016_vm15, %v2439_v5, 0 }
 0x7e0   : > { %v2139_v24 = vmul.f32 1.442695, %v2129_v25  ;;  %v865_v25 = vrot.slane %v836_v54, 4 }
 0x7e2   : > { %4945 = vpow2.f32 %v2139_v24  ;;  %v877_v24 = vsel %vm866_vm14, %v865_v25, %v5654_v35 }
 0x7e3   : > { %2459 = vrot.lane.b32.xlu2 %v5678_v51, %s5259_s29  ;;  %v878_v60 = vrot.slane %v877_v24, 4 }
 0x7e5   : > { %v2126_v5 = vpop.xlane.xlu1 %2125 }
 0x7e8   : > { %v6116_v12 = vpop.eup %4945 }
 0x7e9   : > { %v2157_v32 = vsel %vm1204_vm2, %v6116_v12, 0.0 }
 0x7ea   : > { %2158 = vadd.xlane.f32.xlu1 %v2157_v32  ;;  %v2123_v32 = vpop.xlane.xlu2 %2122 }
 0x7eb   : > { %883 = vrot.lane.b32.xlu2 %v870_v56, %s5260_s23  ;;  %v2133_v56 = vsub.f32 %v6064_v55, %v2123_v32 }
 0x7ee   : > { %2505 = vrot.lane.b32.xlu0 %v5671_v31, %s5259_s29 }
 0x7f3   : > { %887 = vrot.lane.b32.xlu2 %v5642_v9, %s5260_s23 }
 0x7f6   : > { %2283 = vrot.lane.b32.xlu0 %v5678_v51, %s5257_s14 }
 0x7fb   : > { %889 = vrot.lane.b32.xlu2 %v875_v21, %s5260_s23  ;;  %v2147_v21 = vmul.f32 1.442695, %v2133_v56 }
 0x7fe   : > { %2369 = vrot.lane.b32.xlu0 %v5632_v2, %s5258_s17 }
 0x803   : > { %2413 = vrot.lane.b32.xlu1 %v5656_v19, %s5259_s29 }
 0x806   : > { %2367 = vrot.lane.b32.xlu0 %v5632_v2, %s5259_s29 }
 0x80a   : > { %v2162_v3 = vpop.xlane.xlu0 %2161 }
 0x80b   : > { %4947 = vrcp.f32 %v2162_v3  ;;  %2436 = vrot.lane.b32.xlu1 %v5664_v23, %s5259_s29  ;;  %v2134_v3 = vsub.f32 %v6066_v13, %v2126_v5 }
 0x80c   : > { %4949 = vpow2.f32 %v2147_v21 }
 0x80e   : > { %2484 = vrot.lane.b32.xlu0 %v5684_v58, %s5258_s17 }
 0x811   : > { %v4948_v9 = vpop.eup %4947 }
 0x812   : > { %v2186_v10 = vmul.f32 %v4948_v9, %v4938_v29  ;;  %v876_v29 = vsel %vm866_vm14, %v5654_v35, %v865_v25  ;;  %v2416_v9 = vpop.permute.xlu2 %2415  ;;  %v6162_v8 = vpop.eup %4949 }
 0x813   : > { %2199 = vrot.lane.b32.xlu1 %v5632_v2, %s5257_s14  ;;  %v2169_v35 = vsel %vm1204_vm2, %v6162_v8, 0.0  ;;  %v2421_v21 = vsel %vm1016_vm15, %v2416_v9, 0 }
 0x814   : > { %v2194_v45 = vpack.c.bf16 %v2186_v10, %v2186_v10  ;;  %v2149_v10 = vmul.f32 1.442695, %v2134_v3 }
 0x816   : > { %2482 = vrot.lane.b32.xlu0 %v5684_v58, %s5259_s29  ;;  %4665 = vmatmul.msk.bf16.vlgmr.msra.gmra.mxu3 %vm1303_vm3, %v2194_v45  ;;  %4951 = vpow2.f32 %v2149_v10 }
 0x817   : > { %2453 = vmatpush.bf16.xpose.msra.mxu3 %v2444_v48 }
 0x81a   : > { %v2153_v30 = vpop.xlane.xlu2 %2152 }
 0x81b   : > { %2220 = vrot.lane.b32.xlu1 %v5635_v7, %s5257_s14 }
 0x81c   : > { %v6166_v45 = vpop.eup %4951 }
 0x81d   : > { %v2172_v55 = vsel %vm1204_vm2, %v6166_v45, 0.0 }
 0x81e   : > { %891 = vrot.lane.b32.xlu0 %v876_v29, %s5260_s23 }
 0x822   : > { %v6170_v54 = vpop.permute.xlu2 %2507 }
 0x826   : > { %885 = vrot.lane.b32.xlu0 %v872_v41, %s5260_s23 }
 0x82a   : > { %v6172_v13 = vpop.permute.xlu2 %2528 }
 0x82e   : > { %893 = vrot.lane.b32.xlu0 %v878_v60, %s5260_s23 }
 0x832   : > { %v2305_v41 = vpop.permute.xlu2 %2304 }
 0x83a   : > { %v2393_v5 = vpop.permute.xlu2 %2392 }
 0x845   : > { %2170 = vadd.xlane.f32.xlu1 %v2169_v35  ;;  %v2156_v48 = vpop.xlane.xlu0 %2155  ;;  %v6183_v35 = vpop.permute.xlu2 %2390 }
 0x84d   : > { %2173 = vadd.xlane.f32.xlu1 %v2172_v55  ;;  %v2165_v25 = vpop.xlane.xlu0 %2164 }
 0x85d   : > { %v2159_v29 = vpop.xlane.xlu1 %2158 }
 0x85e   : > { %4953 = vrcp.f32 %v2159_v29  ;;  %v2132_v29 = vsub.f32 %v6074_v59, %v6103_v15 }
 0x85f   : > { %4955 = vrcp.f32 %v2153_v30 }
 0x860   : > { %v6174_v47 = vpop.permute.xlu0 %2505  ;;  %4957 = vrcp.f32 %v2156_v48 }
 0x864   : > { %v4954_v24 = vpop.eup %4953 }
 0x865   : > { %v2185_v60 = vmul.f32 %v4954_v24, %v6116_v12  ;;  %v6191_v24 = vpop.permute.xlu2 %2459 }
 0x866   : > { %2530 = vrot.lane.b32.xlu1 %v5680_v57, %s5258_s17 }
 0x867   : > { %v2193_v32 = vpack.c.bf16 %v2185_v60, %v2185_v60  ;;  %v4956_v60 = vpop.eup %4955 }
 0x868   : > { %v2284_v56 = vpop.permute.xlu0 %2283  ;;  %v4958_v59 = vpop.eup %4957 }
 0x869   : > { %4664 = vmatmul.msk.bf16.vlgmr.msra.gmra.mxu2 %vm1303_vm3, %v2193_v32  ;;  %v2145_v32 = vmul.f32 1.442695, %v2132_v29  ;;  %v2289_v30 = vsel %vm1307_vm1, %v2284_v56, 0  ;;  %v2310_v56 = vsel %vm1307_vm1, %v2305_v41, 0 }
 0x86a   : > { %2430 = vmatpush.bf16.xpose.msra.mxu2 %v2421_v21  ;;  %v2183_v21 = vmul.f32 %v4956_v60, %v6087_v17 }
 0x86b   : > { %4959 = vpow2.f32 %v2145_v32 }
 0x86c   : > { %v2191_v26 = vpack.c.bf16 %v2183_v21, %v2183_v21  ;;  %4961 = vrcp.f32 %v2165_v25 }
 0x86d   : > { %v6200_v15 = vpop.permute.xlu2 %883 }
 0x870   : > { %v2370_v3 = vpop.permute.xlu0 %2369 }
 0x871   : > { %v2375_v34 = vsel %vm1016_vm15, %v2370_v3, 0  ;;  %v6204_v17 = vpop.eup %4959 }
 0x872   : > { %v2166_v29 = vsel %vm1204_vm2, %v6204_v17, 0.0 }
 0x875   : > { %v6181_v10 = vpop.permute.xlu1 %2413  ;;  %v888_v25 = vpop.permute.xlu2 %887 }
 0x878   : > { %v6185_v55 = vpop.permute.xlu0 %2367 }
 0x87d   : > { %v6187_v12 = vpop.permute.xlu1 %2436 }
 0x880   : > { %v6193_v9 = vpop.permute.xlu0 %2484 }
 0x885   : > { %v2200_v28 = vpop.permute.xlu1 %2199 }
 0x886   : > { %v2205_v27 = vsel %vm1307_vm1, %v2200_v28, 0  ;;  %v2184_v28 = vmul.f32 %v4958_v59, %v6097_v61 }
 0x887   : > { %2214 = vmatpush.bf16.msra.mxu0 %v2205_v27 }
 0x888   : > { %v6198_v33 = vpop.permute.xlu0 %2482  ;;  %v2192_v60 = vpack.c.bf16 %v2184_v28, %v2184_v28  ;;  %v899_v28 = vrot.slane %v888_v25, 4 }
 0x88a   : > { %4662 = vmatmul.msk.bf16.vlgmr.msra.gmra.mxu0 %vm1303_vm3, %v2191_v26  ;;  %v4962_v26 = vpop.eup %4961 }
 0x88b   : > { %2298 = vmatpush.bf16.msrb.mxu0 %v2289_v30  ;;  %v2187_v61 = vmul.f32 %v4962_v26, %v6105_v39 }
 0x88d   : > { %v2221_v48 = vpop.permute.xlu1 %2220  ;;  %v2195_v21 = vpack.c.bf16 %v2187_v61, %v2187_v61 }
 0x88e   : > { %v2226_v27 = vsel %vm1307_vm1, %v2221_v48, 0  ;;  %v5261_v48 = vmov 1983009808  }
 0x88f   : > { %2384 = vmatpush.bf16.xpose.msra.mxu0 %v2375_v34  ;;  %2235 = vmatpush.bf16.msra.mxu1 %v2226_v27  ;;  %v2398_v34 = vsel %vm1016_vm15, %v2393_v5, 0  ;;  %v923_v27 = vunpack.c.l.s4 %v5261_v48 }
 0x890   : > { %2167 = vadd.xlane.f32.xlu1 %v2166_v29  ;;  %v892_v3 = vpop.permute.xlu0 %891  ;;  %v907_v29 = vsel %vm478_vm0, %v888_v25, %v899_v28 }
 0x891   : > { %v901_v32 = vrot.slane %v892_v3, 4  ;;  %v6221_v39 = vunpack.c.0.s8 %v923_v27 }
 0x892   : > { %4663 = vmatmul.msk.bf16.vlgmr.msra.gmra.mxu1 %vm1303_vm3, %v2192_v60 }
 0x893   : > { %2319 = vmatpush.bf16.msrb.mxu1 %v2310_v56  ;;  %v909_v30 = vsel %vm478_vm0, %v892_v3, %v901_v32  ;;  %v890_v56 = vpop.permute.xlu2 %889  ;;  %v5262_v32 = vmov 1934713408  }
 0x894   : > { %v948_v5 = vrot.slane %v909_v30, 4  ;;  %v937_v6 = vunpack.c.l.s4 %v5262_v32 }
 0x896   : > { %v949_v60 = vsel %vm920_vm4, %v948_v5, %v907_v29  ;;  %v6227_v40 = vunpack.c.0.s8 %v937_v6 }
 0x897   : > { %2407 = vmatpush.bf16.xpose.msra.mxu1 %v2398_v34  ;;  %v900_v34 = vrot.slane %v890_v56, 4 }
 0x898   : > { %v6214_v41 = vpop.permute.xlu0 %885 }
 0x899   : > { %v6217_v59 = vpop.f32.mrf.mxu3  ;;  %v908_v30 = vsel %vm478_vm0, %v890_v56, %v900_v34 }
 0x89a   : > { %4666 = vmatmul.msk.bf16.vlgmr.msrb.gmra.mxu0 %vm1303_vm3, %v2195_v21  ;;  %v953_v21 = vperm.slane %v949_v60, %v6221_v39 }
 0x89c   : > { %v962_v28 = vrot.slane %v953_v21, 4 }
 0x8a0   : > { %v894_v26 = vpop.permute.xlu0 %893 }
 0x8a1   : > { %v902_v61 = vrot.slane %v894_v26, 4  ;;  %v2281_v3 = vpop.f32.mrf.mxu3 }
 0x8a2   : > { %v869_v3 = vrot.slane %v5630_v1, 4 }
 0x8a3   : > { %v910_v16 = vsel %vm478_vm0, %v894_v26, %v902_v61 }
 0x8a4   : > { %v954_v48 = vrot.slane %v910_v16, 4 }
 0x8a6   : > { %v955_v25 = vsel %vm920_vm4, %v954_v48, %v908_v30 }
 0x8a7   : > { %v959_v27 = vperm.slane %v955_v25, %v6221_v39  ;;  %v2513_v25 = vsel %vm1016_vm15, %v6170_v54, 0 }
 0x8a9   : > { %v960_v5 = vrot.slane %v959_v27, 4  ;;  %v963_v29 = vsel %vm920_vm4, %v959_v27, %v962_v28  ;;  %2461 = vrot.lane.b32.xlu1 %v5678_v51, %s5258_s17 }
 0x8aa   : > { %v971_v60 = vperm.slane %v963_v29, %v6227_v40  ;;  %4670 = vmatmul.msk.bf16.vlgmr.msra.gmra.mxu0 %vm1016_vm15, %v6185_v55 }
 0x8ab   : > { %v961_v16 = vsel %vm920_vm4, %v960_v5, %v953_v21 }
 0x8ac   : > { %v967_v6 = vperm.slane %v961_v16, %v6227_v40  ;;  %v974_v56 = vrot.slane %v971_v60, 4  ;;  %996 = vst [vmem:[#allocation1 + $0x21] ss:$2 sm:$0xff] %v971_v60 }
 0x8ae   : > { %v972_v26 = vrot.slane %v967_v6, 4  ;;  %v975_v34 = vsel %vm920_vm4, 0.0, %v974_v56  ;;  %986 = vst [vmem:[#allocation1 + $0x1] ss:$2 sm:$0xff] %v967_v6 }
 0x8af   : > { %1001 = vst [vmem:[#allocation1 + $0x31] ss:$2 sm:$0xff] %v975_v34 }
 0x8b0   : > { %v973_v61 = vsel %vm920_vm4, 0.0, %v972_v26 }
 0x8b1   : > { %991 = vst [vmem:[#allocation1 + $0x11] ss:$2 sm:$0xff] %v973_v61  ;;  %879 = vrot.lane.b32.xlu1 %v5627_v0, %s5260_s23 }
 0x8b8   : > { %v2171_v55 = vpop.xlane.xlu1 %2170 }
 0x8b9   : > { %4963 = vrcp.f32 %v2171_v55  ;;  %881 = vrot.lane.b32.xlu1 %v869_v3, %s5260_s23 }
 0x8bf   : > { %v4964_v32 = vpop.eup %4963 }
 0x8c0   : > { %v2189_v21 = vmul.f32 %v4964_v32, %v6162_v8  ;;  %v2174_v48 = vpop.xlane.xlu1 %2173  ;;  %v898_v32 = vrot.slane %v6214_v41, 4 }
 0x8c1   : > { %4965 = vrcp.f32 %v2174_v48 }
 0x8c2   : > { %v2197_v30 = vpack.c.bf16 %v2189_v21, %v2189_v21 }
 0x8c4   : > { %4668 = vmatmul.msk.bf16.vlgmr.msrb.gmra.mxu2 %vm1303_vm3, %v2197_v30 }
 0x8c5   : > { %2522 = vmatpush.bf16.xpose.msrb.mxu2 %v2513_v25 }
 0x8c7   : > { %v4966_v28 = vpop.eup %4965 }
 0x8c8   : > { %v2190_v0 = vmul.f32 %v4966_v28, %v6166_v45 }
 0x8ca   : > { %v2198_v1 = vpack.c.bf16 %v2190_v0, %v2190_v0 }
 0x8cc   : > { %4669 = vmatmul.msk.bf16.vlgmr.msrb.gmra.mxu3 %vm1303_vm3, %v2198_v1 }
 0x8d4   : > { %4672 = vmatmul.msk.bf16.vlgmr.msra.gmra.mxu2 %vm1016_vm15, %v6181_v10 }
 0x8d8   : > { %v2531_v27 = vpop.permute.xlu1 %2530 }
 0x8d9   : > { %v2536_v8 = vsel %vm1016_vm15, %v2531_v27, 0 }
 0x8da   : > { %2545 = vmatpush.bf16.xpose.msrb.mxu3 %v2536_v8 }
 0x8dc   : > { %4673 = vmatmul.msk.bf16.vlgmr.msra.gmra.mxu3 %vm1016_vm15, %v6187_v12  ;;  %v2490_v12 = vsel %vm1016_vm15, %v6193_v9, 0 }
 0x8e4   : > { %4676 = vmatmul.msk.bf16.vlgmr.msrb.gmra.mxu2 %vm1016_vm15, %v6174_v47 }
 0x8ec   : > { %v6258_v54 = vpop.f32.mrf.mxu2  ;;  %4677 = vmatmul.msk.bf16.vlgmr.msrb.gmra.mxu3 %vm1016_vm15, %v6172_v13 }
 0x8f4   : > { %v2260_v45 = vpop.f32.mrf.mxu2 }
 0x903   : > { %v2168_v5 = vpop.xlane.xlu1 %2167 }
 0x904   : > { %4967 = vrcp.f32 %v2168_v5 }
 0x907   : > { %v6262_v29 = vpop.f32.mrf.mxu0 }
 0x90a   : > { %v4968_v10 = vpop.eup %4967 }
 0x90b   : > { %v2188_v60 = vmul.f32 %v4968_v10, %v6204_v17  ;;  %v897_v17 = vrot.slane %v6200_v15, 4 }
 0x90d   : > { %v2196_v16 = vpack.c.bf16 %v2188_v60, %v2188_v60  ;;  %v905_v3 = vsel %vm478_vm0, %v6200_v15, %v897_v17  ;;  %v906_v15 = vsel %vm478_vm0, %v6214_v41, %v898_v32 }
 0x90e   : > { %v919_v48 = vrot.slane %v905_v3, 4  ;;  %v926_v1 = vrot.slane %v906_v15, 4 }
 0x90f   : > { %v2218_v6 = vpop.f32.mrf.mxu0  ;;  %v6267_v56 = vpop.f32.mrf.mxu1  ;;  %4667 = vmatmul.msk.bf16.vlgmr.msrb.gmra.mxu1 %vm1303_vm3, %v2196_v16 }
 0x910   : > { %2499 = vmatpush.bf16.xpose.msrb.mxu1 %v2490_v12 }
 0x917   : > { %v2239_v47 = vpop.f32.mrf.mxu1  ;;  %v6270_v13 = vpop.f32.mrf.mxu0 }
 0x91b   : > { %v2462_v26 = vpop.permute.xlu1 %2461 }
 0x91c   : > { %v2467_v34 = vsel %vm1016_vm15, %v2462_v26, 0 }
 0x91d   : > { %2476 = vmatpush.bf16.xpose.msrb.mxu0 %v2467_v34 }
 0x91f   : > { %v2302_v61 = vpop.f32.mrf.mxu0  ;;  %4671 = vmatmul.msk.bf16.vlgmr.msra.gmra.mxu1 %vm1016_vm15, %v6183_v35 }
 0x923   : > { %v880_v9 = vpop.permute.xlu1 %879 }
 0x924   : > { %v895_v55 = vrot.slane %v880_v9, 4  ;;  %4674 = vmatmul.msk.bf16.vlgmr.msrb.gmra.mxu0 %vm1016_vm15, %v6191_v24 }
 0x926   : > { %v903_v21 = vsel %vm478_vm0, %v880_v9, %v895_v55 }
 0x927   : > { %v6282_v30 = vpop.f32.mrf.mxu0  ;;  %v921_v25 = vsel %vm920_vm4, %v919_v48, %v903_v21 }
 0x928   : > { %v2551_v35 = vsel %vm1204_vm2, %v6282_v30, -inf  ;;  %v925_v0 = vperm.slane %v921_v25, %v6221_v39 }
 0x929   : > { %2552 = vmax.xlane.f32.xlu0 %v2551_v35 }
 0x92a   : > { %v934_v5 = vrot.slane %v925_v0, 4 }
 0x92b   : > { %v882_v28 = vpop.permute.xlu1 %881 }
 0x92c   : > { %v896_v24 = vrot.slane %v882_v28, 4 }
 0x92e   : > { %v904_v27 = vsel %vm478_vm0, %v882_v28, %v896_v24 }
 0x92f   : > { %v927_v8 = vsel %vm920_vm4, %v926_v1, %v904_v27  ;;  %v2388_v45 = vpop.f32.mrf.mxu0  ;;  %4675 = vmatmul.msk.bf16.vlgmr.msrb.gmra.mxu1 %vm1016_vm15, %v6198_v33 }
 0x930   : > { %v931_v10 = vperm.slane %v927_v8, %v6221_v39 }
 0x932   : > { %v932_v60 = vrot.slane %v931_v10, 4  ;;  %v935_v16 = vsel %vm920_vm4, %v931_v10, %v934_v5 }
 0x933   : > { %v943_v41 = vperm.slane %v935_v16, %v6227_v40 }
 0x934   : > { %v933_v12 = vsel %vm920_vm4, %v932_v60, %v925_v0 }
 0x935   : > { %v939_v6 = vperm.slane %v933_v12, %v6227_v40  ;;  %v946_v47 = vrot.slane %v943_v41, 4  ;;  %994 = vst [vmem:[#allocation1 + $0x20] ss:$2 sm:$0xff] %v943_v41 }
 0x937   : > { %v944_v26 = vrot.slane %v939_v6, 4  ;;  %v947_v34 = vsel %vm920_vm4, 0.0, %v946_v47  ;;  %984 = vst [vmem:[#allocation1] ss:$2 sm:$0xff] %v939_v6 }
 0x938   : > { %999 = vst [vmem:[#allocation1 + $0x30] ss:$2 sm:$0xff] %v947_v34 }
 0x939   : > { %v945_v33 = vsel %vm920_vm4, 0.0, %v944_v26 }
 0x93a   : > { %989 = vst [vmem:[#allocation1 + $0x10] ss:$2 sm:$0xff] %v945_v33 }
 0x93c   : > { %v997_v34 = vld.sshfl [vmem:[#allocation1 + $0x20] sm:$0xff pattern:$0x75316420] }
 0x93d   : > { %v6331_v33 = vpack.c.bf16 %v997_v34, %v997_v34 }
 0x947   : > { %v6301_v61 = vpop.f32.mrf.mxu2 }
 0x94f   : > { %v2344_v17 = vpop.f32.mrf.mxu2  ;;  %v6303_v9 = vpop.f32.mrf.mxu3 }
 0x950   : > { %v2864_v17 = vunpack.c.l.b16 %v6331_v33 }
 0x957   : > { %v2365_v3 = vpop.f32.mrf.mxu3  ;;  %v2432_v55 = vpop.f32.mrf.mxu2 }
 0x958   : > { %v2557_v16 = vsel %vm1204_vm2, %v2432_v55, -inf  ;;  %v1002_v3 = vld.sshfl [vmem:[#allocation1 + $0x30] sm:$0xff pattern:$0x75316420] }
 0x95f   : > { %v2434_v32 = vpop.f32.mrf.mxu2  ;;  %v6305_v21 = vpop.f32.mrf.mxu3 }
 0x960   : > { %v2560_v47 = vsel %vm1204_vm2, %v6305_v21, -inf  ;;  %v6336_v32 = vpack.c.bf16 %v1002_v3, %v1002_v3 }
 0x967   : > { %v2457_v48 = vpop.f32.mrf.mxu3  ;;  %v6307_v35 = vpop.f32.mrf.mxu2 }
 0x968   : > { %v2569_v10 = vsel %vm1204_vm2, %v6307_v35, -inf }
 0x96f   : > { %v2526_v25 = vpop.f32.mrf.mxu2  ;;  %v6309_v15 = vpop.f32.mrf.mxu3 }
 0x970   : > { %v2572_v26 = vsel %vm1204_vm2, %v6309_v15, -inf }
 0x977   : > { %v2549_v28 = vpop.f32.mrf.mxu3 }
 0x98c   : > { %v6311_v0 = vpop.f32.mrf.mxu1 }
 0x994   : > { %v2323_v24 = vpop.f32.mrf.mxu1 }
 0x99c   : > { %v2409_v1 = vpop.f32.mrf.mxu1  ;;  %v2553_v24 = vpop.xlane.xlu0 %2552 }
 0x99d   : > { %v2554_v27 = vsel %vm1204_vm2, %v2409_v1, -inf }
 0x99e   : > { %2555 = vmax.xlane.f32.xlu1 %v2554_v27 }
 0x9a1   : > { %v2478_v8 = vpop.f32.mrf.mxu0 }
 0x9a2   : > { %v2563_v45 = vsel %vm1204_vm2, %v2478_v8, -inf }
 0x9a3   : > { %2564 = vmax.xlane.f32.xlu2 %v2563_v45 }
 0x9a4   : > { %v2411_v5 = vpop.f32.mrf.mxu1 }
 0x9a6   : > { %2570 = vmax.xlane.f32.xlu1 %v2569_v10 }
 0x9a9   : > { %v2480_v60 = vpop.f32.mrf.mxu0 }
 0x9ab   : > { %2558 = vmax.xlane.f32.xlu2 %v2557_v16 }
 0x9ac   : > { %v2501_v41 = vpop.f32.mrf.mxu1 }
 0x9ad   : > { %v2566_v12 = vsel %vm1204_vm2, %v2501_v41, -inf }
 0x9ae   : > { %2567 = vmax.xlane.f32.xlu0 %v2566_v12 }
 0x9b4   : > { %v2503_v6 = vpop.f32.mrf.mxu1 }
 0x9b6   : > { %2561 = vmax.xlane.f32.xlu0 %v2560_v47 }
 0x9bf   : > { %2710 = vrot.lane.b32.xlu1 %v5664_v23, %s5263_s30  ;;  %v6334_v23 = vpack.c.b16 %v2864_v17, %v2864_v17 }
 0x9c3   : > { %2773 = vrot.lane.b32.xlu2 %v5671_v31, %s5263_s30 }
 0x9ca   : > { %2689 = vrot.lane.b32.xlu0 %v5656_v19, %s5263_s30  ;;  %v2888_v19 = vunpack.c.l.b16 %v6336_v32 }
 0x9cc   : > { %v6341_v31 = vpack.c.b16 %v2888_v19, %v2888_v19 }
 0x9d2   : > { %2794 = vrot.lane.b32.xlu0 %v5680_v57, %s5263_s30 }
 0x9ec   : > { %2573 = vmax.xlane.f32.xlu2 %v2572_v26 }
 0xa04   : > { %2866 = vrot.lane.b32.xlu2 %v6334_v23, %s5250_s12 }
 0xa0c   : > { %2890 = vrot.lane.b32.xlu2 %v6341_v31, %s5250_s12 }
 0xa11   : > { %v2556_v57 = vpop.xlane.xlu1 %2555 }
 0xa12   : > { %v2576_v48 = vsub.f32 %v2409_v1, %v2556_v57  ;;  %v2575_v1 = vsub.f32 %v6282_v30, %v2553_v24 }
 0xa14   : > { %v2585_v25 = vmul.f32 1.442695, %v2576_v48  ;;  %2647 = vrot.lane.b32.xlu2 %v5632_v2, %s5263_s30  ;;  %v2583_v6 = vmul.f32 1.442695, %v2575_v1 }
 0xa16   : > { %4969 = vpow2.f32 %v2585_v25  ;;  %v2565_v28 = vpop.xlane.xlu2 %2564  ;;  %v987_v25 = vld.sshfl [vmem:[#allocation1] sm:$0xff pattern:$0x75316420] }
 0xa17   : > { %v2579_v26 = vsub.f32 %v2478_v8, %v2565_v28 }
 0xa1c   : > { %v6347_v27 = vpop.eup %4969  ;;  %2668 = vrot.lane.b32.xlu2 %v5635_v7, %s5263_s30  ;;  %v2571_v7 = vpop.xlane.xlu1 %2570 }
 0xa1d   : > { %v2602_v45 = vsel %vm1204_vm2, %v6347_v27, 0.0 }
 0xa1e   : > { %v2559_v5 = vpop.xlane.xlu2 %2558  ;;  %2603 = vadd.xlane.f32.xlu0 %v2602_v45  ;;  %v6370_v45 = vpack.c.bf16 %v987_v25, %v987_v25 }
 0xa1f   : > { %v2577_v10 = vsub.f32 %v2432_v55, %v2559_v5  ;;  %v2591_v55 = vmul.f32 1.442695, %v2579_v26 }
 0xa21   : > { %v2587_v60 = vmul.f32 1.442695, %v2577_v10  ;;  %v2568_v16 = vpop.xlane.xlu0 %2567  ;;  %v2581_v10 = vsub.f32 %v6307_v35, %v2571_v7 }
 0xa22   : > { %v2580_v12 = vsub.f32 %v2501_v41, %v2568_v16  ;;  %v2816_v16 = vunpack.c.l.b16 %v6370_v45 }
 0xa23   : > { %4971 = vpow2.f32 %v2587_v60 }
 0xa24   : > { %v2593_v2 = vmul.f32 1.442695, %v2580_v12 }
 0xa26   : > { %4973 = vpow2.f32 %v2593_v2  ;;  %v2774_v1 = vpop.permute.xlu2 %2773  ;;  %v2595_v2 = vmul.f32 1.442695, %v2581_v10 }
 0xa27   : > { %4975 = vpow2.f32 %v2583_v6  ;;  %v2779_v12 = vsel %vm1307_vm1, %v2774_v1, 0  ;;  %v6378_v6 = vpack.c.b16 %v2816_v16, %v2816_v16  ;;  %v992_v1 = vld.sshfl [vmem:[#allocation1 + $0x10] sm:$0xff pattern:$0x75316420] }
 0xa28   : > { %4977 = vpow2.f32 %v2591_v55 }
 0xa29   : > { %v6354_v47 = vpop.eup %4971  ;;  %v2562_v3 = vpop.xlane.xlu0 %2561 }
 0xa2a   : > { %v2605_v34 = vsel %vm1204_vm2, %v6354_v47, 0.0  ;;  %v2578_v48 = vsub.f32 %v6305_v21, %v2562_v3 }
 0xa2b   : > { %2606 = vadd.xlane.f32.xlu1 %v2605_v34 }
 0xa2c   : > { %v6358_v17 = vpop.eup %4973  ;;  %v2589_v24 = vmul.f32 1.442695, %v2578_v48 }
 0xa2d   : > { %v2614_v30 = vsel %vm1204_vm2, %v6358_v17, 0.0  ;;  %v6362_v41 = vpop.eup %4975 }
 0xa2e   : > { %2615 = vadd.xlane.f32.xlu0 %v2614_v30  ;;  %v2599_v8 = vsel %vm1204_vm2, %v6362_v41, 0.0  ;;  %v6368_v28 = vpop.eup %4977  ;;  %4979 = vpow2.f32 %v2589_v24 }
 0xa2f   : > { %v2611_v5 = vsel %vm1204_vm2, %v6368_v28, 0.0  ;;  %4981 = vpow2.f32 %v2595_v2 }
 0xa31   : > { %v2711_v19 = vpop.permute.xlu1 %2710 }
 0xa32   : > { %v2716_v57 = vsel %vm1307_vm1, %v2711_v19, 0 }
 0xa33   : > { %2725 = vmatpush.bf16.msra.mxu3 %v2716_v57  ;;  %2600 = vadd.xlane.f32.xlu1 %v2599_v8 }
 0xa34   : > { %v4980_v26 = vpop.eup %4979 }
 0xa35   : > { %v2608_v7 = vsel %vm1204_vm2, %v4980_v26, 0.0  ;;  %v6384_v55 = vpop.eup %4981 }
 0xa36   : > { %v2617_v30 = vsel %vm1204_vm2, %v6384_v55, 0.0 }
 0xa3b   : > { %2612 = vadd.xlane.f32.xlu1 %v2611_v5 }
 0xa3c   : > { %v2690_v60 = vpop.permute.xlu0 %2689 }
 0xa3d   : > { %v2695_v21 = vsel %vm1307_vm1, %v2690_v60, 0 }
 0xa3e   : > { %2704 = vmatpush.bf16.msra.mxu2 %v2695_v21 }
 0xa42   : > { %2788 = vmatpush.bf16.msrb.mxu2 %v2779_v12  ;;  %2818 = vrot.lane.b32.xlu0 %v6378_v6, %s5250_s12 }
 0xa44   : > { %v2795_v35 = vpop.permute.xlu0 %2794 }
 0xa45   : > { %v2800_v34 = vsel %vm1307_vm1, %v2795_v35, 0  ;;  %2609 = vadd.xlane.f32.xlu2 %v2608_v7 }
 0xa46   : > { %2809 = vmatpush.bf16.msrb.mxu3 %v2800_v34 }
 0xa4d   : > { %2618 = vadd.xlane.f32.xlu2 %v2617_v30 }
 0xa54   : > { %2752 = vrot.lane.b32.xlu1 %v5684_v58, %s5263_s30 }
 0xa5f   : > { %v2574_v3 = vpop.xlane.xlu2 %2573 }
 0xa60   : > { %v2582_v19 = vsub.f32 %v6309_v15, %v2574_v3  ;;  %v6397_v15 = vpack.c.bf16 %v992_v1, %v992_v1 }
 0xa62   : > { %v2597_v57 = vmul.f32 1.442695, %v2582_v19  ;;  %v2840_v16 = vunpack.c.l.b16 %v6397_v15 }
 0xa64   : > { %4983 = vpow2.f32 %v2597_v57  ;;  %v6402_v21 = vpack.c.b16 %v2840_v16, %v2840_v16 }
 0xa67   : > { %v2867_v8 = vpop.permute.xlu2 %2866 }
 0xa68   : > { %v2872_v57 = vsel %vm1016_vm15, %v2867_v8, 0 }
 0xa6a   : > { %v6391_v48 = vpop.eup %4983 }
 0xa6b   : > { %v2620_v25 = vsel %vm1204_vm2, %v6391_v48, 0.0 }
 0xa6c   : > { %2621 = vadd.xlane.f32.xlu2 %v2620_v25 }
 0xa6f   : > { %v2891_v24 = vpop.permute.xlu2 %2890 }
 0xa77   : > { %v2648_v5 = vpop.permute.xlu2 %2647 }
 0xa78   : > { %v2653_v10 = vsel %vm1307_vm1, %v2648_v5, 0 }
 0xa79   : > { %2662 = vmatpush.bf16.msra.mxu0 %v2653_v10 }
 0xa7f   : > { %v2669_v60 = vpop.permute.xlu2 %2668 }
 0xa80   : > { %v2674_v58 = vsel %vm1307_vm1, %v2669_v60, 0 }
 0xa81   : > { %2683 = vmatpush.bf16.msra.mxu1 %v2674_v58 }
 0xa84   : > { %2731 = vrot.lane.b32.xlu2 %v5678_v51, %s5263_s30 }
 0xa8c   : > { %2842 = vrot.lane.b32.xlu2 %v6402_v21, %s5250_s12 }
 0xa91   : > { %v2604_v12 = vpop.xlane.xlu0 %2603 }
 0xa92   : > { %4985 = vrcp.f32 %v2604_v12 }
 0xa98   : > { %v4986_v2 = vpop.eup %4985 }
 0xa99   : > { %v2632_v35 = vmul.f32 %v4986_v2, %v6347_v27  ;;  %v2896_v2 = vsel %vm1016_vm15, %v2891_v24, 0 }
 0xa9b   : > { %v2640_v7 = vpack.c.bf16 %v2632_v35, %v2632_v35 }
 0xa9d   : > { %4679 = vmatmul.msk.bf16.vlgmr.msra.gmra.mxu1 %vm1303_vm3, %v2640_v7 }
 0xa9e   : > { %v2607_v34 = vpop.xlane.xlu1 %2606 }
 0xa9f   : > { %4987 = vrcp.f32 %v2607_v34 }
 0xaa1   : > { %v2616_v1 = vpop.xlane.xlu0 %2615 }
 0xaa5   : > { %v4988_v30 = vpop.eup %4987 }
 0xaa6   : > { %v2633_v51 = vmul.f32 %v4988_v30, %v6354_v47  ;;  %v2601_v3 = vpop.xlane.xlu1 %2600 }
 0xaa7   : > { %4989 = vrcp.f32 %v2601_v3 }
 0xaa8   : > { %v2641_v19 = vpack.c.bf16 %v2633_v51, %v2633_v51 }
 0xaaa   : > { %4680 = vmatmul.msk.bf16.vlgmr.msra.gmra.mxu2 %vm1303_vm3, %v2641_v19 }
 0xaab   : > { %2881 = vmatpush.bf16.xpose.msra.mxu2 %v2872_v57 }
 0xaad   : > { %v4990_v25 = vpop.eup %4989 }
 0xaae   : > { %v2631_v5 = vmul.f32 %v4990_v25, %v6362_v41  ;;  %v2613_v60 = vpop.xlane.xlu1 %2612 }
 0xab0   : > { %v2639_v27 = vpack.c.bf16 %v2631_v5, %v2631_v5 }
 0xab2   : > { %4678 = vmatmul.msk.bf16.vlgmr.msra.gmra.mxu0 %vm1303_vm3, %v2639_v27 }
 0xab4   : > { %v2819_v57 = vpop.permute.xlu0 %2818 }
 0xab5   : > { %v2824_v27 = vsel %vm1016_vm15, %v2819_v57, 0 }
 0xab8   : > { %v2610_v10 = vpop.xlane.xlu2 %2609 }
 0xab9   : > { %4991 = vrcp.f32 %v2610_v10 }
 0xaba   : > { %4993 = vrcp.f32 %v2616_v1 }
 0xabf   : > { %v4992_v47 = vpop.eup %4991 }
 0xac0   : > { %v2634_v58 = vmul.f32 %v4992_v47, %v4980_v26  ;;  %v2619_v16 = vpop.xlane.xlu2 %2618  ;;  %v4994_v12 = vpop.eup %4993 }
 0xac1   : > { %4995 = vrcp.f32 %v2619_v16  ;;  %v2636_v41 = vmul.f32 %v4994_v12, %v6358_v17 }
 0xac2   : > { %v2642_v8 = vpack.c.bf16 %v2634_v58, %v2634_v58  ;;  %4997 = vrcp.f32 %v2613_v60 }
 0xac3   : > { %v2644_v51 = vpack.c.bf16 %v2636_v41, %v2636_v41 }
 0xac4   : > { %4681 = vmatmul.msk.bf16.vlgmr.msra.gmra.mxu3 %vm1303_vm3, %v2642_v8 }
 0xac5   : > { %2905 = vmatpush.bf16.xpose.msra.mxu3 %v2896_v2 }
 0xac6   : > { %v2753_v35 = vpop.permute.xlu1 %2752 }
 0xac7   : > { %v4996_v7 = vpop.eup %4995  ;;  %v2758_v34 = vsel %vm1307_vm1, %v2753_v35, 0 }
 0xac8   : > { %v2637_v30 = vmul.f32 %v4996_v7, %v6384_v55  ;;  %2767 = vmatpush.bf16.msrb.mxu1 %v2758_v34  ;;  %v4998_v17 = vpop.eup %4997 }
 0xac9   : > { %v2635_v19 = vmul.f32 %v4998_v17, %v6368_v28 }
 0xaca   : > { %v2645_v26 = vpack.c.bf16 %v2637_v30, %v2637_v30 }
 0xacb   : > { %4683 = vmatmul.msk.bf16.vlgmr.msrb.gmra.mxu1 %vm1303_vm3, %v2644_v51  ;;  %v2643_v1 = vpack.c.bf16 %v2635_v19, %v2635_v19 }
 0xacc   : > { %4684 = vmatmul.msk.bf16.vlgmr.msrb.gmra.mxu2 %vm1303_vm3, %v2645_v26 }
 0xadc   : > { %4688 = vmatmul.msk.bf16.vlgmr.msra.gmra.mxu2 %vm1016_vm15, %v6331_v33 }
 0xadf   : > { %v2622_v24 = vpop.xlane.xlu2 %2621 }
 0xae0   : > { %4999 = vrcp.f32 %v2622_v24 }
 0xae6   : > { %v5000_v3 = vpop.eup %4999 }
 0xae7   : > { %v2638_v55 = vmul.f32 %v5000_v3, %v6391_v48  ;;  %v2732_v25 = vpop.permute.xlu2 %2731 }
 0xae8   : > { %v2737_v5 = vsel %vm1307_vm1, %v2732_v25, 0 }
 0xae9   : > { %v2646_v10 = vpack.c.bf16 %v2638_v55, %v2638_v55  ;;  %2746 = vmatpush.bf16.msrb.mxu0 %v2737_v5 }
 0xaeb   : > { %4685 = vmatmul.msk.bf16.vlgmr.msrb.gmra.mxu3 %vm1303_vm3, %v2646_v10 }
 0xaec   : > { %4682 = vmatmul.msk.bf16.vlgmr.msrb.gmra.mxu0 %vm1303_vm3, %v2643_v1 }
 0xaed   : > { %2833 = vmatpush.bf16.xpose.msra.mxu0 %v2824_v27 }
 0xaef   : > { %v2843_v33 = vpop.permute.xlu2 %2842 }
 0xaf0   : > { %v2848_v60 = vsel %vm1016_vm15, %v2843_v33, 0 }
 0xaf1   : > { %2857 = vmatpush.bf16.xpose.msra.mxu1 %v2848_v60 }
 0xaf8   : > { %4687 = vmatmul.msk.bf16.vlgmr.msra.gmra.mxu1 %vm1016_vm15, %v6397_v15 }
 0xafb   : > { %4689 = vmatmul.msk.bf16.vlgmr.msra.gmra.mxu3 %vm1016_vm15, %v6336_v32 }
 0xafc   : > { %4686 = vmatmul.msk.bf16.vlgmr.msra.gmra.mxu0 %vm1016_vm15, %v6370_v45 }
 0xb1a   : > { %v6435_v28 = vpop.f32.mrf.mxu1 }
 0xb22   : > { %v2687_v48 = vpop.f32.mrf.mxu1 }
 0xb2d   : > { %v6437_v47 = vpop.f32.mrf.mxu2 }
 0xb2f   : > { %v6439_v58 = vpop.f32.mrf.mxu0 }
 0xb35   : > { %v2708_v16 = vpop.f32.mrf.mxu2 }
 0xb37   : > { %v2666_v12 = vpop.f32.mrf.mxu0 }
 0xb47   : > { %v6441_v8 = vpop.f32.mrf.mxu3 }
 0xb48   : > { %v6443_v2 = vpop.f32.mrf.mxu1 }
 0xb4f   : > { %v2729_v15 = vpop.f32.mrf.mxu3  ;;  %v6445_v41 = vpop.f32.mrf.mxu2 }
 0xb50   : > { %v2771_v32 = vpop.f32.mrf.mxu1 }
 0xb57   : > { %v2792_v35 = vpop.f32.mrf.mxu2 }
 0xb5f   : > { %v2883_v7 = vpop.f32.mrf.mxu2 }
 0xb60   : > { %v2917_v25 = vsel %vm1016_vm15, %v2883_v7, -inf }
 0xb67   : > { %v2885_v45 = vpop.f32.mrf.mxu2 }
 0xb69   : > { %v6447_v34 = vpop.f32.mrf.mxu0 }
 0xb6e   : > { %v6449_v30 = vpop.f32.mrf.mxu3 }
 0xb71   : > { %v2750_v51 = vpop.f32.mrf.mxu0 }
 0xb75   : > { %v2859_v26 = vpop.f32.mrf.mxu1 }
 0xb76   : > { %v2813_v24 = vpop.f32.mrf.mxu3  ;;  %v2914_v17 = vsel %vm1016_vm15, %v2859_v26, -inf }
 0xb77   : > { %2915 = vmax.xlane.f32.xlu2 %v2914_v17 }
 0xb79   : > { %v2835_v3 = vpop.f32.mrf.mxu0 }
 0xb7a   : > { %v2911_v19 = vsel %vm1016_vm15, %v2835_v3, -inf }
 0xb7b   : > { %2912 = vmax.xlane.f32.xlu1 %v2911_v19 }
 0xb7d   : > { %v2861_v57 = vpop.f32.mrf.mxu1 }
 0xb7e   : > { %v2907_v55 = vpop.f32.mrf.mxu3 }
 0xb7f   : > { %2918 = vmax.xlane.f32.xlu2 %v2917_v25  ;;  %v2920_v5 = vsel %vm1016_vm15, %v2907_v55, -inf }
 0xb80   : > { %2921 = vmax.xlane.f32.xlu0 %v2920_v5 }
 0xb81   : > { %v2837_v27 = vpop.f32.mrf.mxu0 }
 0xb86   : > { %v2909_v10 = vpop.f32.mrf.mxu3 }
 0xb94   : > { %3091 = vrot.lane.b32.xlu0 %v6334_v23, %s5252_s15  ;;  %3001 = vrot.lane.b32.xlu1 %v6334_v23, %s5251_s13 }
 0xb9c   : > { %3114 = vrot.lane.b32.xlu0 %v6341_v31, %s5252_s15 }
 0xba4   : > { %3089 = vrot.lane.b32.xlu0 %v6334_v23, %s5253_s27 }
 0xbac   : > { %3112 = vrot.lane.b32.xlu0 %v6341_v31, %s5253_s27 }
 0xbb4   : > { %2959 = vrot.lane.b32.xlu0 %v6378_v6, %s5251_s13 }
 0xbea   : > { %v2916_v1 = vpop.xlane.xlu2 %2915 }
 0xbee   : > { %v2913_v33 = vpop.xlane.xlu1 %2912 }
 0xbef   : > { %v2923_v60 = vsub.f32 %v2835_v3, %v2913_v33 }
 0xbf1   : > { %v2927_v48 = vmul.f32 1.442695, %v2923_v60 }
 0xbf2   : > { %v2919_v16 = vpop.xlane.xlu2 %2918 }
 0xbf3   : > { %5001 = vpow2.f32 %v2927_v48  ;;  %v2925_v12 = vsub.f32 %v2883_v7, %v2919_v16  ;;  %v2922_v15 = vpop.xlane.xlu0 %2921  ;;  %v2924_v16 = vsub.f32 %v2859_v26, %v2916_v1 }
 0xbf4   : > { %v2926_v32 = vsub.f32 %v2907_v55, %v2922_v15 }
 0xbf5   : > { %v2931_v35 = vmul.f32 1.442695, %v2925_v12  ;;  %v2929_v12 = vmul.f32 1.442695, %v2924_v16 }
 0xbf6   : > { %v2933_v45 = vmul.f32 1.442695, %v2926_v32 }
 0xbf7   : > { %5003 = vpow2.f32 %v2931_v35 }
 0xbf8   : > { %5005 = vpow2.f32 %v2933_v45 }
 0xbf9   : > { %v5002_v51 = vpop.eup %5001  ;;  %5007 = vpow2.f32 %v2929_v12 }
 0xbfa   : > { %v2935_v24 = vsel %vm1016_vm15, %v5002_v51, 0.0 }
 0xbfb   : > { %2936 = vadd.xlane.f32.xlu1 %v2935_v24 }
 0xbfd   : > { %v5004_v17 = vpop.eup %5003 }
 0xbfe   : > { %v5006_v19 = vpop.eup %5005  ;;  %v2941_v57 = vsel %vm1016_vm15, %v5004_v17, 0.0 }
 0xbff   : > { %2942 = vadd.xlane.f32.xlu2 %v2941_v57  ;;  %v2944_v3 = vsel %vm1016_vm15, %v5006_v19, 0.0  ;;  %v5008_v15 = vpop.eup %5007 }
 0xc00   : > { %2945 = vadd.xlane.f32.xlu0 %v2944_v3  ;;  %v2938_v32 = vsel %vm1016_vm15, %v5008_v15, 0.0 }
 0xc06   : > { %v3002_v25 = vpop.permute.xlu1 %3001  ;;  %v3092_v7 = vpop.permute.xlu0 %3091 }
 0xc07   : > { %v3007_v55 = vsel %vm866_vm14, %v3002_v25, 0  ;;  %v3097_v5 = vsel %vm1016_vm15, %v3092_v7, 0 }
 0xc08   : > { %3016 = vmatpush.bf16.msrb.mxu2 %v3007_v55 }
 0xc0c   : > { %3106 = vmatpush.bf16.xpose.msra.mxu2 %v3097_v5 }
 0xc0e   : > { %v3115_v27 = vpop.permute.xlu0 %3114 }
 0xc14   : > { %3068 = vrot.lane.b32.xlu1 %v6402_v21, %s5252_s15  ;;  %2980 = vrot.lane.b32.xlu0 %v6402_v21, %s5251_s13 }
 0xc16   : > { %v3090_v10 = vpop.permute.xlu0 %3089 }
 0xc17   : > { %3022 = vrot.lane.b32.xlu2 %v6341_v31, %s5251_s13 }
 0xc1c   : > { %3045 = vrot.lane.b32.xlu0 %v6378_v6, %s5252_s15 }
 0xc1e   : > { %v3113_v33 = vpop.permute.xlu0 %3112 }
 0xc24   : > { %3066 = vrot.lane.b32.xlu0 %v6402_v21, %s5253_s27 }
 0xc26   : > { %v2960_v60 = vpop.permute.xlu0 %2959 }
 0xc27   : > { %v2965_v48 = vsel %vm866_vm14, %v2960_v60, 0 }
 0xc28   : > { %2974 = vmatpush.bf16.msrb.mxu0 %v2965_v48  ;;  %v3120_v48 = vsel %vm1016_vm15, %v3115_v27, 0 }
 0xc40   : > { %2939 = vadd.xlane.f32.xlu2 %v2938_v32 }
 0xc58   : > { %3043 = vrot.lane.b32.xlu2 %v6378_v6, %s5253_s27 }
 0xc6e   : > { %v2937_v35 = vpop.xlane.xlu1 %2936 }
 0xc6f   : > { %5009 = vrcp.f32 %v2937_v35 }
 0xc72   : > { %v2943_v45 = vpop.xlane.xlu2 %2942 }
 0xc73   : > { %5011 = vrcp.f32 %v2943_v45  ;;  %v2946_v24 = vpop.xlane.xlu0 %2945 }
 0xc74   : > { %5013 = vrcp.f32 %v2946_v24 }
 0xc75   : > { %v5010_v57 = vpop.eup %5009 }
 0xc76   : > { %v2951_v3 = vmul.f32 %v5010_v57, %v5002_v51 }
 0xc78   : > { %v2955_v25 = vpack.c.bf16 %v2951_v3, %v2951_v3 }
 0xc79   : > { %v5012_v7 = vpop.eup %5011 }
 0xc7a   : > { %v5014_v26 = vpop.eup %5013  ;;  %v2953_v1 = vmul.f32 %v5012_v7, %v5004_v17  ;;  %v3023_v55 = vpop.permute.xlu2 %3022  ;;  %4690 = vmatmul.msk.bf16.vlgmr.msrb.gmra.mxu0 %vm1016_vm15, %v2955_v25 }
 0xc7b   : > { %v2954_v5 = vmul.f32 %v5014_v26, %v5006_v19  ;;  %v3028_v60 = vsel %vm866_vm14, %v3023_v55, 0 }
 0xc7c   : > { %v2957_v16 = vpack.c.bf16 %v2953_v1, %v2953_v1  ;;  %3037 = vmatpush.bf16.msrb.mxu3 %v3028_v60 }
 0xc7d   : > { %v2958_v12 = vpack.c.bf16 %v2954_v5, %v2954_v5 }
 0xc7e   : > { %4692 = vmatmul.msk.bf16.vlgmr.msrb.gmra.mxu2 %vm1016_vm15, %v2957_v16 }
 0xc7f   : > { %4693 = vmatmul.msk.bf16.vlgmr.msrb.gmra.mxu3 %vm1016_vm15, %v2958_v12 }
 0xc80   : > { %3129 = vmatpush.bf16.xpose.msra.mxu3 %v3120_v48 }
 0xc86   : > { %v3069_v51 = vpop.permute.xlu1 %3068  ;;  %v2981_v32 = vpop.permute.xlu0 %2980 }
 0xc87   : > { %v3074_v17 = vsel %vm1016_vm15, %v3069_v51, 0  ;;  %v2986_v35 = vsel %vm866_vm14, %v2981_v32, 0 }
 0xc88   : > { %2995 = vmatpush.bf16.msrb.mxu1 %v2986_v35 }
 0xc8c   : > { %3083 = vmatpush.bf16.xpose.msra.mxu1 %v3074_v17 }
 0xc8e   : > { %4696 = vmatmul.msk.bf16.vlgmr.msra.gmra.mxu2 %vm1016_vm15, %v3090_v10  ;;  %v3046_v19 = vpop.permute.xlu0 %3045 }
 0xc8f   : > { %v3051_v27 = vsel %vm1016_vm15, %v3046_v19, 0  ;;  %4697 = vmatmul.msk.bf16.vlgmr.msra.gmra.mxu3 %vm1016_vm15, %v3113_v33 }
 0xc90   : > { %3060 = vmatpush.bf16.xpose.msra.mxu0 %v3051_v27 }
 0xc96   : > { %v3067_v7 = vpop.permute.xlu0 %3066 }
 0xcb3   : > { %v2940_v45 = vpop.xlane.xlu2 %2939 }
 0xcb4   : > { %5015 = vrcp.f32 %v2940_v45 }
 0xcba   : > { %v5016_v24 = vpop.eup %5015 }
 0xcbb   : > { %v2952_v57 = vmul.f32 %v5016_v24, %v5008_v15  ;;  %v3044_v3 = vpop.permute.xlu2 %3043 }
 0xcbc   : > { %4694 = vmatmul.msk.bf16.vlgmr.msra.gmra.mxu0 %vm1016_vm15, %v3044_v3 }
 0xcbd   : > { %v2956_v25 = vpack.c.bf16 %v2952_v57, %v2952_v57 }
 0xcbf   : > { %4691 = vmatmul.msk.bf16.vlgmr.msrb.gmra.mxu1 %vm1016_vm15, %v2956_v25 }
 0xccf   : > { %4695 = vmatmul.msk.bf16.vlgmr.msra.gmra.mxu1 %vm1016_vm15, %v3067_v7 }
 0xcf7   : > { %v6499_v10 = vpop.f32.mrf.mxu0 }
 0xcff   : > { %v2978_v26 = vpop.f32.mrf.mxu0 }
 0xd01   : > { %v6501_v1 = vpop.f32.mrf.mxu2 }
 0xd02   : > { %v6503_v33 = vpop.f32.mrf.mxu3 }
 0xd09   : > { %v3020_v55 = vpop.f32.mrf.mxu2 }
 0xd0a   : > { %v3041_v5 = vpop.f32.mrf.mxu3 }
 0xd11   : > { %v3108_v60 = vpop.f32.mrf.mxu2 }
 0xd12   : > { %v3131_v15 = vpop.f32.mrf.mxu3  ;;  %v3141_v48 = vsel %vm1016_vm15, %v3108_v60, -inf }
 0xd13   : > { %3142 = vmax.xlane.f32.xlu0 %v3141_v48  ;;  %v3144_v16 = vsel %vm1016_vm15, %v3131_v15, -inf }
 0xd14   : > { %3145 = vmax.xlane.f32.xlu1 %v3144_v16 }
 0xd19   : > { %v3110_v12 = vpop.f32.mrf.mxu2 }
 0xd1a   : > { %v3133_v51 = vpop.f32.mrf.mxu3 }
 0xd2d   : > { %3225 = vrot.lane.b32.xlu1 %v6334_v23, %s5254_s22 }
 0xd35   : > { %3183 = vrot.lane.b32.xlu1 %v6378_v6, %s5254_s22 }
 0xd39   : > { %v3062_v32 = vpop.f32.mrf.mxu0 }
 0xd3a   : > { %v3135_v17 = vsel %vm1016_vm15, %v3062_v32, -inf }
 0xd3b   : > { %3136 = vmax.xlane.f32.xlu2 %v3135_v17 }
 0xd3c   : > { %v6512_v35 = vpop.f32.mrf.mxu1 }
 0xd3d   : > { %3313 = vrot.lane.b32.xlu1 %v6334_v23, %s5256_s26 }
 0xd41   : > { %v3064_v19 = vpop.f32.mrf.mxu0 }
 0xd44   : > { %v2999_v27 = vpop.f32.mrf.mxu1 }
 0xd45   : > { %3269 = vrot.lane.b32.xlu1 %v6378_v6, %s5255_s1 }
 0xd4c   : > { %v3085_v45 = vpop.f32.mrf.mxu1 }
 0xd4d   : > { %3290 = vrot.lane.b32.xlu1 %v6402_v21, %s5256_s26  ;;  %v3138_v24 = vsel %vm1016_vm15, %v3085_v45, -inf }
 0xd4e   : > { %3139 = vmax.xlane.f32.xlu0 %v3138_v24 }
 0xd53   : > { %3315 = vrot.lane.b32.xlu2 %v6334_v23, %s5255_s1 }
 0xd54   : > { %v3087_v57 = vpop.f32.mrf.mxu1 }
 0xd62   : > { %3246 = vrot.lane.b32.xlu0 %v6341_v31, %s5254_s22 }
 0xd6a   : > { %3338 = vrot.lane.b32.xlu0 %v6341_v31, %s5255_s1 }
 0xd72   : > { %3204 = vrot.lane.b32.xlu0 %v6402_v21, %s5254_s22 }
 0xd86   : > { %v3143_v3 = vpop.xlane.xlu0 %3142 }
 0xd87   : > { %v3149_v25 = vsub.f32 %v3108_v60, %v3143_v3  ;;  %v3146_v26 = vpop.xlane.xlu1 %3145 }
 0xd89   : > { %v3155_v7 = vmul.f32 1.442695, %v3149_v25 }
 0xd8b   : > { %5017 = vpow2.f32 %v3155_v7 }
 0xd91   : > { %v5018_v55 = vpop.eup %5017 }
 0xd92   : > { %v3165_v5 = vsel %vm1016_vm15, %v5018_v55, 0.0 }
 0xd9c   : > { %3166 = vadd.xlane.f32.xlu0 %v3165_v5 }
 0xd9f   : > { %v3226_v48 = vpop.permute.xlu1 %3225 }
 0xda0   : > { %v3231_v16 = vsel %vm866_vm14, %v3226_v48, 0 }
 0xda1   : > { %3240 = vmatpush.bf16.msrb.mxu2 %v3231_v16  ;;  %v3150_v16 = vsub.f32 %v3131_v15, %v3146_v26 }
 0xda7   : > { %v3184_v12 = vpop.permute.xlu1 %3183 }
 0xda8   : > { %v3189_v51 = vsel %vm866_vm14, %v3184_v12, 0 }
 0xda9   : > { %3198 = vmatpush.bf16.msrb.mxu0 %v3189_v51  ;;  %v3157_v51 = vmul.f32 1.442695, %v3150_v16 }
 0xdae   : > { %v3137_v17 = vpop.xlane.xlu2 %3136 }
 0xdaf   : > { %v3147_v19 = vsub.f32 %v3062_v32, %v3137_v17  ;;  %v3314_v27 = vpop.permute.xlu1 %3313 }
 0xdb0   : > { %3336 = vrot.lane.b32.xlu0 %v6341_v31, %s5256_s26 }
 0xdb1   : > { %v3151_v60 = vmul.f32 1.442695, %v3147_v19 }
 0xdb3   : > { %5019 = vpow2.f32 %v3151_v60 }
 0xdb6   : > { %v3316_v24 = vpop.permute.xlu2 %3315 }
 0xdb7   : > { %v3321_v57 = vsel %vm1016_vm15, %v3316_v24, 0  ;;  %v3270_v3 = vpop.permute.xlu1 %3269 }
 0xdb8   : > { %v3275_v25 = vsel %vm1016_vm15, %v3270_v3, 0  ;;  %3330 = vmatpush.bf16.xpose.msra.mxu2 %v3321_v57  ;;  %3267 = vrot.lane.b32.xlu0 %v6378_v6, %s5256_s26  ;;  %s4762_s26 = sshll.u32 %s5349_s21, 5  ;;  %s4482_s21 = scalar_lea.sflag [#allocation4], %s5428_s16 }
 0xdb9   : > { %v5020_v7 = vpop.eup %5019  ;;  %3284 = vmatpush.bf16.xpose.msra.mxu0 %v3275_v25 }
 0xdba   : > { %v3159_v32 = vsel %vm1016_vm15, %v5020_v7, 0.0 }
 0xdbb   : > { %3160 = vadd.xlane.f32.xlu2 %v3159_v32 }
 0xdc0   : > { %3470 = vrot.lane.b32.xlu0 %v6341_v31, %s5257_s14 }
 0xdc1   : > { %v3140_v5 = vpop.xlane.xlu0 %3139 }
 0xdc2   : > { %v3148_v48 = vsub.f32 %v3085_v45, %v3140_v5 }
 0xdc4   : > { %v3153_v12 = vmul.f32 1.442695, %v3148_v48 }
 0xdc6   : > { %5021 = vpow2.f32 %v3153_v12 }
 0xdc7   : > { %5023 = vpow2.f32 %v3157_v51 }
 0xdc8   : > { %3562 = vrot.lane.b32.xlu0 %v6341_v31, %s5258_s17 }
 0xdcc   : > { %v5022_v17 = vpop.eup %5021 }
 0xdcd   : > { %v3162_v19 = vsel %vm1016_vm15, %v5022_v17, 0.0  ;;  %v5024_v60 = vpop.eup %5023 }
 0xdce   : > { %3163 = vadd.xlane.f32.xlu2 %v3162_v19  ;;  %v3168_v15 = vsel %vm1016_vm15, %v5024_v60, 0.0 }
 0xdd0   : > { %3428 = vrot.lane.b32.xlu0 %v6402_v21, %s5257_s14 }
 0xdd4   : > { %v3247_v24 = vpop.permute.xlu0 %3246 }
 0xdd5   : > { %v3252_v57 = vsel %vm866_vm14, %v3247_v24, 0 }
 0xdd6   : > { %3169 = vadd.xlane.f32.xlu2 %v3168_v15  ;;  %3261 = vmatpush.bf16.msrb.mxu3 %v3252_v57 }
 0xddc   : > { %v3339_v45 = vpop.permute.xlu0 %3338 }
 0xddd   : > { %v3344_v26 = vsel %vm1016_vm15, %v3339_v45, 0 }
 0xdde   : > { %3353 = vmatpush.bf16.xpose.msra.mxu3 %v3344_v26 }
 0xde4   : > { %v3205_v3 = vpop.permute.xlu0 %3204 }
 0xde5   : > { %v3210_v25 = vsel %vm866_vm14, %v3205_v3, 0 }
 0xde6   : > { %3219 = vmatpush.bf16.msrb.mxu1 %v3210_v25 }
 0xdee   : > { %3292 = vrot.lane.b32.xlu2 %v6402_v21, %s5255_s1  ;;  %s435_s1 = scalar_lea.vmem [#allocation8], %s4598_s24 }
 0xe0f   : > { %v3167_v32 = vpop.xlane.xlu0 %3166 }
 0xe10   : > { %5025 = vrcp.f32 %v3167_v32 }
 0xe16   : > { %v5026_v5 = vpop.eup %5025 }
 0xe17   : > { %v3177_v48 = vmul.f32 %v5026_v5, %v5018_v55 }
 0xe19   : > { %v3181_v16 = vpack.c.bf16 %v3177_v48, %v3177_v48 }
 0xe1b   : > { %4700 = vmatmul.msk.bf16.vlgmr.msrb.gmra.mxu2 %vm1016_vm15, %v3181_v16 }
 0xe22   : > { %v3337_v12 = vpop.permute.xlu0 %3336 }
 0xe2a   : > { %v3268_v19 = vpop.permute.xlu0 %3267 }
 0xe2b   : > { %4704 = vmatmul.msk.bf16.vlgmr.msra.gmra.mxu2 %vm1016_vm15, %v3314_v27 }
 0xe2e   : > { %v3161_v51 = vpop.xlane.xlu2 %3160 }
 0xe2f   : > { %5027 = vrcp.f32 %v3161_v51 }
 0xe32   : > { %v3471_v45 = vpop.permute.xlu0 %3470 }
 0xe35   : > { %v5028_v24 = vpop.eup %5027 }
 0xe36   : > { %v3175_v57 = vmul.f32 %v5028_v24, %v5020_v7 }
 0xe38   : > { %v3179_v15 = vpack.c.bf16 %v3175_v57, %v3175_v57 }
 0xe3a   : > { %4698 = vmatmul.msk.bf16.vlgmr.msrb.gmra.mxu0 %vm1016_vm15, %v3179_v15  ;;  %v3563_v3 = vpop.permute.xlu0 %3562 }
 0xe3b   : > { %v3568_v15 = vsel %vm1016_vm15, %v3563_v3, 0 }
 0xe41   : > { %v3164_v26 = vpop.xlane.xlu2 %3163 }
 0xe42   : > { %5029 = vrcp.f32 %v3164_v26  ;;  %v3429_v48 = vpop.permute.xlu0 %3428 }
 0xe43   : > { %v3434_v24 = vsel %vm866_vm14, %v3429_v48, 0 }
 0xe48   : > { %v5030_v25 = vpop.eup %5029 }
 0xe49   : > { %v3176_v55 = vmul.f32 %v5030_v25, %v5022_v17  ;;  %v3170_v32 = vpop.xlane.xlu2 %3169  ;;  %v3476_v17 = vsel %vm866_vm14, %v3471_v45, 0 }
 0xe4a   : > { %5031 = vrcp.f32 %v3170_v32  ;;  %4702 = vmatmul.msk.bf16.vlgmr.msra.gmra.mxu0 %vm1016_vm15, %v3268_v19  ;;  %v3291_v19 = vpop.permute.xlu1 %3290 }
 0xe4b   : > { %v3180_v5 = vpack.c.bf16 %v3176_v55, %v3176_v55 }
 0xe4d   : > { %4699 = vmatmul.msk.bf16.vlgmr.msrb.gmra.mxu1 %vm1016_vm15, %v3180_v5 }
 0xe50   : > { %v5032_v27 = vpop.eup %5031 }
 0xe51   : > { %v3178_v16 = vmul.f32 %v5032_v27, %v5024_v60  ;;  %v3293_v7 = vpop.permute.xlu2 %3292 }
 0xe52   : > { %v3298_v51 = vsel %vm1016_vm15, %v3293_v7, 0 }
 0xe53   : > { %v3182_v57 = vpack.c.bf16 %v3178_v16, %v3178_v16  ;;  %3307 = vmatpush.bf16.xpose.msra.mxu1 %v3298_v51 }
 0xe55   : > { %4701 = vmatmul.msk.bf16.vlgmr.msrb.gmra.mxu3 %vm1016_vm15, %v3182_v57 }
 0xe56   : > { %3485 = vmatpush.bf16.msrb.mxu3 %v3476_v17 }
 0xe5b   : > { %3443 = vmatpush.bf16.msrb.mxu1 %v3434_v24 }
 0xe5d   : > { %4703 = vmatmul.msk.bf16.vlgmr.msra.gmra.mxu1 %vm1016_vm15, %v3291_v19 }
 0xe65   : > { %4705 = vmatmul.msk.bf16.vlgmr.msra.gmra.mxu3 %vm1016_vm15, %v3337_v12 }
 0xe66   : > { %3577 = vmatpush.bf16.xpose.msra.mxu3 %v3568_v15 }
 0xe9e   : > { %v6564_v60 = vpop.f32.mrf.mxu2 }
 0xea6   : > { %v3244_v26 = vpop.f32.mrf.mxu2 }
 0xeae   : > { %v3332_v25 = vpop.f32.mrf.mxu2 }
 0xeaf   : > { %v3365_v55 = vsel %vm1016_vm15, %v3332_v25, -inf }
 0xeb0   : > { %3366 = vmax.xlane.f32.xlu2 %v3365_v55 }
 0xeb6   : > { %v3334_v32 = vpop.f32.mrf.mxu2 }
 0xeb7   : > { %v6567_v45 = vpop.f32.mrf.mxu0 }
 0xebf   : > { %v3202_v5 = vpop.f32.mrf.mxu0 }
 0xec7   : > { %v3286_v27 = vpop.f32.mrf.mxu0 }
 0xec8   : > { %v3359_v48 = vsel %vm1016_vm15, %v3286_v27, -inf }
 0xec9   : > { %3360 = vmax.xlane.f32.xlu1 %v3359_v48 }
 0xeca   : > { %v6570_v16 = vpop.f32.mrf.mxu1 }
 0xecf   : > { %v3288_v3 = vpop.f32.mrf.mxu0 }
 0xed2   : > { %v3223_v12 = vpop.f32.mrf.mxu1 }
 0xed8   : > { %v6572_v7 = vpop.f32.mrf.mxu3 }
 0xeda   : > { %v3309_v51 = vpop.f32.mrf.mxu1 }
 0xedb   : > { %v3362_v24 = vsel %vm1016_vm15, %v3309_v51, -inf }
 0xedc   : > { %3363 = vmax.xlane.f32.xlu2 %v3362_v24 }
 0xee0   : > { %v3265_v57 = vpop.f32.mrf.mxu3 }
 0xee2   : > { %v3311_v17 = vpop.f32.mrf.mxu1  ;;  %3539 = vrot.lane.b32.xlu1 %v6334_v23, %s5258_s17 }
 0xee8   : > { %v3355_v19 = vpop.f32.mrf.mxu3 }
 0xee9   : > { %v3368_v15 = vsel %vm1016_vm15, %v3355_v19, -inf }
 0xeea   : > { %3369 = vmax.xlane.f32.xlu0 %v3368_v15 }
 0xef0   : > { %v3357_v26 = vpop.f32.mrf.mxu3 }
 0xef4   : > { %3449 = vrot.lane.b32.xlu2 %v6334_v23, %s5257_s14 }
 0xefc   : > { %3407 = vrot.lane.b32.xlu2 %v6378_v6, %s5257_s14 }
 0xefe   : > { %3560 = vrot.lane.b32.xlu0 %v6341_v31, %s5259_s29 }
 0xf04   : > { %3537 = vrot.lane.b32.xlu2 %v6334_v23, %s5259_s29 }
 0xf0c   : > { %3493 = vrot.lane.b32.xlu2 %v6378_v6, %s5258_s17 }
 0xf14   : > { %3514 = vrot.lane.b32.xlu2 %v6402_v21, %s5259_s29 }
 0xf23   : > { %v3367_v55 = vpop.xlane.xlu2 %3366 }
 0xf24   : > { %v3373_v32 = vsub.f32 %v3332_v25, %v3367_v55 }
 0xf26   : > { %v3379_v5 = vmul.f32 1.442695, %v3373_v32 }
 0xf28   : > { %5033 = vpow2.f32 %v3379_v5 }
 0xf2e   : > { %v5034_v48 = vpop.eup %5033 }
 0xf2f   : > { %v3389_v3 = vsel %vm1016_vm15, %v5034_v48, 0.0 }
 0xf30   : > { %3390 = vadd.xlane.f32.xlu0 %v3389_v3 }
 0xf3c   : > { %v3361_v12 = vpop.xlane.xlu1 %3360 }
 0xf3d   : > { %v3371_v24 = vsub.f32 %v3286_v27, %v3361_v12 }
 0xf3f   : > { %v3375_v57 = vmul.f32 1.442695, %v3371_v24 }
 0xf41   : > { %5035 = vpow2.f32 %v3375_v57 }
 0xf44   : > { %3491 = vrot.lane.b32.xlu0 %v6378_v6, %s5259_s29 }
 0xf47   : > { %v5036_v17 = vpop.eup %5035 }
 0xf48   : > { %v3383_v15 = vsel %vm1016_vm15, %v5036_v17, 0.0 }
 0xf49   : > { %3384 = vadd.xlane.f32.xlu1 %v3383_v15 }
 0xf4f   : > { %v3364_v26 = vpop.xlane.xlu2 %3363 }
 0xf50   : > { %v3372_v36 = vsub.f32 %v3309_v51, %v3364_v26 }
 0xf52   : > { %v3377_v25 = vmul.f32 1.442695, %v3372_v36 }
 0xf54   : > { %5037 = vpow2.f32 %v3377_v25  ;;  %v3540_v55 = vpop.permute.xlu1 %3539 }
 0xf55   : > { %v3545_v3 = vsel %vm1016_vm15, %v3540_v55, 0 }
 0xf57   : > { %v3450_v32 = vpop.permute.xlu2 %3449 }
 0xf58   : > { %v3455_v5 = vsel %vm866_vm14, %v3450_v32, 0 }
 0xf59   : > { %3464 = vmatpush.bf16.msrb.mxu2 %v3455_v5 }
 0xf5a   : > { %v5038_v27 = vpop.eup %5037 }
 0xf5b   : > { %v3386_v12 = vsel %vm1016_vm15, %v5038_v27, 0.0 }
 0xf5c   : > { %3387 = vadd.xlane.f32.xlu1 %v3386_v12 }
 0xf5d   : > { %3554 = vmatpush.bf16.xpose.msra.mxu2 %v3545_v3  ;;  %v3370_v24 = vpop.xlane.xlu0 %3369 }
 0xf5e   : > { %v3374_v57 = vsub.f32 %v3355_v19, %v3370_v24 }
 0xf5f   : > { %v3408_v18 = vpop.permute.xlu2 %3407 }
 0xf60   : > { %v3381_v15 = vmul.f32 1.442695, %v3374_v57  ;;  %v3413_v51 = vsel %vm866_vm14, %v3408_v18, 0 }
 0xf61   : > { %3422 = vmatpush.bf16.msrb.mxu0 %v3413_v51 }
 0xf62   : > { %5039 = vpow2.f32 %v3381_v15 }
 0xf67   : > { %v3538_v36 = vpop.permute.xlu2 %3537 }
 0xf68   : > { %v5040_v26 = vpop.eup %5039 }
 0xf69   : > { %v3392_v25 = vsel %vm1016_vm15, %v5040_v26, 0.0 }
 0xf6a   : > { %3393 = vadd.xlane.f32.xlu1 %v3392_v25 }
 0xf6f   : > { %v3494_v55 = vpop.permute.xlu2 %3493 }
 0xf70   : > { %v3499_v32 = vsel %vm1016_vm15, %v3494_v55, 0  ;;  %v3561_v5 = vpop.permute.xlu0 %3560 }
 0xf71   : > { %3508 = vmatpush.bf16.xpose.msra.mxu0 %v3499_v32 }
 0xf83   : > { %3516 = vrot.lane.b32.xlu1 %v6402_v21, %s5258_s17  ;;  %s7089_s17 = sld [smem:[#allocation31_spill]] }
 0xf89   : > { %s7090_s29 = smov %s7089_s17  ;;  %s4493_s23 = scalar_lea.hbm %s7089_s17, %s4762_s26 }
 0xf8a   : > { %s5191_s27 = scalar_lea.hbm %s7090_s29, 64 }
 0xfa3   : > { %v3391_v19 = vpop.xlane.xlu0 %3390 }
 0xfa4   : > { %5041 = vrcp.f32 %v3391_v19 }
 0xfaa   : > { %v5042_v3 = vpop.eup %5041 }
 0xfab   : > { %v3401_v12 = vmul.f32 %v5042_v3, %v5034_v48 }
 0xfad   : > { %v3405_v18 = vpack.c.bf16 %v3401_v12, %v3401_v12 }
 0xfaf   : > { %4708 = vmatmul.msk.bf16.vlgmr.msrb.gmra.mxu2 %vm1016_vm15, %v3405_v18 }
 0xfb6   : > { %v3492_v32 = vpop.permute.xlu0 %3491 }
 0xfbc   : > { %v3385_v24 = vpop.xlane.xlu1 %3384 }
 0xfbd   : > { %5043 = vrcp.f32 %v3385_v24  ;;  %v3515_v24 = vpop.permute.xlu2 %3514 }
 0xfbf   : > { %4712 = vmatmul.msk.bf16.vlgmr.msra.gmra.mxu2 %vm1016_vm15, %v3538_v36 }
 0xfc3   : > { %v5044_v57 = vpop.eup %5043 }
 0xfc4   : > { %v3399_v15 = vmul.f32 %v5044_v57, %v5036_v17 }
 0xfc6   : > { %v3403_v51 = vpack.c.bf16 %v3399_v15, %v3399_v15 }
 0xfc8   : > { %4706 = vmatmul.msk.bf16.vlgmr.msrb.gmra.mxu0 %vm1016_vm15, %v3403_v51 }
 0xfcf   : > { %v3388_v25 = vpop.xlane.xlu1 %3387 }
 0xfd0   : > { %5045 = vrcp.f32 %v3388_v25 }
 0xfd6   : > { %v5046_v55 = vpop.eup %5045 }
 0xfd7   : > { %v3400_v38 = vmul.f32 %v5046_v55, %v5038_v27 }
 0xfd8   : > { %4710 = vmatmul.msk.bf16.vlgmr.msra.gmra.mxu0 %vm1016_vm15, %v3492_v32 }
 0xfd9   : > { %v3404_v48 = vpack.c.bf16 %v3400_v38, %v3400_v38 }
 0xfdb   : > { %4707 = vmatmul.msk.bf16.vlgmr.msrb.gmra.mxu1 %vm1016_vm15, %v3404_v48 }
 0xfdd   : > { %v3394_v19 = vpop.xlane.xlu1 %3393 }
 0xfde   : > { %5047 = vrcp.f32 %v3394_v19 }
 0xfe4   : > { %v5048_v3 = vpop.eup %5047 }
 0xfe5   : > { %v3402_v12 = vmul.f32 %v5048_v3, %v5040_v26 }
 0xfe7   : > { %v3406_v36 = vpack.c.bf16 %v3402_v12, %v3402_v12 }
 0xfe9   : > { %4709 = vmatmul.msk.bf16.vlgmr.msrb.gmra.mxu3 %vm1016_vm15, %v3406_v36 }
 0xff5   : > { %v3517_v17 = vpop.permute.xlu1 %3516 }
 0xff6   : > { %v3522_v18 = vsel %vm1016_vm15, %v3517_v17, 0 }
 0xff7   : > { %3531 = vmatpush.bf16.xpose.msra.mxu1 %v3522_v18 }
 0xff9   : > { %4713 = vmatmul.msk.bf16.vlgmr.msra.gmra.mxu3 %vm1016_vm15, %v3561_v5 }
 0xffe   : > { %4711 = vmatmul.msk.bf16.vlgmr.msra.gmra.mxu1 %vm1016_vm15, %v3515_v24 }
0x1032   : > { %v6611_v27 = vpop.f32.mrf.mxu2 }
0x103a   : > { %v3468_v38 = vpop.f32.mrf.mxu2 }
0x1042   : > { %v3556_v57 = vpop.f32.mrf.mxu2 }
0x1043   : > { %v3589_v15 = vsel %vm1016_vm15, %v3556_v57, -inf }
0x1044   : > { %3590 = vmax.xlane.f32.xlu1 %v3589_v15 }
0x1045   : > { %v6614_v26 = vpop.f32.mrf.mxu0 }
0x104a   : > { %v3558_v51 = vpop.f32.mrf.mxu2 }
0x104d   : > { %v3426_v25 = vpop.f32.mrf.mxu0 }
0x1055   : > { %v3510_v55 = vpop.f32.mrf.mxu0 }
0x1056   : > { %v3583_v32 = vsel %vm1016_vm15, %v3510_v55, -inf }
0x1057   : > { %3584 = vmax.xlane.f32.xlu2 %v3583_v32 }
0x1058   : > { %v3445_v48 = vpop.f32.mrf.mxu1 }
0x105d   : > { %v3512_v5 = vpop.f32.mrf.mxu0 }
0x1060   : > { %v3447_v19 = vpop.f32.mrf.mxu1 }
0x106c   : > { %v3487_v3 = vpop.f32.mrf.mxu3 }
0x106f   : > { %3673 = vrot.lane.b32.xlu2 %v6334_v23, %s5263_s30 }
0x1074   : > { %v3489_v12 = vpop.f32.mrf.mxu3 }
0x107b   : > { %v3533_v36 = vpop.f32.mrf.mxu1 }
0x107c   : > { %v3579_v17 = vpop.f32.mrf.mxu3  ;;  %v3586_v18 = vsel %vm1016_vm15, %v3533_v36, -inf }
0x107d   : > { %3587 = vmax.xlane.f32.xlu1 %v3586_v18  ;;  %v3592_v24 = vsel %vm1016_vm15, %v3579_v17, -inf }
0x107e   : > { %3593 = vmax.xlane.f32.xlu0 %v3592_v24 }
0x1083   : > { %v3535_v38 = vpop.f32.mrf.mxu1 }
0x1084   : > { %v3581_v15 = vpop.f32.mrf.mxu3 }
0x10b7   : > { %v3591_v18 = vpop.xlane.xlu1 %3590 }
0x10b8   : > { %v3597_v15 = vsub.f32 %v3556_v57, %v3591_v18 }
0x10ca   : > { %v3585_v51 = vpop.xlane.xlu2 %3584 }
0x10cb   : > { %v3595_v25 = vsub.f32 %v3510_v55, %v3585_v51 }
0x10cd   : > { %v3599_v32 = vmul.f32 1.442695, %v3595_v25 }
0x10cf   : > { %5049 = vpow2.f32 %v3599_v32  ;;  %v3603_v32 = vmul.f32 1.442695, %v3597_v15 }
0x10d2   : > { %v3674_v5 = vpop.permute.xlu2 %3673 }
0x10d3   : > { %v3679_v19 = vsel %vm866_vm14, %v3674_v5, 0 }
0x10d4   : > { %3688 = vmatpush.bf16.msrb.mxu2 %v3679_v19 }
0x10d5   : > { %v6622_v23 = vpop.eup %5049 }
0x10d6   : > { %v3607_v12 = vsel %vm1016_vm15, %v6622_v23, 0.0 }
0x10d7   : > { %3608 = vadd.xlane.f32.xlu1 %v3607_v12 }
0x10f0   : > { %v3588_v42 = vpop.xlane.xlu1 %3587  ;;  %3694 = vrot.lane.b32.xlu1 %v6341_v31, %s5263_s30 }
0x10f1   : > { %v3596_v24 = vsub.f32 %v3533_v36, %v3588_v42  ;;  %v3594_v38 = vpop.xlane.xlu0 %3593 }
0x10f2   : > { %v3598_v55 = vsub.f32 %v3579_v17, %v3594_v38 }
0x10f3   : > { %v3601_v51 = vmul.f32 1.442695, %v3596_v24 }
0x10f4   : > { %v3605_v25 = vmul.f32 1.442695, %v3598_v55 }
0x10f5   : > { %5051 = vpow2.f32 %v3601_v51 }
0x10f6   : > { %5053 = vpow2.f32 %v3605_v25 }
0x10f7   : > { %5055 = vpow2.f32 %v3603_v32 }
0x10f8   : > { %3847 = vrot.lane.b32.xlu1 %v6572_v7, %s5264_s11 }
0x10fb   : > { %v5052_v5 = vpop.eup %5051 }
0x10fc   : > { %v5054_v19 = vpop.eup %5053  ;;  %v3610_v12 = vsel %vm1016_vm15, %v5052_v5, 0.0 }
0x10fd   : > { %3611 = vadd.xlane.f32.xlu0 %v3610_v12  ;;  %v3616_v42 = vsel %vm1016_vm15, %v5054_v19, 0.0  ;;  %v5056_v31 = vpop.eup %5055 }
0x10fe   : > { %3617 = vadd.xlane.f32.xlu2 %v3616_v42  ;;  %v3613_v57 = vsel %vm1016_vm15, %v5056_v31, 0.0 }
0x1100   : > { %3841 = vrot.lane.b32.xlu1 %v6567_v45, %s5264_s11 }
0x1105   : > { %3614 = vadd.xlane.f32.xlu0 %v3613_v57 }
0x1108   : > { %3725 = vrot.lane.b32.xlu1 %v6048_v62, %s5264_s11 }
0x1110   : > { %3755 = vrot.lane.b32.xlu1 %v6262_v29, %s5265_s25 }
0x1116   : > { %3652 = vrot.lane.b32.xlu2 %v6402_v21, %s5263_s30 }
0x1118   : > { %3761 = vrot.lane.b32.xlu1 %v6217_v59, %s5265_s25 }
0x1119   : > { %3631 = vrot.lane.b32.xlu0 %v6378_v6, %s5263_s30 }
0x111e   : > { %3861 = vrot.lane.b32.xlu2 %v6611_v27, %s5265_s25 }
0x1120   : > { %3791 = vrot.lane.b32.xlu1 %v6437_v47, %s5266_s2 }
0x1121   : > { %3845 = vrot.lane.b32.xlu0 %v6564_v60, %s5264_s11 }
0x1126   : > { %3843 = vrot.lane.b32.xlu2 %v6570_v16, %s5264_s11 }
0x1129   : > { %3863 = vrot.lane.b32.xlu0 %v3487_v3, %s5265_s25 }
0x112e   : > { %3857 = vrot.lane.b32.xlu2 %v6614_v26, %s5265_s25 }
0x1131   : > { %3859 = vrot.lane.b32.xlu0 %v3445_v48, %s5265_s25 }
0x1136   : > { %3727 = vrot.lane.b32.xlu2 %v6041_v50, %s5264_s11 }
0x1139   : > { %3723 = vrot.lane.b32.xlu0 %v6043_v14, %s5264_s11 }
0x113e   : > { %3757 = vrot.lane.b32.xlu2 %v6267_v56, %s5265_s25 }
0x1141   : > { %3729 = vrot.lane.b32.xlu0 %v6033_v52, %s5264_s11 }
0x1146   : > { %3787 = vrot.lane.b32.xlu2 %v6439_v58, %s5266_s2 }
0x1149   : > { %3759 = vrot.lane.b32.xlu0 %v6258_v54, %s5265_s25 }
0x114a   : > { %v3609_v50 = vpop.xlane.xlu1 %3608 }
0x114e   : > { %3793 = vrot.lane.b32.xlu2 %v6441_v8, %s5266_s2 }
0x1151   : > { %3789 = vrot.lane.b32.xlu0 %v6435_v28, %s5266_s2 }
0x1162   : > { %v3695_v14 = vpop.permute.xlu1 %3694 }
0x1163   : > { %v3700_v62 = vsel %vm866_vm14, %v3695_v14, 0 }
0x1164   : > { %3709 = vmatpush.bf16.msrb.mxu3 %v3700_v62 }
0x1170   : > { %v3612_v59 = vpop.xlane.xlu0 %3611 }
0x1171   : > { %5057 = vrcp.f32 %v3612_v59  ;;  %v3618_v52 = vpop.xlane.xlu2 %3617 }
0x1172   : > { %5059 = vrcp.f32 %v3618_v52 }
0x1177   : > { %v5058_v29 = vpop.eup %5057 }
0x1178   : > { %v5060_v56 = vpop.eup %5059  ;;  %v3624_v6 = vmul.f32 %v5058_v29, %v5052_v5  ;;  %v3615_v21 = vpop.xlane.xlu0 %3614 }
0x1179   : > { %v3626_v54 = vmul.f32 %v5060_v56, %v5054_v19  ;;  %5061 = vrcp.f32 %v3615_v21  ;;  %v3653_v47 = vpop.permute.xlu2 %3652 }
0x117a   : > { %v3658_v58 = vsel %vm866_vm14, %v3653_v47, 0  ;;  %v3628_v28 = vpack.c.bf16 %v3624_v6, %v3624_v6  ;;  %5063 = vrcp.f32 %v3609_v50 }
0x117b   : > { %v3630_v8 = vpack.c.bf16 %v3626_v54, %v3626_v54  ;;  %3667 = vmatpush.bf16.msrb.mxu1 %v3658_v58 }
0x117d   : > { %4717 = vmatmul.msk.bf16.vlgmr.msrb.gmra.mxu3 %vm1016_vm15, %v3630_v8 }
0x117e   : > { %4715 = vmatmul.msk.bf16.vlgmr.msrb.gmra.mxu1 %vm1016_vm15, %v3628_v28 }
0x117f   : > { %v5062_v60 = vpop.eup %5061 }
0x1180   : > { %v3625_v45 = vmul.f32 %v5062_v60, %v5056_v31  ;;  %v5064_v7 = vpop.eup %5063 }
0x1181   : > { %v3623_v27 = vmul.f32 %v5064_v7, %v6622_v23 }
0x1182   : > { %v3629_v16 = vpack.c.bf16 %v3625_v45, %v3625_v45 }
0x1183   : > { %v3627_v3 = vpack.c.bf16 %v3623_v27, %v3623_v27 }
0x1184   : > { %4716 = vmatmul.msk.bf16.vlgmr.msrb.gmra.mxu2 %vm1016_vm15, %v3629_v16 }
0x118b   : > { %v3632_v26 = vpop.permute.xlu0 %3631 }
0x118c   : > { %v3637_v48 = vsel %vm866_vm14, %v3632_v26, 0 }
0x118d   : > { %3646 = vmatpush.bf16.msrb.mxu0 %v3637_v48 }
0x1190   : > { %4714 = vmatmul.msk.bf16.vlgmr.msrb.gmra.mxu0 %vm1016_vm15, %v3627_v3 }
0x11fb   : > { %v3669_v36 = vpop.f32.mrf.mxu1 }
0x11fc   : > { %3875 = vrot.lane.b32.xlu2 %v3669_v36, %s5266_s2 }
0x1200   : > { %v3711_v17 = vpop.f32.mrf.mxu3 }
0x1203   : > { %v3671_v18 = vpop.f32.mrf.mxu1 }
0x1204   : > { %3735 = vrot.lane.b32.xlu2 %v6057_v49, %s5264_s11  ;;  %v3846_v49 = vpop.permute.xlu0 %3845 }
0x1205   : > { %v3887_v14 = vsel %vm1016_vm15, %v6501_v1, %v3846_v49 }
0x1207   : > { %v3690_v24 = vpop.f32.mrf.mxu2 }
0x1208   : > { %v3713_v38 = vpop.f32.mrf.mxu3  ;;  %3877 = vrot.lane.b32.xlu0 %v3690_v24, %s5266_s2 }
0x120c   : > { %3765 = vrot.lane.b32.xlu2 %v6311_v0, %s5265_s25  ;;  %v3864_v0 = vpop.permute.xlu0 %3863 }
0x120d   : > { %v3648_v23 = vpop.f32.mrf.mxu0 }
0x120e   : > { %3873 = vrot.lane.b32.xlu1 %v3648_v23, %s5266_s2 }
0x120f   : > { %v3692_v55 = vpop.f32.mrf.mxu2 }
0x1210   : > { %3731 = vrot.lane.b32.xlu0 %v6053_v46, %s5264_s11  ;;  %v3862_v46 = vpop.permute.xlu2 %3861 }
0x1211   : > { %v3891_v62 = vsel %vm3819_vm5, %v3887_v14, %v3862_v46 }
0x1214   : > { %3795 = vrot.lane.b32.xlu2 %v6447_v34, %s5266_s2 }
0x1215   : > { %v3650_v15 = vpop.f32.mrf.mxu0 }
0x1216   : > { %3879 = vrot.lane.b32.xlu1 %v3711_v17, %s5266_s2 }
0x1218   : > { %3737 = vrot.lane.b32.xlu0 %v6059_v11, %s5264_s11  ;;  %v3844_v11 = vpop.permute.xlu2 %3843 }
0x1219   : > { %v3886_v21 = vsel %vm1016_vm15, %v6512_v35, %v3844_v11 }
0x121c   : > { %3801 = vrot.lane.b32.xlu2 %v6449_v30, %s5266_s2  ;;  %v3860_v30 = vpop.permute.xlu0 %3859 }
0x121d   : > { %v3890_v47 = vsel %vm3819_vm5, %v3886_v21, %v3860_v30 }
0x121e   : > { %3733 = vrot.lane.b32.xlu1 %v6070_v20, %s5264_s11  ;;  %v3848_v20 = vpop.permute.xlu1 %3847  ;;  %s4494_s11 = sshll.u32 %s435_s1, 4  ;;  %s4495_s11 = int_to_ptr.vmem [resolvable:$true] %s4494_s11 }
0x121f   : > { %v3888_v28 = vsel %vm1016_vm15, %v6503_v33, %v3848_v20 }
0x1220   : > { %3767 = vrot.lane.b32.xlu0 %v6301_v61, %s5265_s25  ;;  %v3858_v34 = vpop.permute.xlu2 %3857  ;;  %v3892_v45 = vsel %vm3819_vm5, %v3888_v28, %v3864_v0 }
0x1224   : > { %v3724_v25 = vpop.permute.xlu0 %3723 }
0x1225   : > { %v3811_v18 = vsel %vm1016_vm15, %v5889_v44, %v3724_v25 }
0x1226   : > { %3763 = vrot.lane.b32.xlu1 %v6270_v13, %s5265_s25  ;;  %v3842_v61 = vpop.permute.xlu1 %3841 }
0x1227   : > { %v3885_v52 = vsel %vm1016_vm15, %v6499_v10, %v3842_v61 }
0x1228   : > { %3797 = vrot.lane.b32.xlu0 %v6443_v2, %s5266_s2  ;;  %v3728_v51 = vpop.permute.xlu2 %3727  ;;  %v3889_v56 = vsel %vm3819_vm5, %v3885_v52, %v3858_v34 }
0x1229   : > { %v3813_v33 = vsel %vm1016_vm15, %v5875_v43, %v3728_v51 }
0x122c   : > { %v3730_v5 = vpop.permute.xlu0 %3729 }
0x122d   : > { %v3814_v38 = vsel %vm1016_vm15, %v5881_v22, %v3730_v5 }
0x122e   : > { %3769 = vrot.lane.b32.xlu1 %v6303_v9, %s5265_s25  ;;  %v3726_v13 = vpop.permute.xlu1 %3725  ;;  %s4496_s25 = sshll.u32 %s4493_s23, 4  ;;  %s4497_s25 = int_to_ptr.hbm [resolvable:$true] %s4496_s25 }
0x122f   : > { %v3812_v61 = vsel %vm1016_vm15, %v5871_v4, %v3726_v13 }
0x1230   : > { %v3758_v32 = vpop.permute.xlu2 %3757 }
0x1234   : > { %v3760_v12 = vpop.permute.xlu0 %3759 }
0x1235   : > { %v3822_v49 = vsel %vm3819_vm5, %v3813_v33, %v3760_v12 }
0x1236   : > { %3799 = vrot.lane.b32.xlu1 %v6445_v41, %s5266_s2  ;;  %v3756_v2 = vpop.permute.xlu1 %3755  ;;  %s5185_s2 = sshra.s32 %s4497_s25, 4  ;;  %s5186_s2 = int_to_ptr.hbm [resolvable:$true] %s5185_s2 }
0x1237   : > { %v3820_v20 = vsel %vm3819_vm5, %v3811_v18, %v3756_v2  ;;  %s5187_s28 = scalar_lea.hbm %s5186_s2, 32  ;;  %p5192_p0 = scmp.lt.s32.totalorder %s5186_s2, %s7090_s29 }
0x1238   : > { %v3788_v19 = vpop.permute.xlu2 %3787  ;;  %p5188_p4 = scmp.ne.s32.totalorder %s5186_s2, %s5187_s28  ;;  %p5193_p7 = scmp.lt.s32.totalorder %s5191_s27, %s5187_s28 }
0x123a   : > { %p5189_p6 = pnand %p5188_p4, %p5380_p11  ;;  %p5194_p5 = por %p5193_p7, %p5192_p0 }
0x123c   : > { %v6709_v31 = vpop.permute.xlu0 %3789  ;;  %p5190_p13 = pneg %p5189_p6 }
0x123e   : > { %v3762_v9 = vpop.permute.xlu1 %3761  ;;  %p5195_p8 = pnand %p5194_p5, %p5190_p13 }
0x123f   : > { %v3823_v44 = vsel %vm3819_vm5, %v3814_v38, %v3762_v9  ;;  %v3829_v9 = vsel %vm3828_vm6, %v3820_v20, %v3788_v19 }
0x1240   : > { %v3794_v42 = vpop.permute.xlu2 %3793 }
0x1246   : > { %v3792_v57 = vpop.permute.xlu1 %3791 }
0x1247   : > { %v3831_v51 = vsel %vm3828_vm6, %v3822_v49, %v3792_v57 }
0x1256   : > { %v3876_v41 = vpop.permute.xlu2 %3875 }
0x1257   : > { %v3894_v8 = vsel %vm3828_vm6, %v3890_v47, %v3876_v41 }
0x1258   : > { %v3911_v16 = vrot.slane %v3894_v8, 4 }
0x125e   : > { %v6722_v54 = vpop.permute.xlu2 %3735 }
0x1266   : > { %v3766_v23 = vpop.permute.xlu2 %3765 }
0x127a   : > { %v3878_v50 = vpop.permute.xlu0 %3877 }
0x127b   : > { %v3895_v29 = vsel %vm3828_vm6, %v3891_v62, %v3878_v50  ;;  %v3832_v50 = vsel %vm3828_vm6, %v3823_v44, %v3794_v42  ;;  %v3796_v42 = vpop.permute.xlu2 %3795 }
0x127c   : > { %v3897_v58 = vrot.slane %v3895_v29, 4 }
0x1280   : > { %v3874_v59 = vpop.permute.xlu1 %3873 }
0x1281   : > { %v3893_v1 = vsel %vm3828_vm6, %v3889_v56, %v3874_v59 }
0x1282   : > { %v6718_v6 = vpop.permute.xlu0 %3731  ;;  %v3898_v10 = vsel %vm920_vm4, %v3897_v58, %v3893_v1  ;;  %v3899_v60 = vrot.slane %v3893_v1, 4 }
0x1283   : > { %v3904_v35 = vperm.slane %v3898_v10, %v6221_v39  ;;  %v7077_v10 = vld [vmem:[#allocation22_spill] sm:$0xff] }
0x1284   : > { %v3900_v36 = vsel %vm920_vm4, %v3895_v29, %v3899_v60 }
0x1285   : > { %v3923_v55 = vrot.slane %v3904_v35, 4  ;;  %v3908_v11 = vperm.slane %v3900_v36, %v6221_v39 }
0x1287   : > { %v3935_v62 = vrot.slane %v3908_v11, 4 }
0x1288   : > { %v3880_v7 = vpop.permute.xlu1 %3879 }
0x1289   : > { %v3896_v27 = vsel %vm3828_vm6, %v3892_v45, %v3880_v7  ;;  %v7078_v45 = vld [vmem:[#allocation26_spill] sm:$0xff] }
0x128a   : > { %v3909_v26 = vrot.slane %v3896_v27, 4  ;;  %v3912_v48 = vsel %vm920_vm4, %v3896_v27, %v3911_v16  ;;  %v6734_v3 = vpop.permute.xlu0 %3737 }
0x128b   : > { %v3920_v17 = vperm.slane %v3912_v48, %v6221_v39 }
0x128c   : > { %v3910_v24 = vsel %vm920_vm4, %v3909_v26, %v3894_v8 }
0x128d   : > { %v3916_v15 = vperm.slane %v3910_v24, %v6221_v39  ;;  %v3933_v46 = vrot.slane %v3920_v17, 4  ;;  %v3821_v39 = vsel %vm3819_vm5, %v3812_v61, %v3758_v32  ;;  %v3936_v19 = vsel %vm920_vm4, %v3920_v17, %v3935_v62 }
0x128e   : > { %v3830_v32 = vsel %vm3828_vm6, %v3821_v39, %v6709_v31  ;;  %v3815_v31 = vsel %vm1016_vm15, %v5893_v53, %v6718_v6  ;;  %v3944_v53 = vperm.slane %v3936_v19, %v6227_v40  ;;  %v7079_v6 = vld [vmem:[#allocation23_spill] sm:$0xff]  ;;  %v7087_v19 = vld [vmem:[#allocation18_spill] sm:$0xff] }
0x128f   : > { %v3921_v0 = vrot.slane %v3916_v15, 4  ;;  %v3924_v43 = vsel %vm920_vm4, %v3916_v15, %v3923_v55  ;;  %v3934_v22 = vsel %vm920_vm4, %v3933_v46, %v3908_v11  ;;  %v7082_v46 = vld [vmem:[#allocation21_spill] sm:$0xff] }
0x1290   : > { %v3932_v34 = vperm.slane %v3924_v43, %v6227_v40  ;;  %v3734_v30 = vpop.permute.xlu1 %3733  ;;  %v3940_v14 = vperm.slane %v3934_v22, %v6227_v40  ;;  %v3951_v38 = vrot.slane %v3944_v53, 4 }
0x1291   : > { %v3922_v25 = vsel %vm920_vm4, %v3921_v0, %v3904_v35  ;;  %v3816_v58 = vsel %vm1016_vm15, %v5897_v63, %v3734_v30  ;;  %v3802_v0 = vpop.permute.xlu2 %3801 }
0x1292   : > { %v3928_v5 = vperm.slane %v3922_v25, %v6227_v40  ;;  %v3947_v12 = vrot.slane %v3932_v34, 4  ;;  %v3955_v2 = vadd.f32 %v3932_v34, %v3831_v51  ;;  %v6759_v41 = vpop.permute.xlu0 %3767  ;;  %v3949_v8 = vrot.slane %v3940_v14, 4  ;;  %v7081_v40 = vld [vmem:[#allocation27_spill] sm:$0xff]  ;;  %v7083_v25 = vld [vmem:[#allocation28_spill] sm:$0xff] }
0x1293   : > { %v3825_v35 = vsel %vm3819_vm5, %v3816_v58, %v3766_v23  ;;  %v7080_v23 = vld [vmem:[#allocation20_spill] sm:$0xff]  ;;  %v3818_v15 = vsel %vm1016_vm15, %v7081_v40, %v6734_v3  ;;  %v3952_v34 = vsel %vm920_vm4, 0.0, %v3951_v38  ;;  %v3817_v39 = vsel %vm1016_vm15, %v7083_v25, %v6722_v54 }
0x1294   : > { %v3945_v4 = vrot.slane %v3928_v5, 4  ;;  %v3948_v13 = vsel %vm920_vm4, 0.0, %v3947_v12  ;;  %v3953_v57 = vadd.f32 %v3928_v5, %v3829_v9  ;;  %v3963_v59 = vmul.f32 0.5, %v3955_v2  ;;  %v7084_v5 = vld [vmem:[#allocation25_spill] sm:$0xff] }
0x1295   : > { %v3956_v52 = vadd.f32 %v3948_v13, %v3832_v50  ;;  %v3950_v36 = vsel %vm920_vm4, 0.0, %v3949_v8  ;;  %v3826_v2 = vsel %vm3819_vm5, %v3817_v39, %v6759_v41 }
0x1296   : > { %v3946_v29 = vsel %vm920_vm4, 0.0, %v3945_v4  ;;  %v3961_v56 = vmul.f32 0.5, %v3953_v57  ;;  %v6769_v21 = vadd.f32 %v3963_v59, %v5603_v37  ;;  %v7085_v57 = vld [vmem:[#allocation24_spill] sm:$0xff]  ;;  %vm4472_vm4 = vcmask 257024  }
0x1297   : > { %v3954_v1 = vadd.f32 %v3946_v29, %v3830_v32  ;;  %v3964_v47 = vmul.f32 0.5, %v3956_v52  ;;  %v7086_v52 = vld [vmem:[#allocation17_spill] sm:$0xff] }
0x1298   : > { %v6778_v28 = vadd.f32 %v3961_v56, %v7077_v10  ;;  %3991 = vst [vmem:[#allocation1 + $0x10] ss:$2 sm:$0xff] %v6769_v21  ;;  %v3764_v37 = vpop.permute.xlu1 %3763 }
0x1299   : > { %v3962_v60 = vmul.f32 0.5, %v3954_v1  ;;  %v6782_v16 = vadd.f32 %v3964_v47, %v7078_v45  ;;  %v3824_v7 = vsel %vm3819_vm5, %v3815_v31, %v3764_v37  ;;  %v7088_v1 = vld [vmem:[#allocation19_spill] sm:$0xff] }
0x129a   : > { %3987 = vst [vmem:[#allocation1] ss:$2 sm:$0xff] %v6778_v28  ;;  %v3833_v63 = vsel %vm3828_vm6, %v3824_v7, %v3796_v42  ;;  %v3798_v27 = vpop.permute.xlu0 %3797 }
0x129b   : > { %v6790_v26 = vadd.f32 %v3962_v60, %v7079_v6  ;;  %3993 = vst [vmem:[#allocation1 + $0x11] ss:$2 sm:$0xff] %v6782_v16  ;;  %v3957_v48 = vadd.f32 %v3940_v14, %v3833_v63  ;;  %v3834_v17 = vsel %vm3828_vm6, %v3825_v35, %v3798_v27 }
0x129c   : > { %v3958_v33 = vadd.f32 %v3950_v36, %v3834_v17 }
0x129d   : > { %3989 = vst [vmem:[#allocation1 + $0x1] ss:$2 sm:$0xff] %v6790_v26  ;;  %v3965_v18 = vmul.f32 0.5, %v3957_v48 }
0x129e   : > { %v3966_v24 = vmul.f32 0.5, %v3958_v33 }
0x129f   : > { %v6797_v55 = vadd.f32 %v3965_v18, %v7080_v23 }
0x12a0   : > { %v6803_v49 = vadd.f32 %v3966_v24, %v7082_v46  ;;  %v3770_v11 = vpop.permute.xlu1 %3769 }
0x12a1   : > { %3995 = vst [vmem:[#allocation1 + $0x20] ss:$2 sm:$0xff] %v6797_v55  ;;  %v3827_v43 = vsel %vm3819_vm5, %v3818_v15, %v3770_v11 }
0x12a2   : > { %3997 = vst [vmem:[#allocation1 + $0x21] ss:$2 sm:$0xff] %v6803_v49  ;;  %v3836_v20 = vsel %vm3828_vm6, %v3827_v43, %v3802_v0  ;;  %v4003_v44 = vld.sshfl [vmem:[#allocation1 + $0x10] sm:$0xff pattern:$0x75316420] }
0x12a3   : > { %v4013_v30 = vsel %vm478_vm0, %v4003_v44, 0.0  ;;  %v3960_v22 = vadd.f32 %v3952_v34, %v3836_v20 }
0x12a4   : > { %4014 = vadd.xlane.f32.xlu1 %v4013_v30  ;;  %v4002_v3 = vld.sshfl [vmem:[#allocation1] sm:$0xff pattern:$0x75316420] }
0x12a5   : > { %v4010_v61 = vsel %vm478_vm0, %v4002_v3, 0.0  ;;  %v3968_v51 = vmul.f32 0.5, %v3960_v22 }
0x12a6   : > { %4011 = vadd.xlane.f32.xlu0 %v4010_v61 }
0x12a7   : > { %v6816_v12 = vadd.f32 %v3968_v51, %v7084_v5 }
0x12a8   : > { %v3800_v9 = vpop.permute.xlu1 %3799 }
0x12a9   : > { %v3835_v50 = vsel %vm3828_vm6, %v3826_v2, %v3800_v9  ;;  %4001 = vst [vmem:[#allocation1 + $0x31] ss:$2 sm:$0xff] %v6816_v12  ;;  %v4004_v14 = vld.sshfl [vmem:[#allocation1 + $0x20] sm:$0xff pattern:$0x75316420] }
0x12aa   : > { %v3959_v62 = vadd.f32 %v3944_v53, %v3835_v50  ;;  %v4016_v4 = vsel %vm478_vm0, %v4004_v14, 0.0  ;;  %v4757_v50 = vld [vmem:[%s7024_s7 + $0x8] sm:$0xff] }
0x12ab   : > { %4017 = vadd.xlane.f32.xlu2 %v4016_v4  ;;  %4320 = vmatpush.bf16.msra.mxu0 %v4757_v50 }
0x12ac   : > { %v3967_v13 = vmul.f32 0.5, %v3959_v62 }
0x12ae   : > { %v6824_v59 = vadd.f32 %v3967_v13, %v7085_v57  ;;  %v4756_v13 = vld [vmem:[%s7024_s7] sm:$0xff] }
0x12af   : > { %4321 = vmatpush.bf16.msra.mxu0 %v4756_v13 }
0x12b0   : > { %3999 = vst [vmem:[#allocation1 + $0x30] ss:$2 sm:$0xff] %v6824_v59 }
0x12b7   : > { %v4005_v54 = vld.sshfl [vmem:[#allocation1 + $0x30] sm:$0xff pattern:$0x75316420] }
0x12b8   : > { %v4019_v32 = vsel %vm478_vm0, %v4005_v54, 0.0 }
0x12b9   : > { %4020 = vadd.xlane.f32.xlu0 %v4019_v32 }
0x1317   : > { %v4015_v41 = vpop.xlane.xlu1 %4014 }
0x1318   : > { %v4023_v29 = vmul.f32 %v4015_v41, %v7086_v52 }
0x1319   : > { %v4012_v56 = vpop.xlane.xlu0 %4011 }
0x131a   : > { %v4041_v42 = vperm.slane %v4023_v29, %v7087_v19  ;;  %v4045_v47 = vperm.slane %v4023_v29, %v7088_v1  ;;  %v4022_v58 = vmul.f32 %v4012_v56, %v7086_v52 }
0x131c   : > { %v6833_v8 = vsub.f32 %v6769_v21, %v4041_v42  ;;  %v6836_v31 = vsub.f32 %v6782_v16, %v4045_v47  ;;  %v4033_v10 = vperm.slane %v4022_v58, %v7087_v19  ;;  %v4037_v37 = vperm.slane %v4022_v58, %v7088_v1 }
0x131e   : > { %v4080_v60 = vmul.f32 %v6833_v8, %v6833_v8  ;;  %v4081_v45 = vmul.f32 %v6836_v31, %v6836_v31  ;;  %v6845_v7 = vsub.f32 %v6778_v28, %v4033_v10  ;;  %v6848_v63 = vsub.f32 %v6790_v26, %v4037_v37  ;;  %v4018_v35 = vpop.xlane.xlu2 %4017 }
0x131f   : > { %v4024_v27 = vmul.f32 %v4018_v35, %v7086_v52  ;;  %v6901_v35 = vld [vmem:[%s7023_s6] ss:$0 sm:$0xff] }
0x1320   : > { %4098 = vst [vmem:[#allocation1 + $0x10] ss:$2 sm:$0xff] %v4080_v60  ;;  %v4078_v53 = vmul.f32 %v6845_v7, %v6845_v7  ;;  %v4079_v6 = vmul.f32 %v6848_v63, %v6848_v63  ;;  %v6896_v60 = vld [vmem:[%s7022_s5] ss:$0 sm:$0xff] }
0x1321   : > { %4100 = vst [vmem:[#allocation1 + $0x11] ss:$2 sm:$0xff] %v4081_v45  ;;  %v4049_v48 = vperm.slane %v4024_v27, %v7087_v19  ;;  %v4053_v36 = vperm.slane %v4024_v27, %v7088_v1 }
0x1322   : > { %4094 = vst [vmem:[#allocation1] ss:$2 sm:$0xff] %v4078_v53 }
0x1323   : > { %4096 = vst [vmem:[#allocation1 + $0x1] ss:$2 sm:$0xff] %v4079_v6  ;;  %v6858_v17 = vsub.f32 %v6797_v55, %v4049_v48  ;;  %v6861_v33 = vsub.f32 %v6803_v49, %v4053_v36 }
0x1325   : > { %v4082_v18 = vmul.f32 %v6858_v17, %v6858_v17  ;;  %v4083_v24 = vmul.f32 %v6861_v33, %v6861_v33 }
0x1327   : > { %4102 = vst [vmem:[#allocation1 + $0x20] ss:$2 sm:$0xff] %v4082_v18 }
0x1328   : > { %4104 = vst [vmem:[#allocation1 + $0x21] ss:$2 sm:$0xff] %v4083_v24  ;;  %v4110_v38 = vld.sshfl [vmem:[#allocation1 + $0x10] sm:$0xff pattern:$0x75316420] }
0x1329   : > { %v4120_v23 = vsel %vm478_vm0, %v4110_v38, 0.0  ;;  %v6905_v38 = vrot.slane %v6896_v60, 4 }
0x132a   : > { %4121 = vadd.xlane.f32.xlu2 %v4120_v23  ;;  %v4109_v40 = vld.sshfl [vmem:[#allocation1] sm:$0xff pattern:$0x75316420] }
0x132b   : > { %v4117_v15 = vsel %vm478_vm0, %v4109_v40, 0.0 }
0x132c   : > { %4118 = vadd.xlane.f32.xlu1 %v4117_v15  ;;  %v4021_v46 = vpop.xlane.xlu0 %4020 }
0x132d   : > { %v4025_v11 = vmul.f32 %v4021_v46, %v7086_v52  ;;  %v6910_v46 = vrot.slane %v6901_v35, 4 }
0x132f   : > { %v4057_v0 = vperm.slane %v4025_v11, %v7087_v19  ;;  %v4061_v43 = vperm.slane %v4025_v11, %v7088_v1  ;;  %v4111_v20 = vld.sshfl [vmem:[#allocation1 + $0x20] sm:$0xff pattern:$0x75316420] }
0x1330   : > { %v4123_v44 = vsel %vm478_vm0, %v4111_v20, 0.0 }
0x1331   : > { %v6874_v34 = vsub.f32 %v6824_v59, %v4057_v0  ;;  %v6877_v30 = vsub.f32 %v6816_v12, %v4061_v43  ;;  %4124 = vadd.xlane.f32.xlu0 %v4123_v44 }
0x1333   : > { %v4084_v22 = vmul.f32 %v6874_v34, %v6874_v34  ;;  %v4085_v3 = vmul.f32 %v6877_v30, %v6877_v30 }
0x1335   : > { %4106 = vst [vmem:[#allocation1 + $0x30] ss:$2 sm:$0xff] %v4084_v22 }
0x1336   : > { %4108 = vst [vmem:[#allocation1 + $0x31] ss:$2 sm:$0xff] %v4085_v3 }
0x133d   : > { %v4112_v61 = vld.sshfl [vmem:[#allocation1 + $0x30] sm:$0xff pattern:$0x75316420] }
0x133e   : > { %v4126_v51 = vsel %vm478_vm0, %v4112_v61, 0.0 }
0x133f   : > { %4127 = vadd.xlane.f32.xlu1 %v4126_v51 }
0x139d   : > { %v4122_v25 = vpop.xlane.xlu2 %4121 }
0x139e   : > { %v4130_v39 = vmul.f32 %v4122_v25, %v7086_v52 }
0x139f   : > { %v4119_v5 = vpop.xlane.xlu1 %4118 }
0x13a0   : > { %v4134_v2 = vadd.f32 1e-06, %v4130_v39  ;;  %v4129_v9 = vmul.f32 %v4119_v5, %v7086_v52 }
0x13a2   : > { %5065 = vrsqrt.f32 %v4134_v2  ;;  %v4133_v14 = vadd.f32 1e-06, %v4129_v9  ;;  %vm4153_vm8 = vweird.f32 %v4134_v2 }
0x13a4   : > { %5067 = vrsqrt.f32 %v4133_v14  ;;  %v4125_v62 = vpop.xlane.xlu0 %4124  ;;  %vm4143_vm11 = vweird.f32 %v4133_v14 }
0x13a5   : > { %v4131_v4 = vmul.f32 %v4125_v62, %v7086_v52 }
0x13a7   : > { %v4135_v57 = vadd.f32 1e-06, %v4131_v4 }
0x13a8   : > { %v5066_v54 = vpop.eup %5065 }
0x13a9   : > { %v4148_v32 = vmul.f32 %v5066_v54, %v4134_v2  ;;  %5069 = vrsqrt.f32 %v4135_v57  ;;  %vm4154_vm7 = vweird.f32 %v5066_v54  ;;  %vm4163_vm14 = vweird.f32 %v4135_v57 }
0x13aa   : > { %v5068_v41 = vpop.eup %5067  ;;  %vm4155_vm10 = vmor %vm4153_vm8, %vm4154_vm7 }
0x13ab   : > { %v4149_v29 = vmul.f32 %v5066_v54, %v4148_v32  ;;  %v4138_v56 = vmul.f32 %v5068_v41, %v4133_v14  ;;  %vm4144_vm9 = vweird.f32 %v5068_v41 }
0x13ac   : > { %vm4145_vm12 = vmor %vm4143_vm11, %vm4144_vm9 }
0x13ad   : > { %v4150_v42 = vmul.f32 0.5, %v4149_v29  ;;  %v4139_v47 = vmul.f32 %v5068_v41, %v4138_v56 }
0x13af   : > { %v5070_v58 = vpop.eup %5069  ;;  %v4151_v10 = vsub.f32 1.5, %v4150_v42  ;;  %v4140_v37 = vmul.f32 0.5, %v4139_v47 }
0x13b0   : > { %v4158_v45 = vmul.f32 %v5070_v58, %v4135_v57  ;;  %vm4164_vm13 = vweird.f32 %v5070_v58 }
0x13b1   : > { %v4152_v27 = vmul.f32 %v5066_v54, %v4151_v10  ;;  %v4141_v53 = vsub.f32 1.5, %v4140_v37  ;;  %vm4165_vm15 = vmor %vm4163_vm14, %vm4164_vm13 }
0x13b2   : > { %v4159_v6 = vmul.f32 %v5070_v58, %v4158_v45  ;;  %v4128_v48 = vpop.xlane.xlu1 %4127 }
0x13b3   : > { %v4156_v36 = vsel %vm4155_vm10, %v5066_v54, %v4152_v27  ;;  %v4142_v18 = vmul.f32 %v5068_v41, %v4141_v53  ;;  %v4132_v24 = vmul.f32 %v4128_v48, %v7086_v52 }
0x13b4   : > { %v4192_v23 = vperm.slane %v4156_v36, %v7087_v19  ;;  %v4196_v40 = vperm.slane %v4156_v36, %v7088_v1  ;;  %v4160_v15 = vmul.f32 0.5, %v4159_v6 }
0x13b5   : > { %v4146_v11 = vsel %vm4145_vm12, %v5068_v41, %v4142_v18  ;;  %v4136_v0 = vadd.f32 1e-06, %v4132_v24 }
0x13b6   : > { %v4223_v43 = vmul.f32 %v4192_v23, %v6833_v8  ;;  %v4224_v20 = vmul.f32 %v4196_v40, %v6836_v31  ;;  %v4184_v52 = vperm.slane %v4146_v11, %v7087_v19  ;;  %v4188_v44 = vperm.slane %v4146_v11, %v7088_v1 }
0x13b7   : > { %v4161_v22 = vsub.f32 1.5, %v4160_v15  ;;  %5071 = vrsqrt.f32 %v4136_v0  ;;  %vm4173_vm2 = vweird.f32 %v4136_v0 }
0x13b8   : > { %v4236_v3 = vmul.f32 %v6896_v60, %v4223_v43  ;;  %v4237_v61 = vmul.f32 %v6905_v38, %v4224_v20  ;;  %v4221_v51 = vmul.f32 %v4184_v52, %v6845_v7  ;;  %v4222_v25 = vmul.f32 %v4188_v44, %v6848_v63 }
0x13b9   : > { %v4162_v39 = vmul.f32 %v5070_v58, %v4161_v22 }
0x13ba   : > { %v4249_v8 = vadd.f32 %v6901_v35, %v4236_v3  ;;  %v4250_v31 = vadd.f32 %v6910_v46, %v4237_v61  ;;  %v4234_v5 = vmul.f32 %v6896_v60, %v4221_v51  ;;  %v4235_v2 = vmul.f32 %v6905_v38, %v4222_v25 }
0x13bb   : > { %v4166_v9 = vsel %vm4165_vm15, %v5070_v58, %v4162_v39 }
0x13bc   : > { %4267 = vst [vmem:[#allocation1 + $0x10] ss:$2 sm:$0xff] %v4249_v8  ;;  %v4247_v50 = vadd.f32 %v6901_v35, %v4234_v5  ;;  %v4248_v14 = vadd.f32 %v6910_v46, %v4235_v2  ;;  %v4200_v7 = vperm.slane %v4166_v9, %v7087_v19  ;;  %v4204_v63 = vperm.slane %v4166_v9, %v7088_v1 }
0x13bd   : > { %v5072_v62 = vpop.eup %5071  ;;  %4269 = vst [vmem:[#allocation1 + $0x11] ss:$2 sm:$0xff] %v4250_v31 }
0x13be   : > { %4263 = vst [vmem:[#allocation1] ss:$2 sm:$0xff] %v4247_v50  ;;  %v4225_v4 = vmul.f32 %v4200_v7, %v6858_v17  ;;  %v4226_v13 = vmul.f32 %v4204_v63, %v6861_v33  ;;  %v4168_v57 = vmul.f32 %v5072_v62, %v4136_v0  ;;  %vm4174_vm1 = vweird.f32 %v5072_v62 }
0x13bf   : > { %4265 = vst [vmem:[#allocation1 + $0x1] ss:$2 sm:$0xff] %v4248_v14  ;;  %vm4175_vm3 = vmor %vm4173_vm2, %vm4174_vm1 }
0x13c0   : > { %v4238_v54 = vmul.f32 %v6896_v60, %v4225_v4  ;;  %v4239_v32 = vmul.f32 %v6905_v38, %v4226_v13  ;;  %v4169_v41 = vmul.f32 %v5072_v62, %v4168_v57 }
0x13c2   : > { %v4251_v29 = vadd.f32 %v6901_v35, %v4238_v54  ;;  %v4252_v56 = vadd.f32 %v6910_v46, %v4239_v32  ;;  %v4170_v42 = vmul.f32 0.5, %v4169_v41 }
0x13c4   : > { %4271 = vst [vmem:[#allocation1 + $0x20] ss:$2 sm:$0xff] %v4251_v29  ;;  %v4171_v47 = vsub.f32 1.5, %v4170_v42  ;;  %v4279_v58 = vld.sshfl [vmem:[#allocation1 + $0x10] sm:$0xff pattern:$0x75316420] }
0x13c5   : > { %4273 = vst [vmem:[#allocation1 + $0x21] ss:$2 sm:$0xff] %v4252_v56 }
0x13c6   : > { %v4172_v17 = vmul.f32 %v5072_v62, %v4171_v47  ;;  %v4278_v33 = vld.sshfl [vmem:[#allocation1] sm:$0xff pattern:$0x75316420]  ;;  %4437 = vst [vmem:[#allocation1 + $0x10] ss:$2 sm:$0xff] %v6769_v21 }
0x13c7   : > { %v4286_v10 = vpack.c.bf16 %v4279_v58, %v4278_v33  ;;  %4433 = vst [vmem:[#allocation1] ss:$2 sm:$0xff] %v6778_v28 }
0x13c8   : > { %v4176_v37 = vsel %vm4175_vm3, %v5072_v62, %v4172_v17  ;;  %4435 = vst [vmem:[#allocation1 + $0x1] ss:$2 sm:$0xff] %v6790_v26 }
0x13c9   : > { %v4208_v45 = vperm.slane %v4176_v37, %v7087_v19  ;;  %v4212_v27 = vperm.slane %v4176_v37, %v7088_v1  ;;  %4726 = vmatmul.msk.bf16.vlgmr.msra.gmra.mxu0 %vm478_vm0, %v4286_v10  ;;  %4439 = vst [vmem:[#allocation1 + $0x11] ss:$2 sm:$0xff] %v6782_v16  ;;  %v4862_v10 = vld [vmem:[%s7027_s10] ss:$0 sm:$0xff] }
0x13cb   : > { %v4227_v53 = vmul.f32 %v4208_v45, %v6874_v34  ;;  %v4228_v6 = vmul.f32 %v4212_v27, %v6877_v30  ;;  %v4861_v34 = vld [vmem:[%s7025_s8] ss:$0 sm:$0xff] }
0x13cc   : > { %v4280_v21 = vld.sshfl [vmem:[#allocation1 + $0x20] sm:$0xff pattern:$0x75316420] }
0x13cd   : > { %v4240_v48 = vmul.f32 %v6896_v60, %v4227_v53  ;;  %v4241_v28 = vmul.f32 %v6905_v38, %v4228_v6  ;;  %4441 = vst [vmem:[#allocation1 + $0x20] ss:$2 sm:$0xff] %v6797_v55  ;;  %v4761_v55 = vld [vmem:[%s7026_s9 + $0x18] sm:$0xff] }
0x13ce   : > { %4443 = vst [vmem:[#allocation1 + $0x21] ss:$2 sm:$0xff] %v6803_v49  ;;  %4418 = vmatpush.bf16.msra.mxu1 %v4761_v55  ;;  %v4760_v49 = vld [vmem:[%s7026_s9 + $0x10] sm:$0xff] }
0x13cf   : > { %v4253_v26 = vadd.f32 %v6901_v35, %v4240_v48  ;;  %v4254_v19 = vadd.f32 %v6910_v46, %v4241_v28  ;;  %v4758_v35 = vld [vmem:[%s7026_s9] sm:$0xff] }
0x13d0   : > { %v4448_v27 = vld.sshfl [vmem:[#allocation1] sm:$0xff pattern:$0x75316420]  ;;  %v4449_v28 = vld.sshfl [vmem:[#allocation1 + $0x10] sm:$0xff pattern:$0x75316420] }
0x13d1   : > { %4275 = vst [vmem:[#allocation1 + $0x30] ss:$2 sm:$0xff] %v4253_v26 }
0x13d2   : > { %4277 = vst [vmem:[#allocation1 + $0x31] ss:$2 sm:$0xff] %v4254_v19  ;;  %4419 = vmatpush.bf16.msra.mxu1 %v4760_v49 }
0x13d5   : > { %v4450_v55 = vld.sshfl [vmem:[#allocation1 + $0x20] sm:$0xff pattern:$0x75316420] }
0x13d9   : > { %v4281_v16 = vld.sshfl [vmem:[#allocation1 + $0x30] sm:$0xff pattern:$0x75316420] }
0x13da   : > { %v4287_v1 = vpack.c.bf16 %v4281_v16, %v4280_v21  ;;  %4445 = vst [vmem:[#allocation1 + $0x30] ss:$2 sm:$0xff] %v6824_v59 }
0x13db   : > { %4447 = vst [vmem:[#allocation1 + $0x31] ss:$2 sm:$0xff] %v6816_v12  ;;  %v4759_v12 = vld [vmem:[%s7026_s9 + $0x8] sm:$0xff] }
0x13dc   : > { %4727 = vmatmul.msk.bf16.gmra.mxu0 %vm478_vm0, %v4287_v1  ;;  %4420 = vmatpush.bf16.msra.mxu1 %v4759_v12  ;;  %vm4407_vm0 = vcmask 523264  }
0x13e0   : > { %4421 = vmatpush.bf16.msra.mxu1 %v4758_v35 }
0x1446   : > { %v4323_v59 = vpop.f32.mrf.mxu0 }
0x1447   : > { %v4324_v30 = vadd.f32 %v4861_v34, %v4323_v59 }
0x1449   : > { %v4333_v60 = vmul.f32 %v4324_v30, %v4324_v30 }
0x144b   : > { %v4337_v36 = vmul.f32 %v4333_v60, %v4324_v30 }
0x144d   : > { %v4341_v18 = vmul.f32 0.044715, %v4337_v36 }
0x144e   : > { %v4325_v24 = vpop.f32.mrf.mxu0 }
0x144f   : > { %v4345_v38 = vadd.f32 %v4341_v18, %v4324_v30  ;;  %v4326_v23 = vadd.f32 %v4861_v34, %v4325_v24 }
0x1451   : > { %v4349_v40 = vmul.f32 0.7978846, %v4345_v38  ;;  %v4334_v15 = vmul.f32 %v4326_v23, %v4326_v23 }
0x1453   : > { %v4338_v46 = vmul.f32 %v4334_v15, %v4326_v23  ;;  %5073 = vtanh.f32 %v4349_v40 }
0x1455   : > { %v4342_v11 = vmul.f32 0.044715, %v4338_v46 }
0x1457   : > { %v4346_v0 = vadd.f32 %v4342_v11, %v4326_v23 }
0x1459   : > { %v4350_v43 = vmul.f32 0.7978846, %v4346_v0  ;;  %v4328_v20 = vpop.f32.mrf.mxu0  ;;  %v5074_v44 = vpop.eup %5073 }
0x145a   : > { %v4329_v52 = vadd.f32 %v4861_v34, %v4328_v20  ;;  %v4357_v3 = vadd.f32 1.0, %v5074_v44 }
0x145b   : > { %5075 = vtanh.f32 %v4350_v43 }
0x145c   : > { %v4335_v22 = vmul.f32 %v4329_v52, %v4329_v52  ;;  %v4361_v8 = vmul.f32 0.5, %v4357_v3 }
0x145e   : > { %v4339_v61 = vmul.f32 %v4335_v22, %v4329_v52  ;;  %v4365_v7 = vmul.f32 %v4361_v8, %v4324_v30  ;;  %v4451_v30 = vld.sshfl [vmem:[#allocation1 + $0x30] sm:$0xff pattern:$0x75316420] }
0x1460   : > { %v4343_v51 = vmul.f32 0.044715, %v4339_v61 }
0x1461   : > { %v5076_v25 = vpop.eup %5075  ;;  %v4330_v39 = vpop.f32.mrf.mxu0 }
0x1462   : > { %v4358_v31 = vadd.f32 1.0, %v5076_v25  ;;  %v4347_v5 = vadd.f32 %v4343_v51, %v4329_v52  ;;  %v4331_v2 = vadd.f32 %v4861_v34, %v4330_v39 }
0x1464   : > { %v4362_v9 = vmul.f32 0.5, %v4358_v31  ;;  %v4351_v50 = vmul.f32 0.7978846, %v4347_v5  ;;  %v4336_v14 = vmul.f32 %v4331_v2, %v4331_v2 }
0x1466   : > { %v4366_v63 = vmul.f32 %v4362_v9, %v4326_v23  ;;  %v4340_v62 = vmul.f32 %v4336_v14, %v4331_v2  ;;  %5077 = vtanh.f32 %v4351_v50 }
0x1468   : > { %v4369_v4 = vpack.c.bf16 %v4366_v63, %v4365_v7  ;;  %v4344_v13 = vmul.f32 0.044715, %v4340_v62 }
0x146a   : > { %v4348_v57 = vadd.f32 %v4344_v13, %v4331_v2  ;;  %4744 = vmatmul.msk.bf16.vlgmr.msra.gmra.mxu1 %vm4407_vm0, %v4369_v4 }
0x146c   : > { %v4352_v54 = vmul.f32 0.7978846, %v4348_v57  ;;  %v5078_v32 = vpop.eup %5077 }
0x146d   : > { %v4359_v41 = vadd.f32 1.0, %v5078_v32 }
0x146e   : > { %5079 = vtanh.f32 %v4352_v54 }
0x146f   : > { %v4363_v56 = vmul.f32 0.5, %v4359_v41 }
0x1471   : > { %v4367_v58 = vmul.f32 %v4363_v56, %v4329_v52 }
0x1474   : > { %v5080_v29 = vpop.eup %5079 }
0x1475   : > { %v4360_v42 = vadd.f32 1.0, %v5080_v29 }
0x1477   : > { %v4364_v47 = vmul.f32 0.5, %v4360_v42 }
0x1479   : > { %v4368_v17 = vmul.f32 %v4364_v47, %v4331_v2 }
0x147b   : > { %v4370_v33 = vpack.c.bf16 %v4368_v17, %v4367_v58 }
0x147d   : > { %4745 = vmatmul.msk.bf16.gmra.mxu1 %vm4407_vm0, %v4370_v33 }
0x14e7   : > { %v4423_v37 = vpop.f32.mrf.mxu1 }
0x14e8   : > { %v4424_v45 = vadd.f32 %v4862_v10, %v4423_v37 }
0x14ea   : > { %v4456_v53 = vadd.f32 %v4448_v27, %v4424_v45 }
0x14ec   : > { %v4464_v6 = vrot.slane %v4456_v53, 4  ;;  %4473 = vst.msk [vmem:[%s435_s1] sm:$0xf] %vm4472_vm4, %v4456_v53 }
0x14ee   : > { %4474 = vst.msk [vmem:[%s435_s1 + $0x4] sm:$0xf] %vm4472_vm4, %v4464_v6 }
0x14ef   : > { %v4425_v21 = vpop.f32.mrf.mxu1 }
0x14f0   : > { %v4426_v48 = vadd.f32 %v4862_v10, %v4425_v21 }
0x14f2   : > { %v4457_v26 = vadd.f32 %v4449_v28, %v4426_v48 }
0x14f4   : > { %v4465_v19 = vrot.slane %v4457_v26, 4  ;;  %4475 = vst.msk [vmem:[%s435_s1 + $0x8] sm:$0xf] %vm4472_vm4, %v4457_v26 }
0x14f6   : > { %4476 = vst.msk [vmem:[%s435_s1 + $0xc] sm:$0xf] %vm4472_vm4, %v4465_v19 }
0x14fa   : > { %v4428_v16 = vpop.f32.mrf.mxu1 }
0x14fb   : > { %v4429_v1 = vadd.f32 %v4862_v10, %v4428_v16 }
0x14fd   : > { %v4458_v49 = vadd.f32 %v4450_v55, %v4429_v1 }
0x14ff   : > { %v4466_v34 = vrot.slane %v4458_v49, 4  ;;  %4477 = vst.msk [vmem:[%s435_s1 + $0x10] sm:$0xf] %vm4472_vm4, %v4458_v49 }
0x1501   : > { %4478 = vst.msk [vmem:[%s435_s1 + $0x14] sm:$0xf] %vm4472_vm4, %v4466_v34 }
0x1502   : > { %v4430_v12 = vpop.f32.mrf.mxu1 }
0x1503   : > { %v4431_v59 = vadd.f32 %v4862_v10, %v4430_v12 }
0x1505   : > { %v4459_v60 = vadd.f32 %v4451_v30, %v4431_v59 }
0x1507   : > { %v4467_v35 = vrot.slane %v4459_v60, 4  ;;  %4479 = vst.msk [vmem:[%s435_s1 + $0x18] sm:$0xf] %vm4472_vm4, %v4459_v60 }
0x1509   : > { %4480 = vst.msk [vmem:[%s435_s1 + $0x1c] sm:$0xf] %vm4472_vm4, %v4467_v35 }
0x150a   : > { %5198 = shalt.err (!%p5195_p8)
}
0x150b   : > { %s5267_s16 = smov 4  }
0x150c   : > { %4777 = dma.vmem_to_hbm [thread:$0]  (%p5380_p11), %s4495_s11, 512, %s4497_s25, %s4482_s21, %s5251_s13, %s5251_s13, %s5267_s16  }
0x150d PF: > { %s7092_s1 = sld [smem:[#allocation12_spill]]  ;;  %p7094_p9 = scmp.ge.s32.totalorder %s5241_s20, 2 }
0x150f   : > { %p4791_p10 = pnand %p7094_p9, %p5384_p12 }
0x1511   : > { %p4792_p1 = pneg %p4791_p10 }
0x1513   : > { %s4511_s14 = sand.u32 1, %s7092_s1  }
0x1514   : > { %s4512_s17 = scalar_lea.sflag [#allocation4], %s4511_s14 }
0x1515   : > { %5224 = dma.done.wait (%p4792_p1), %s4512_s17, 512  }
0x1516   : > { %5226 = vsyncadd (%p4792_p1), %s4512_s17, 4294966784  ;;  %s7095_s20 = sld [smem:[#allocation13_spill]]  ;;  %s7097_s17 = smov %s5233_s18 }
0x1517   : > { %s7096_s23 = sld [smem:[#allocation14_spill]]  ;;  %s7098_s18 = smov %s5237_s19 }
0x151c   : > { %p25_p2 = scmp.ge.s32.totalorder %s7095_s20, 4  }
0x151d   : > { %s7099_s19 = smov %s7096_s23 }
0x151e   :  { %27 = sbr.rel (!%p25_p2) target bundleno = 10 (0xa), region = 173 }
0x1523   :  { %4518 = vsyncpa [#allocation3], 1 }
0x1524   :  { %4520 = vsyncpa [#allocation3 + $0x1], 1 }
0x1525   :  { %4521 = vsyncpa [#allocation6], 1 }
0x1526   :  { %4522 = vsyncpa [#allocation4], 1 }
0x1527   :  { %4524 = vsyncpa [#allocation4 + $0x1], 1 }

</bundles_post_ra>
